<compile_context>
chip_gen: v6e
topology: v6e:2x2x1
jax: 0.10.0
libtpu: 0.0.40
codegen_flags: <defaults>
</compile_context>

<pallas_src>
import math
import jax
import jax.numpy as jnp
import numpy as np
from jax.experimental import pallas as pl
from jax.experimental.pallas import tpu as pltpu


def rcab_kernel(x_ref, w1_ref, b1_ref, w2_ref, b2_ref,
                wd_ref, bd_ref, wu_ref, bu_ref,
                o_ref, pad_ref):
    # x_ref    : (1, H, W, C) VMEM block (one batch element), f32
    # w1/w2    : (9*C, C) fused conv weights in matmul dtype (tap-major rows)
    # wd/wu    : (C, Cr) / (Cr, C) CALayer 1x1-conv weights, f32 (tiny)
    # pad_ref  : (H+2, W+2, C) zero-padded image scratch in matmul dtype
    H, W, C = x_ref.shape[1], x_ref.shape[2], x_ref.shape[3]
    HW = H * W

    # Zero only the 1-pixel border; the interior is fully overwritten by every
    # conv.  Done every grid step (4 thin stripes, cheap) instead of once under
    # pl.when(program_id == 0), which would break on megacore chips where the
    # "parallel" batch axis is split and one core never sees program_id == 0.
    zrow = jnp.zeros((1, W + 2, C), dtype=pad_ref.dtype)
    zcol = jnp.zeros((H + 2, 1, C), dtype=pad_ref.dtype)
    pad_ref[pl.ds(0, 1), :, :] = zrow
    pad_ref[pl.ds(H + 1, 1), :, :] = zrow
    pad_ref[:, pl.ds(0, 1), :] = zcol
    pad_ref[:, pl.ds(W + 1, 1), :] = zcol

    def conv3x3(inp_hwc, w_ref, b_ref):
        # Single interior store (cast to the matmul dtype here, not at dot time).
        pad_ref[pl.ds(1, H), pl.ds(1, W), :] = inp_hwc.astype(pad_ref.dtype)
        # 9 accumulating MXU matmuls with K=C; the LHS of each is a shifted
        # view of the padded image -- no im2col copies at all.
        acc = jnp.zeros((HW, C), jnp.float32)
        for dy in range(3):
            for dx in range(3):
                t = dy * 3 + dx
                lhs = pad_ref[pl.ds(dy, H), pl.ds(dx, W), :].reshape(HW, C)
                acc = acc + jnp.dot(lhs, w_ref[pl.ds(t * C, C), :],
                                    preferred_element_type=jnp.float32)
        return acc + b_ref[...]                                     # (HW, C) f32

    # body: conv -> ReLU -> conv  (f32 accumulation throughout)
    h1 = jnp.maximum(conv3x3(x_ref[0], w1_ref, b1_ref), 0.0)        # (HW, C)
    h2 = conv3x3(h1.reshape(H, W, C), w2_ref, b2_ref)               # (HW, C)

    # CALayer: global average pool -> 1x1 conv -> ReLU -> 1x1 conv -> sigmoid
    y = jnp.sum(h2, axis=0, keepdims=True) * (1.0 / HW)             # (1, C)
    z = jnp.maximum(
        jnp.dot(y, wd_ref[...], preferred_element_type=jnp.float32) + bd_ref[...],
        0.0)                                                         # (1, Cr)
    s = jax.nn.sigmoid(
        jnp.dot(z, wu_ref[...], preferred_element_type=jnp.float32) + bu_ref[...])

    # channel attention + residual add (x re-read from VMEM, not held live)
    out = (h2 * s).reshape(H, W, C) + x_ref[0]
    o_ref[0] = out.astype(o_ref.dtype)


def _vmem_limit_bytes(C, H, W, Cr, matmul_dtype):
    """Explicit scoped-VMEM request: double-buffered (1,H,W,C) f32 in/out
    blocks + double-buffered weights + the pad scratch, with headroom."""
    f32 = 4
    mm = jnp.dtype(matmul_dtype).itemsize
    blk = H * W * C * f32
    wts = 2 * 9 * C * C * mm + (C * Cr + Cr * C + 3 * C + Cr) * f32
    pad = (H + 2) * (W + 2) * C * mm
    est = 2 * 2 * blk + 2 * wts + pad
    est = int(1.5 * est) + (1 << 20)
    # Clamp to [32 MiB, 64 MiB]: keeps pipelining alive without exceeding the
    # smallest physical VMEM (v7x has 64 MiB per TensorCore).
    return min(64 * 1024 * 1024, max(32 * 1024 * 1024, est))


def rcab_forward(x_nchw, params, matmul_dtype=jnp.bfloat16):
    """Pallas RCAB forward.  x_nchw: (N, C, H, W) float32 (PyTorch layout).

    matmul_dtype: dtype of the conv-matmul operands (weights + padded image).
    Default bf16 (~3x MXU throughput, ~1e-2 relative error); accumulation is
    f32 either way.  Pass jnp.float32 for bit-accurate-ish results.
    """
    w1, b1, w2, b2, wd, bd, wu, bu = params
    N, C, H, W = x_nchw.shape
    Cr = wd.shape[1]
    assert w1.shape == (3, 3, C, C) and w2.shape == (3, 3, C, C), \
        "RCAB requires in_channel == inter_channel"
    sub = 8 if jnp.dtype(matmul_dtype).itemsize == 4 else 16
    assert W % sub == 0, \
        f"W must be a multiple of {sub} for layout-preserving reshapes"

    x = jnp.transpose(x_nchw, (0, 2, 3, 1))          # -> NHWC
    # pre-fuse conv weights to the tap-major layout: (3,3,Cin,Cout) -> (9*Cin,Cout)
    w1f = w1.reshape(9 * C, C).astype(matmul_dtype)
    w2f = w2.reshape(9 * C, C).astype(matmul_dtype)

    out = pl.pallas_call(
        rcab_kernel,
        out_shape=jax.ShapeDtypeStruct((N, H, W, C), x.dtype),
        grid_spec=pltpu.PrefetchScalarGridSpec(
            num_scalar_prefetch=0,
            grid=(N,),                                # one batch element / step
            in_specs=[
                pl.BlockSpec((1, H, W, C), lambda n: (n, 0, 0, 0)),   # x
                pl.BlockSpec((9 * C, C),   lambda n: (0, 0)),         # w1 fused
                pl.BlockSpec((1, C),       lambda n: (0, 0)),         # b1
                pl.BlockSpec((9 * C, C),   lambda n: (0, 0)),         # w2 fused
                pl.BlockSpec((1, C),       lambda n: (0, 0)),         # b2
                pl.BlockSpec((C, Cr),      lambda n: (0, 0)),         # wd
                pl.BlockSpec((1, Cr),      lambda n: (0, 0)),         # bd
                pl.BlockSpec((Cr, C),      lambda n: (0, 0)),         # wu
                pl.BlockSpec((1, C),       lambda n: (0, 0)),         # bu
            ],
            out_specs=pl.BlockSpec((1, H, W, C), lambda n: (n, 0, 0, 0)),
            scratch_shapes=[
                pltpu.VMEM((H + 2, W + 2, C), matmul_dtype),   # padded image
            ],
        ),
        compiler_params=pltpu.CompilerParams(
            dimension_semantics=("parallel",),
            vmem_limit_bytes=_vmem_limit_bytes(C, H, W, Cr, matmul_dtype)),
    )(x, w1f, b1, w2f, b2, wd, bd, wu, bu)

    return jnp.transpose(out, (0, 3, 1, 2))           # back to NCHW


def init_params(key, C, reduction=1, ksize=3):
    """Deterministic parameter init matching the module's __init__ recipe:
    xavier_normal_(gain=sqrt(2)) for weights, constant 0.01 for biases."""
    Cr = C // reduction
    k1, k2, k3, k4 = jax.random.split(key, 4)
    gain = math.sqrt(2.0)

    def xavier(k, shape, fan_in, fan_out):
        std = gain * math.sqrt(2.0 / (fan_in + fan_out))
        return (std * jax.random.normal(k, shape)).astype(jnp.float32)

    # conv weights stored as (kH, kW, Cin, Cout)
    w1 = xavier(k1, (ksize, ksize, C, C), C * ksize * ksize, C * ksize * ksize)
    w2 = xavier(k2, (ksize, ksize, C, C), C * ksize * ksize, C * ksize * ksize)
    wd = xavier(k3, (C, Cr), C, Cr)          # 1x1 conv fans
    wu = xavier(k4, (Cr, C), Cr, C)
    b1 = jnp.full((1, C), 0.01, jnp.float32)
    b2 = jnp.full((1, C), 0.01, jnp.float32)
    bd = jnp.full((1, Cr), 0.01, jnp.float32)
    bu = jnp.full((1, C), 0.01, jnp.float32)
    return w1, b1, w2, b2, wd, bd, wu, bu


def rcab_reference(x_nchw, params):
    """Pure-JAX reference (same math, XLA convs) for a correctness check."""
    w1, b1, w2, b2, wd, bd, wu, bu = params
    x = jnp.transpose(x_nchw, (0, 2, 3, 1))

    def conv(inp, w, b):
        out = jax.lax.conv_general_dilated(
            inp, w, window_strides=(1, 1), padding="SAME",
            dimension_numbers=("NHWC", "HWIO", "NHWC"))
        return out + b.reshape(1, 1, 1, -1)

    h1 = jax.nn.relu(conv(x, w1, b1))
    h2 = conv(h1, w2, b2)
    y = jnp.mean(h2, axis=(1, 2), keepdims=True)                     # (N,1,1,C)
    z = jax.nn.relu(jnp.einsum("nijc,cr->nijr", y, wd) + bd.reshape(1, 1, 1, -1))
    s = jax.nn.sigmoid(jnp.einsum("nijr,rc->nijc", z, wu) + bu.reshape(1, 1, 1, -1))
    res = h2 * s + x
    return jnp.transpose(res, (0, 3, 1, 2))


if __name__ == "__main__":
    # smallest RCAB in the network is RCAB(32, 32) (CAB1 / CAB12), reduction=1
    N, C, H, W = 2, 32, 16, 16
    key = jax.random.PRNGKey(0)
    kx, kp = jax.random.split(key)
    x = jax.random.normal(kx, (N, C, H, W), dtype=jnp.float32)
    params = init_params(kp, C, reduction=1, ksize=3)

    ref = jax.block_until_ready(rcab_reference(x, params))

    # f32-operand path: tight correctness check against the XLA reference
    out_f32 = jax.block_until_ready(
        rcab_forward(x, params, matmul_dtype=jnp.float32))
    np.testing.assert_allclose(np.asarray(out_f32), np.asarray(ref),
                               atol=1e-3, rtol=1e-3)

    # default bf16-operand / f32-accumulation path (the performance path)
    out_bf16 = jax.block_until_ready(rcab_forward(x, params))
    np.testing.assert_allclose(np.asarray(out_bf16), np.asarray(ref),
                               atol=1e-1, rtol=1e-1)

    print("KERNEL_OK")
</pallas_src>

<mosaic_0001>
module attributes {stable_mosaic.version = 11 : i64} {
  func.func @rcab_kernel(%arg0: i32, %arg1: memref<1x16x16x32xf32, #tpu.memory_space<vmem>>, %arg2: memref<288x32xf32, #tpu.memory_space<vmem>>, %arg3: memref<1x32xf32, #tpu.memory_space<vmem>>, %arg4: memref<288x32xf32, #tpu.memory_space<vmem>>, %arg5: memref<1x32xf32, #tpu.memory_space<vmem>>, %arg6: memref<32x32xf32, #tpu.memory_space<vmem>>, %arg7: memref<1x32xf32, #tpu.memory_space<vmem>>, %arg8: memref<32x32xf32, #tpu.memory_space<vmem>>, %arg9: memref<1x32xf32, #tpu.memory_space<vmem>>, %arg10: memref<1x16x16x32xf32, #tpu.memory_space<vmem>>, %arg11: memref<18x18x32xf32, #tpu.memory_space<vmem>>) attributes {dimension_semantics = [#tpu.dimension_semantics<parallel>], iteration_bounds = array<i64: 2>, scalar_prefetch = 0 : i64, scratch_operands = 1 : i64, tpu.core_type = #tpu.core_type<tc>, window_params = [{transform_indices = @transform_0, window_bounds = array<i64: 1, 16, 16, 32>}, {pipeline_mode = #tpu.pipeline_mode<synchronous>, transform_indices = @transform_1, window_bounds = array<i64: 288, 32>}, {pipeline_mode = #tpu.pipeline_mode<synchronous>, transform_indices = @transform_2, window_bounds = array<i64: 1, 32>}, {pipeline_mode = #tpu.pipeline_mode<synchronous>, transform_indices = @transform_3, window_bounds = array<i64: 288, 32>}, {pipeline_mode = #tpu.pipeline_mode<synchronous>, transform_indices = @transform_4, window_bounds = array<i64: 1, 32>}, {pipeline_mode = #tpu.pipeline_mode<synchronous>, transform_indices = @transform_5, window_bounds = array<i64: 32, 32>}, {pipeline_mode = #tpu.pipeline_mode<synchronous>, transform_indices = @transform_6, window_bounds = array<i64: 1, 32>}, {pipeline_mode = #tpu.pipeline_mode<synchronous>, transform_indices = @transform_7, window_bounds = array<i64: 32, 32>}, {pipeline_mode = #tpu.pipeline_mode<synchronous>, transform_indices = @transform_8, window_bounds = array<i64: 1, 32>}, {transform_indices = @transform_9, window_bounds = array<i64: 1, 16, 16, 32>}]} {
    %cst = arith.constant 0.000000e+00 : f32
    %0 = vector.broadcast %cst : f32 to vector<1x18x32xf32>
    %cst_0 = arith.constant 0.000000e+00 : f32
    %1 = vector.broadcast %cst_0 : f32 to vector<18x1x32xf32>
    %c0 = arith.constant 0 : index
    %c0_1 = arith.constant 0 : index
    %c0_2 = arith.constant 0 : index
    %2 = vector.load %arg11[%c0, %c0_1, %c0_2] : memref<18x18x32xf32, #tpu.memory_space<vmem>>, vector<1x18x32xf32>
    tpu.vector_store %arg11[%c0, %c0_1, %c0_2], %0 {strides = array<i32>} : memref<18x18x32xf32, #tpu.memory_space<vmem>>, vector<1x18x32xf32>,
    %c17 = arith.constant 17 : index
    %c0_3 = arith.constant 0 : index
    %c0_4 = arith.constant 0 : index
    %3 = vector.load %arg11[%c17, %c0_3, %c0_4] : memref<18x18x32xf32, #tpu.memory_space<vmem>>, vector<1x18x32xf32>
    tpu.vector_store %arg11[%c17, %c0_3, %c0_4], %0 {strides = array<i32>} : memref<18x18x32xf32, #tpu.memory_space<vmem>>, vector<1x18x32xf32>,
    %c0_5 = arith.constant 0 : index
    %c0_6 = arith.constant 0 : index
    %c0_7 = arith.constant 0 : index
    %4 = vector.load %arg11[%c0_5, %c0_6, %c0_7] : memref<18x18x32xf32, #tpu.memory_space<vmem>>, vector<18x1x32xf32>
    tpu.vector_store %arg11[%c0_5, %c0_6, %c0_7], %1 {strides = array<i32>} : memref<18x18x32xf32, #tpu.memory_space<vmem>>, vector<18x1x32xf32>,
    %c0_8 = arith.constant 0 : index
    %c17_9 = arith.constant 17 : index
    %c0_10 = arith.constant 0 : index
    %5 = vector.load %arg11[%c0_8, %c17_9, %c0_10] : memref<18x18x32xf32, #tpu.memory_space<vmem>>, vector<18x1x32xf32>
    tpu.vector_store %arg11[%c0_8, %c17_9, %c0_10], %1 {strides = array<i32>} : memref<18x18x32xf32, #tpu.memory_space<vmem>>, vector<18x1x32xf32>,
    %c0_11 = arith.constant 0 : index
    %c0_12 = arith.constant 0 : index
    %c0_13 = arith.constant 0 : index
    %c0_14 = arith.constant 0 : index
    %6 = vector.load %arg1[%c0_11, %c0_12, %c0_13, %c0_14] : memref<1x16x16x32xf32, #tpu.memory_space<vmem>>, vector<1x16x16x32xf32>
    %7 = vector.shape_cast %6 : vector<1x16x16x32xf32> to vector<16x16x32xf32>
    %c1 = arith.constant 1 : index
    %c1_15 = arith.constant 1 : index
    %c0_16 = arith.constant 0 : index
    %8 = vector.load %arg11[%c1, %c1_15, %c0_16] : memref<18x18x32xf32, #tpu.memory_space<vmem>>, vector<16x16x32xf32>
    tpu.vector_store %arg11[%c1, %c1_15, %c0_16], %7 {strides = array<i32>} : memref<18x18x32xf32, #tpu.memory_space<vmem>>, vector<16x16x32xf32>,
    %cst_17 = arith.constant 0.000000e+00 : f32
    %9 = vector.broadcast %cst_17 : f32 to vector<256x32xf32>
    %c0_18 = arith.constant 0 : index
    %c0_19 = arith.constant 0 : index
    %c0_20 = arith.constant 0 : index
    %10 = vector.load %arg11[%c0_18, %c0_19, %c0_20] : memref<18x18x32xf32, #tpu.memory_space<vmem>>, vector<16x16x32xf32>
    %11 = vector.shape_cast %10 : vector<16x16x32xf32> to vector<256x32xf32>
    %c0_21 = arith.constant 0 : index
    %c0_22 = arith.constant 0 : index
    %12 = vector.load %arg2[%c0_21, %c0_22] : memref<288x32xf32, #tpu.memory_space<vmem>>, vector<32x32xf32>
    %cst_23 = arith.constant dense<0.000000e+00> : vector<256x32xf32>
    %13 = tpu.matmul %11, %12, %cst_23 {dimension_numbers = #tpu.dot_dimension_numbers<[1], [0], [0], [1], [0, 0, 1, 1], [], []>} : vector<256x32xf32>, vector<32x32xf32>, vector<256x32xf32> -> vector<256x32xf32>
    %14 = arith.addf %9, %13 : vector<256x32xf32>
    %c0_24 = arith.constant 0 : index
    %c1_25 = arith.constant 1 : index
    %c0_26 = arith.constant 0 : index
    %15 = vector.load %arg11[%c0_24, %c1_25, %c0_26] : memref<18x18x32xf32, #tpu.memory_space<vmem>>, vector<16x16x32xf32>
    %16 = vector.shape_cast %15 : vector<16x16x32xf32> to vector<256x32xf32>
    %c32 = arith.constant 32 : index
    %c0_27 = arith.constant 0 : index
    %17 = vector.load %arg2[%c32, %c0_27] : memref<288x32xf32, #tpu.memory_space<vmem>>, vector<32x32xf32>
    %cst_28 = arith.constant dense<0.000000e+00> : vector<256x32xf32>
    %18 = tpu.matmul %16, %17, %cst_28 {dimension_numbers = #tpu.dot_dimension_numbers<[1], [0], [0], [1], [0, 0, 1, 1], [], []>} : vector<256x32xf32>, vector<32x32xf32>, vector<256x32xf32> -> vector<256x32xf32>
    %19 = arith.addf %14, %18 : vector<256x32xf32>
    %c0_29 = arith.constant 0 : index
    %c2 = arith.constant 2 : index
    %c0_30 = arith.constant 0 : index
    %20 = vector.load %arg11[%c0_29, %c2, %c0_30] : memref<18x18x32xf32, #tpu.memory_space<vmem>>, vector<16x16x32xf32>
    %21 = vector.shape_cast %20 : vector<16x16x32xf32> to vector<256x32xf32>
    %c64 = arith.constant 64 : index
    %c0_31 = arith.constant 0 : index
    %22 = vector.load %arg2[%c64, %c0_31] : memref<288x32xf32, #tpu.memory_space<vmem>>, vector<32x32xf32>
    %cst_32 = arith.constant dense<0.000000e+00> : vector<256x32xf32>
    %23 = tpu.matmul %21, %22, %cst_32 {dimension_numbers = #tpu.dot_dimension_numbers<[1], [0], [0], [1], [0, 0, 1, 1], [], []>} : vector<256x32xf32>, vector<32x32xf32>, vector<256x32xf32> -> vector<256x32xf32>
    %24 = arith.addf %19, %23 : vector<256x32xf32>
    %c1_33 = arith.constant 1 : index
    %c0_34 = arith.constant 0 : index
    %c0_35 = arith.constant 0 : index
    %25 = vector.load %arg11[%c1_33, %c0_34, %c0_35] : memref<18x18x32xf32, #tpu.memory_space<vmem>>, vector<16x16x32xf32>
    %26 = vector.shape_cast %25 : vector<16x16x32xf32> to vector<256x32xf32>
    %c96 = arith.constant 96 : index
    %c0_36 = arith.constant 0 : index
    %27 = vector.load %arg2[%c96, %c0_36] : memref<288x32xf32, #tpu.memory_space<vmem>>, vector<32x32xf32>
    %cst_37 = arith.constant dense<0.000000e+00> : vector<256x32xf32>
    %28 = tpu.matmul %26, %27, %cst_37 {dimension_numbers = #tpu.dot_dimension_numbers<[1], [0], [0], [1], [0, 0, 1, 1], [], []>} : vector<256x32xf32>, vector<32x32xf32>, vector<256x32xf32> -> vector<256x32xf32>
    %29 = arith.addf %24, %28 : vector<256x32xf32>
    %c1_38 = arith.constant 1 : index
    %c1_39 = arith.constant 1 : index
    %c0_40 = arith.constant 0 : index
    %30 = vector.load %arg11[%c1_38, %c1_39, %c0_40] : memref<18x18x32xf32, #tpu.memory_space<vmem>>, vector<16x16x32xf32>
    %31 = vector.shape_cast %30 : vector<16x16x32xf32> to vector<256x32xf32>
    %c128 = arith.constant 128 : index
    %c0_41 = arith.constant 0 : index
    %32 = vector.load %arg2[%c128, %c0_41] : memref<288x32xf32, #tpu.memory_space<vmem>>, vector<32x32xf32>
    %cst_42 = arith.constant dense<0.000000e+00> : vector<256x32xf32>
    %33 = tpu.matmul %31, %32, %cst_42 {dimension_numbers = #tpu.dot_dimension_numbers<[1], [0], [0], [1], [0, 0, 1, 1], [], []>} : vector<256x32xf32>, vector<32x32xf32>, vector<256x32xf32> -> vector<256x32xf32>
    %34 = arith.addf %29, %33 : vector<256x32xf32>
    %c1_43 = arith.constant 1 : index
    %c2_44 = arith.constant 2 : index
    %c0_45 = arith.constant 0 : index
    %35 = vector.load %arg11[%c1_43, %c2_44, %c0_45] : memref<18x18x32xf32, #tpu.memory_space<vmem>>, vector<16x16x32xf32>
    %36 = vector.shape_cast %35 : vector<16x16x32xf32> to vector<256x32xf32>
    %c160 = arith.constant 160 : index
    %c0_46 = arith.constant 0 : index
    %37 = vector.load %arg2[%c160, %c0_46] : memref<288x32xf32, #tpu.memory_space<vmem>>, vector<32x32xf32>
    %cst_47 = arith.constant dense<0.000000e+00> : vector<256x32xf32>
    %38 = tpu.matmul %36, %37, %cst_47 {dimension_numbers = #tpu.dot_dimension_numbers<[1], [0], [0], [1], [0, 0, 1, 1], [], []>} : vector<256x32xf32>, vector<32x32xf32>, vector<256x32xf32> -> vector<256x32xf32>
    %39 = arith.addf %34, %38 : vector<256x32xf32>
    %c2_48 = arith.constant 2 : index
    %c0_49 = arith.constant 0 : index
    %c0_50 = arith.constant 0 : index
    %40 = vector.load %arg11[%c2_48, %c0_49, %c0_50] : memref<18x18x32xf32, #tpu.memory_space<vmem>>, vector<16x16x32xf32>
    %41 = vector.shape_cast %40 : vector<16x16x32xf32> to vector<256x32xf32>
    %c192 = arith.constant 192 : index
    %c0_51 = arith.constant 0 : index
    %42 = vector.load %arg2[%c192, %c0_51] : memref<288x32xf32, #tpu.memory_space<vmem>>, vector<32x32xf32>
    %cst_52 = arith.constant dense<0.000000e+00> : vector<256x32xf32>
    %43 = tpu.matmul %41, %42, %cst_52 {dimension_numbers = #tpu.dot_dimension_numbers<[1], [0], [0], [1], [0, 0, 1, 1], [], []>} : vector<256x32xf32>, vector<32x32xf32>, vector<256x32xf32> -> vector<256x32xf32>
    %44 = arith.addf %39, %43 : vector<256x32xf32>
    %c2_53 = arith.constant 2 : index
    %c1_54 = arith.constant 1 : index
    %c0_55 = arith.constant 0 : index
    %45 = vector.load %arg11[%c2_53, %c1_54, %c0_55] : memref<18x18x32xf32, #tpu.memory_space<vmem>>, vector<16x16x32xf32>
    %46 = vector.shape_cast %45 : vector<16x16x32xf32> to vector<256x32xf32>
    %c224 = arith.constant 224 : index
    %c0_56 = arith.constant 0 : index
    %47 = vector.load %arg2[%c224, %c0_56] : memref<288x32xf32, #tpu.memory_space<vmem>>, vector<32x32xf32>
    %cst_57 = arith.constant dense<0.000000e+00> : vector<256x32xf32>
    %48 = tpu.matmul %46, %47, %cst_57 {dimension_numbers = #tpu.dot_dimension_numbers<[1], [0], [0], [1], [0, 0, 1, 1], [], []>} : vector<256x32xf32>, vector<32x32xf32>, vector<256x32xf32> -> vector<256x32xf32>
    %49 = arith.addf %44, %48 : vector<256x32xf32>
    %c2_58 = arith.constant 2 : index
    %c2_59 = arith.constant 2 : index
    %c0_60 = arith.constant 0 : index
    %50 = vector.load %arg11[%c2_58, %c2_59, %c0_60] : memref<18x18x32xf32, #tpu.memory_space<vmem>>, vector<16x16x32xf32>
    %51 = vector.shape_cast %50 : vector<16x16x32xf32> to vector<256x32xf32>
    %c256 = arith.constant 256 : index
    %c0_61 = arith.constant 0 : index
    %52 = vector.load %arg2[%c256, %c0_61] : memref<288x32xf32, #tpu.memory_space<vmem>>, vector<32x32xf32>
    %cst_62 = arith.constant dense<0.000000e+00> : vector<256x32xf32>
    %53 = tpu.matmul %51, %52, %cst_62 {dimension_numbers = #tpu.dot_dimension_numbers<[1], [0], [0], [1], [0, 0, 1, 1], [], []>} : vector<256x32xf32>, vector<32x32xf32>, vector<256x32xf32> -> vector<256x32xf32>
    %54 = arith.addf %49, %53 : vector<256x32xf32>
    %c0_63 = arith.constant 0 : index
    %c0_64 = arith.constant 0 : index
    %55 = vector.load %arg3[%c0_63, %c0_64] : memref<1x32xf32, #tpu.memory_space<vmem>>, vector<1x32xf32>
    %56 = vector.broadcast %55 : vector<1x32xf32> to vector<256x32xf32>
    %57 = arith.addf %54, %56 : vector<256x32xf32>
    %cst_65 = arith.constant 0.000000e+00 : f32
    %58 = vector.broadcast %cst_65 : f32 to vector<256x32xf32>
    %59 = arith.maximumf %57, %58 : vector<256x32xf32>
    %60 = vector.shape_cast %59 : vector<256x32xf32> to vector<16x16x32xf32>
    %c1_66 = arith.constant 1 : index
    %c1_67 = arith.constant 1 : index
    %c0_68 = arith.constant 0 : index
    %61 = vector.load %arg11[%c1_66, %c1_67, %c0_68] : memref<18x18x32xf32, #tpu.memory_space<vmem>>, vector<16x16x32xf32>
    tpu.vector_store %arg11[%c1_66, %c1_67, %c0_68], %60 {strides = array<i32>} : memref<18x18x32xf32, #tpu.memory_space<vmem>>, vector<16x16x32xf32>,
    %cst_69 = arith.constant 0.000000e+00 : f32
    %62 = vector.broadcast %cst_69 : f32 to vector<256x32xf32>
    %c0_70 = arith.constant 0 : index
    %c0_71 = arith.constant 0 : index
    %c0_72 = arith.constant 0 : index
    %63 = vector.load %arg11[%c0_70, %c0_71, %c0_72] : memref<18x18x32xf32, #tpu.memory_space<vmem>>, vector<16x16x32xf32>
    %64 = vector.shape_cast %63 : vector<16x16x32xf32> to vector<256x32xf32>
    %c0_73 = arith.constant 0 : index
    %c0_74 = arith.constant 0 : index
    %65 = vector.load %arg4[%c0_73, %c0_74] : memref<288x32xf32, #tpu.memory_space<vmem>>, vector<32x32xf32>
    %cst_75 = arith.constant dense<0.000000e+00> : vector<256x32xf32>
    %66 = tpu.matmul %64, %65, %cst_75 {dimension_numbers = #tpu.dot_dimension_numbers<[1], [0], [0], [1], [0, 0, 1, 1], [], []>} : vector<256x32xf32>, vector<32x32xf32>, vector<256x32xf32> -> vector<256x32xf32>
    %67 = arith.addf %62, %66 : vector<256x32xf32>
    %c0_76 = arith.constant 0 : index
    %c1_77 = arith.constant 1 : index
    %c0_78 = arith.constant 0 : index
    %68 = vector.load %arg11[%c0_76, %c1_77, %c0_78] : memref<18x18x32xf32, #tpu.memory_space<vmem>>, vector<16x16x32xf32>
    %69 = vector.shape_cast %68 : vector<16x16x32xf32> to vector<256x32xf32>
    %c32_79 = arith.constant 32 : index
    %c0_80 = arith.constant 0 : index
    %70 = vector.load %arg4[%c32_79, %c0_80] : memref<288x32xf32, #tpu.memory_space<vmem>>, vector<32x32xf32>
    %cst_81 = arith.constant dense<0.000000e+00> : vector<256x32xf32>
    %71 = tpu.matmul %69, %70, %cst_81 {dimension_numbers = #tpu.dot_dimension_numbers<[1], [0], [0], [1], [0, 0, 1, 1], [], []>} : vector<256x32xf32>, vector<32x32xf32>, vector<256x32xf32> -> vector<256x32xf32>
    %72 = arith.addf %67, %71 : vector<256x32xf32>
    %c0_82 = arith.constant 0 : index
    %c2_83 = arith.constant 2 : index
    %c0_84 = arith.constant 0 : index
    %73 = vector.load %arg11[%c0_82, %c2_83, %c0_84] : memref<18x18x32xf32, #tpu.memory_space<vmem>>, vector<16x16x32xf32>
    %74 = vector.shape_cast %73 : vector<16x16x32xf32> to vector<256x32xf32>
    %c64_85 = arith.constant 64 : index
    %c0_86 = arith.constant 0 : index
    %75 = vector.load %arg4[%c64_85, %c0_86] : memref<288x32xf32, #tpu.memory_space<vmem>>, vector<32x32xf32>
    %cst_87 = arith.constant dense<0.000000e+00> : vector<256x32xf32>
    %76 = tpu.matmul %74, %75, %cst_87 {dimension_numbers = #tpu.dot_dimension_numbers<[1], [0], [0], [1], [0, 0, 1, 1], [], []>} : vector<256x32xf32>, vector<32x32xf32>, vector<256x32xf32> -> vector<256x32xf32>
    %77 = arith.addf %72, %76 : vector<256x32xf32>
    %c1_88 = arith.constant 1 : index
    %c0_89 = arith.constant 0 : index
    %c0_90 = arith.constant 0 : index
    %78 = vector.load %arg11[%c1_88, %c0_89, %c0_90] : memref<18x18x32xf32, #tpu.memory_space<vmem>>, vector<16x16x32xf32>
    %79 = vector.shape_cast %78 : vector<16x16x32xf32> to vector<256x32xf32>
    %c96_91 = arith.constant 96 : index
    %c0_92 = arith.constant 0 : index
    %80 = vector.load %arg4[%c96_91, %c0_92] : memref<288x32xf32, #tpu.memory_space<vmem>>, vector<32x32xf32>
    %cst_93 = arith.constant dense<0.000000e+00> : vector<256x32xf32>
    %81 = tpu.matmul %79, %80, %cst_93 {dimension_numbers = #tpu.dot_dimension_numbers<[1], [0], [0], [1], [0, 0, 1, 1], [], []>} : vector<256x32xf32>, vector<32x32xf32>, vector<256x32xf32> -> vector<256x32xf32>
    %82 = arith.addf %77, %81 : vector<256x32xf32>
    %c1_94 = arith.constant 1 : index
    %c1_95 = arith.constant 1 : index
    %c0_96 = arith.constant 0 : index
    %83 = vector.load %arg11[%c1_94, %c1_95, %c0_96] : memref<18x18x32xf32, #tpu.memory_space<vmem>>, vector<16x16x32xf32>
    %84 = vector.shape_cast %83 : vector<16x16x32xf32> to vector<256x32xf32>
    %c128_97 = arith.constant 128 : index
    %c0_98 = arith.constant 0 : index
    %85 = vector.load %arg4[%c128_97, %c0_98] : memref<288x32xf32, #tpu.memory_space<vmem>>, vector<32x32xf32>
    %cst_99 = arith.constant dense<0.000000e+00> : vector<256x32xf32>
    %86 = tpu.matmul %84, %85, %cst_99 {dimension_numbers = #tpu.dot_dimension_numbers<[1], [0], [0], [1], [0, 0, 1, 1], [], []>} : vector<256x32xf32>, vector<32x32xf32>, vector<256x32xf32> -> vector<256x32xf32>
    %87 = arith.addf %82, %86 : vector<256x32xf32>
    %c1_100 = arith.constant 1 : index
    %c2_101 = arith.constant 2 : index
    %c0_102 = arith.constant 0 : index
    %88 = vector.load %arg11[%c1_100, %c2_101, %c0_102] : memref<18x18x32xf32, #tpu.memory_space<vmem>>, vector<16x16x32xf32>
    %89 = vector.shape_cast %88 : vector<16x16x32xf32> to vector<256x32xf32>
    %c160_103 = arith.constant 160 : index
    %c0_104 = arith.constant 0 : index
    %90 = vector.load %arg4[%c160_103, %c0_104] : memref<288x32xf32, #tpu.memory_space<vmem>>, vector<32x32xf32>
    %cst_105 = arith.constant dense<0.000000e+00> : vector<256x32xf32>
    %91 = tpu.matmul %89, %90, %cst_105 {dimension_numbers = #tpu.dot_dimension_numbers<[1], [0], [0], [1], [0, 0, 1, 1], [], []>} : vector<256x32xf32>, vector<32x32xf32>, vector<256x32xf32> -> vector<256x32xf32>
    %92 = arith.addf %87, %91 : vector<256x32xf32>
    %c2_106 = arith.constant 2 : index
    %c0_107 = arith.constant 0 : index
    %c0_108 = arith.constant 0 : index
    %93 = vector.load %arg11[%c2_106, %c0_107, %c0_108] : memref<18x18x32xf32, #tpu.memory_space<vmem>>, vector<16x16x32xf32>
    %94 = vector.shape_cast %93 : vector<16x16x32xf32> to vector<256x32xf32>
    %c192_109 = arith.constant 192 : index
    %c0_110 = arith.constant 0 : index
    %95 = vector.load %arg4[%c192_109, %c0_110] : memref<288x32xf32, #tpu.memory_space<vmem>>, vector<32x32xf32>
    %cst_111 = arith.constant dense<0.000000e+00> : vector<256x32xf32>
    %96 = tpu.matmul %94, %95, %cst_111 {dimension_numbers = #tpu.dot_dimension_numbers<[1], [0], [0], [1], [0, 0, 1, 1], [], []>} : vector<256x32xf32>, vector<32x32xf32>, vector<256x32xf32> -> vector<256x32xf32>
    %97 = arith.addf %92, %96 : vector<256x32xf32>
    %c2_112 = arith.constant 2 : index
    %c1_113 = arith.constant 1 : index
    %c0_114 = arith.constant 0 : index
    %98 = vector.load %arg11[%c2_112, %c1_113, %c0_114] : memref<18x18x32xf32, #tpu.memory_space<vmem>>, vector<16x16x32xf32>
    %99 = vector.shape_cast %98 : vector<16x16x32xf32> to vector<256x32xf32>
    %c224_115 = arith.constant 224 : index
    %c0_116 = arith.constant 0 : index
    %100 = vector.load %arg4[%c224_115, %c0_116] : memref<288x32xf32, #tpu.memory_space<vmem>>, vector<32x32xf32>
    %cst_117 = arith.constant dense<0.000000e+00> : vector<256x32xf32>
    %101 = tpu.matmul %99, %100, %cst_117 {dimension_numbers = #tpu.dot_dimension_numbers<[1], [0], [0], [1], [0, 0, 1, 1], [], []>} : vector<256x32xf32>, vector<32x32xf32>, vector<256x32xf32> -> vector<256x32xf32>
    %102 = arith.addf %97, %101 : vector<256x32xf32>
    %c2_118 = arith.constant 2 : index
    %c2_119 = arith.constant 2 : index
    %c0_120 = arith.constant 0 : index
    %103 = vector.load %arg11[%c2_118, %c2_119, %c0_120] : memref<18x18x32xf32, #tpu.memory_space<vmem>>, vector<16x16x32xf32>
    %104 = vector.shape_cast %103 : vector<16x16x32xf32> to vector<256x32xf32>
    %c256_121 = arith.constant 256 : index
    %c0_122 = arith.constant 0 : index
    %105 = vector.load %arg4[%c256_121, %c0_122] : memref<288x32xf32, #tpu.memory_space<vmem>>, vector<32x32xf32>
    %cst_123 = arith.constant dense<0.000000e+00> : vector<256x32xf32>
    %106 = tpu.matmul %104, %105, %cst_123 {dimension_numbers = #tpu.dot_dimension_numbers<[1], [0], [0], [1], [0, 0, 1, 1], [], []>} : vector<256x32xf32>, vector<32x32xf32>, vector<256x32xf32> -> vector<256x32xf32>
    %107 = arith.addf %102, %106 : vector<256x32xf32>
    %c0_124 = arith.constant 0 : index
    %c0_125 = arith.constant 0 : index
    %108 = vector.load %arg5[%c0_124, %c0_125] : memref<1x32xf32, #tpu.memory_space<vmem>>, vector<1x32xf32>
    %109 = vector.broadcast %108 : vector<1x32xf32> to vector<256x32xf32>
    %110 = arith.addf %107, %109 : vector<256x32xf32>
    %cst_126 = arith.constant dense<0.000000e+00> : vector<32xf32>
    %111 = vector.multi_reduction <add>, %110, %cst_126 [0] : vector<256x32xf32> to vector<32xf32>
    %112 = vector.shape_cast %111 : vector<32xf32> to vector<1x32xf32>
    %cst_127 = arith.constant 3.906250e-03 : f32
    %113 = vector.broadcast %cst_127 : f32 to vector<1x32xf32>
    %114 = arith.mulf %112, %113 : vector<1x32xf32>
    %c0_128 = arith.constant 0 : index
    %c0_129 = arith.constant 0 : index
    %115 = vector.load %arg6[%c0_128, %c0_129] : memref<32x32xf32, #tpu.memory_space<vmem>>, vector<32x32xf32>
    %cst_130 = arith.constant dense<0.000000e+00> : vector<1x32xf32>
    %116 = tpu.matmul %114, %115, %cst_130 {dimension_numbers = #tpu.dot_dimension_numbers<[1], [0], [0], [1], [0, 0, 1, 1], [], []>} : vector<1x32xf32>, vector<32x32xf32>, vector<1x32xf32> -> vector<1x32xf32>
    %c0_131 = arith.constant 0 : index
    %c0_132 = arith.constant 0 : index
    %117 = vector.load %arg7[%c0_131, %c0_132] : memref<1x32xf32, #tpu.memory_space<vmem>>, vector<1x32xf32>
    %118 = arith.addf %116, %117 : vector<1x32xf32>
    %cst_133 = arith.constant 0.000000e+00 : f32
    %119 = vector.broadcast %cst_133 : f32 to vector<1x32xf32>
    %120 = arith.maximumf %118, %119 : vector<1x32xf32>
    %c0_134 = arith.constant 0 : index
    %c0_135 = arith.constant 0 : index
    %121 = vector.load %arg8[%c0_134, %c0_135] : memref<32x32xf32, #tpu.memory_space<vmem>>, vector<32x32xf32>
    %cst_136 = arith.constant dense<0.000000e+00> : vector<1x32xf32>
    %122 = tpu.matmul %120, %121, %cst_136 {dimension_numbers = #tpu.dot_dimension_numbers<[1], [0], [0], [1], [0, 0, 1, 1], [], []>} : vector<1x32xf32>, vector<32x32xf32>, vector<1x32xf32> -> vector<1x32xf32>
    %c0_137 = arith.constant 0 : index
    %c0_138 = arith.constant 0 : index
    %123 = vector.load %arg9[%c0_137, %c0_138] : memref<1x32xf32, #tpu.memory_space<vmem>>, vector<1x32xf32>
    %124 = arith.addf %122, %123 : vector<1x32xf32>
    %125 = arith.negf %124 : vector<1x32xf32>
    %126 = math.exp %125 : vector<1x32xf32>
    %cst_139 = arith.constant 1.000000e+00 : f32
    %127 = vector.broadcast %cst_139 : f32 to vector<1x32xf32>
    %128 = arith.addf %127, %126 : vector<1x32xf32>
    %129 = arith.divf %127, %128 : vector<1x32xf32>
    %130 = vector.broadcast %129 : vector<1x32xf32> to vector<256x32xf32>
    %131 = arith.mulf %110, %130 : vector<256x32xf32>
    %132 = vector.shape_cast %131 : vector<256x32xf32> to vector<16x16x32xf32>
    %c0_140 = arith.constant 0 : index
    %c0_141 = arith.constant 0 : index
    %c0_142 = arith.constant 0 : index
    %c0_143 = arith.constant 0 : index
    %133 = vector.load %arg1[%c0_140, %c0_141, %c0_142, %c0_143] : memref<1x16x16x32xf32, #tpu.memory_space<vmem>>, vector<1x16x16x32xf32>
    %134 = vector.shape_cast %133 : vector<1x16x16x32xf32> to vector<16x16x32xf32>
    %135 = arith.addf %132, %134 : vector<16x16x32xf32>
    %c0_144 = arith.constant 0 : index
    %c0_145 = arith.constant 0 : index
    %c0_146 = arith.constant 0 : index
    %c0_147 = arith.constant 0 : index
    %136 = vector.load %arg10[%c0_144, %c0_145, %c0_146, %c0_147] : memref<1x16x16x32xf32, #tpu.memory_space<vmem>>, vector<1x16x16x32xf32>
    %137 = vector.shape_cast %136 : vector<1x16x16x32xf32> to vector<16x16x32xf32>
    %138 = vector.shape_cast %135 : vector<16x16x32xf32> to vector<1x16x16x32xf32>
    tpu.vector_store %arg10[%c0_144, %c0_145, %c0_146, %c0_147], %138 {strides = array<i32>} : memref<1x16x16x32xf32, #tpu.memory_space<vmem>>, vector<1x16x16x32xf32>,
    return
  }
  func.func @transform_0(%arg0: i32) -> (i32, i32, i32, i32) {
    %c0_i32 = arith.constant 0 : i32
    %c0_i32_0 = arith.constant 0 : i32
    %c0_i32_1 = arith.constant 0 : i32
    %c0_i32_2 = arith.constant 0 : i32
    return %arg0, %c0_i32, %c0_i32_0, %c0_i32_1 : i32, i32, i32, i32
  }
  func.func @transform_1(%arg0: i32) -> (i32, i32) {
    %c0_i32 = arith.constant 0 : i32
    %c0_i32_0 = arith.constant 0 : i32
    %c0_i32_1 = arith.constant 0 : i32
    return %c0_i32, %c0_i32_0 : i32, i32
  }
  func.func @transform_2(%arg0: i32) -> (i32, i32) {
    %c0_i32 = arith.constant 0 : i32
    %c0_i32_0 = arith.constant 0 : i32
    %c0_i32_1 = arith.constant 0 : i32
    return %c0_i32, %c0_i32_0 : i32, i32
  }
  func.func @transform_3(%arg0: i32) -> (i32, i32) {
    %c0_i32 = arith.constant 0 : i32
    %c0_i32_0 = arith.constant 0 : i32
    %c0_i32_1 = arith.constant 0 : i32
    return %c0_i32, %c0_i32_0 : i32, i32
  }
  func.func @transform_4(%arg0: i32) -> (i32, i32) {
    %c0_i32 = arith.constant 0 : i32
    %c0_i32_0 = arith.constant 0 : i32
    %c0_i32_1 = arith.constant 0 : i32
    return %c0_i32, %c0_i32_0 : i32, i32
  }
  func.func @transform_5(%arg0: i32) -> (i32, i32) {
    %c0_i32 = arith.constant 0 : i32
    %c0_i32_0 = arith.constant 0 : i32
    %c0_i32_1 = arith.constant 0 : i32
    return %c0_i32, %c0_i32_0 : i32, i32
  }
  func.func @transform_6(%arg0: i32) -> (i32, i32) {
    %c0_i32 = arith.constant 0 : i32
    %c0_i32_0 = arith.constant 0 : i32
    %c0_i32_1 = arith.constant 0 : i32
    return %c0_i32, %c0_i32_0 : i32, i32
  }
  func.func @transform_7(%arg0: i32) -> (i32, i32) {
    %c0_i32 = arith.constant 0 : i32
    %c0_i32_0 = arith.constant 0 : i32
    %c0_i32_1 = arith.constant 0 : i32
    return %c0_i32, %c0_i32_0 : i32, i32
  }
  func.func @transform_8(%arg0: i32) -> (i32, i32) {
    %c0_i32 = arith.constant 0 : i32
    %c0_i32_0 = arith.constant 0 : i32
    %c0_i32_1 = arith.constant 0 : i32
    return %c0_i32, %c0_i32_0 : i32, i32
  }
  func.func @transform_9(%arg0: i32) -> (i32, i32, i32, i32) {
    %c0_i32 = arith.constant 0 : i32
    %c0_i32_0 = arith.constant 0 : i32
    %c0_i32_1 = arith.constant 0 : i32
    %c0_i32_2 = arith.constant 0 : i32
    return %arg0, %c0_i32, %c0_i32_0, %c0_i32_1 : i32, i32, i32, i32
  }
}

</mosaic_0001>

<bundles_post_ra>
// kernel: tpu_custom_call.1
= control target key start
LH: loop header
LB: loop body
LE: loop exit
PB: predicated region body
PF: predicated region fallthrough
CT: control target
= control target key end

     0   :  { %14 = vsyncpa [#allocation4], 0  ;;  %s13894_s0 = inlined_call_operand.vmem [shape: f32[2,16,16,32], index: 0, kind: input, shape index: {}]   ;;  %s13895_s1 = inlined_call_operand.vmem [shape: f32[288,32], index: 1, kind: input, shape index: {}]   ;;  %s13896_s2 = inlined_call_operand.vmem [shape: f32[1,32], index: 2, kind: input, shape index: {}]   ;;  %s13897_s3 = inlined_call_operand.vmem [shape: f32[288,32], index: 3, kind: input, shape index: {}]   ;;  %s13898_s4 = inlined_call_operand.vmem [shape: f32[1,32], index: 4, kind: input, shape index: {}]   ;;  %s13899_s5 = inlined_call_operand.vmem [shape: f32[32,32], index: 5, kind: input, shape index: {}]   ;;  %s13900_s6 = inlined_call_operand.vmem [shape: f32[1,32], index: 6, kind: input, shape index: {}]   ;;  %s13901_s7 = inlined_call_operand.vmem [shape: f32[32,32], index: 7, kind: input, shape index: {}]   ;;  %s13902_s8 = inlined_call_operand.vmem [shape: f32[1,32], index: 8, kind: input, shape index: {}]   ;;  %s13903_s9 = inlined_call_operand.hbm [shape: f32[2,16,16,32], index: 9, kind: output, shape index: {}]  }
   0x1   :  { %16 = vsyncpa [#allocation4 + $0x1], 0  ;;  %s10347_s30 = smov 0   ;;  %s10349_s10 = smov 0  }
   0x2   :  { %s10351_s11 = smov 0   ;;  %s10353_s12 = smov 0  }
   0x3 LB: > { %s10368_s13 = sadd.s32 4294967295, %s10290_s12   ;;  %s7900_s14 = sadd.s32 4294967294, %s10290_s12   ;;  %s10290_s12 = sphi %s10353_s12, %s14274_s12   ;;  %s10286_s11 = sphi %s10351_s11, %s14273_s11   ;;  %s10282_s10 = sphi %s10349_s10, %s14272_s10   ;;  %s10278_s30 = sphi %s10347_s30, %s14271_s30  }
   0x4   : > { %s10372_s15 = sadd.s32 1, %s10290_s12   ;;  %s223_s16 = sadd.s32 1, %s10286_s11 }
   0x5   : > { %s220_s17 = ssub.s32 %s10290_s12, %s10372_s15  ;;  %p233_p0 = scmp.ne.s32.totalorder %s10286_s11, %s10282_s10 }
   0x6   : > { %p221_p1 = scmp.eq.s32.totalorder %s220_s17, 0  ;;  %p234_p2 = scmp.eq.s32.totalorder %s10368_s13, 1 }
   0x7   : > { %p239_p3 = scmp.ne.s32.totalorder %s10282_s10, %s10278_s30  ;;  %p240_p4 = scmp.eq.s32.totalorder %s7900_s14, 1 }
   0x8   : > { %s10383_s18 = scalar_select %p221_p1, %s10286_s11, %s223_s16  }
   0x9   : > { %p10385_p5 = por %p234_p2, %p233_p0  ;;  %p10389_p6 = por %p240_p4, %p239_p3 }
   0xa   : > { %p7903_p7 = scmp.ge.s32.totalorder %s10290_s12, 1  ;;  %p290_p8 = scmp.lt.s32.totalorder %s10290_s12, 3 }
   0xc   : > { %p291_p9 = pnand %p7903_p7, %p290_p8 }
   0xe   : > { %294 = sbr.rel (%p291_p9) target bundleno = 1513 (0x5e9), region = 56 }
  0x13   : > { %v513_v0 = vld [vmem:[%s13895_s1 + $0x38] sm:$0xff]  ;;  %v512_v2 = vld [vmem:[%s13895_s1 + $0x30] sm:$0xff]  ;;  %vm331_vm0 = vcmask 261120   ;;  %vm334_vm1 = vcmask 254976   ;;  %v13904_v4 = vmov 0.0   ;;  %vm340_vm2 = vcmask 253952  }
  0x14   : > { %v477_v1 = vld [vmem:[%s13895_s1 + $0x18] sm:$0xff]  ;;  %9153 = vmatprep.subr.mxu0 %v513_v0  ;;  %v476_v3 = vld [vmem:[%s13895_s1 + $0x10] sm:$0xff]  ;;  %332 = vst.msk [vmem:[#allocation2] sm:$0xff] %vm331_vm0, %v13904_v4  ;;  %333 = vst.msk [vmem:[#allocation2 + $0x8] sm:$0xff] %vm331_vm0, %v13904_v4  ;;  %p326_p10 = scmp.lt.s32.totalorder %s10368_s13, 1  ;;  %vm10293_vm3 = vmmov 0  }
  0x15   : > { %9209 = vmatprep.subr.mxu1 %v477_v1  ;;  %337 = vst.msk [vmem:[#allocation2 + $0x198] sm:$0xff] %vm331_vm0, %v13904_v4  ;;  %338 = vst.msk [vmem:[#allocation2 + $0x1a0] sm:$0xff] %vm331_vm0, %v13904_v4  ;;  %9154 = vmatpush3.msra.mxu0 %v513_v0  ;;  %v511_v5 = vld [vmem:[%s13895_s1 + $0x28] sm:$0xff]  ;;  %v510_v7 = vld [vmem:[%s13895_s1 + $0x20] sm:$0xff]  ;;  %s323_s27 = sand.u32 1, %s10282_s10   ;;  %s8494_s14 = sshll.u32 %s10368_s13, 12 }
  0x16   : > { %335 = vst.msk [vmem:[#allocation2 + $0x10] sm:$0x3] %vm334_vm1, %v13904_v4  ;;  %339 = vst.msk [vmem:[#allocation2 + $0x1a8] sm:$0x3] %vm334_vm1, %v13904_v4  ;;  %9210 = vmatpush3.msra.mxu1 %v477_v1  ;;  %v475_v6 = vld [vmem:[%s13895_s1 + $0x8] sm:$0xff]  ;;  %9155 = vmatprep.subr.mxu0 %v512_v2  ;;  %s327_s21 = scalar_select %p326_p10, %s10368_s13, 1 }
  0x17   : > { %341 = vst.msk [vmem:[#allocation2] sm:$0x1] %vm340_vm2, %v13904_v4  ;;  %342 = vst.msk [vmem:[#allocation2 + $0x18] sm:$0x1] %vm340_vm2, %v13904_v4  ;;  %9211 = vmatprep.subr.mxu1 %v476_v3  ;;  %9156 = vmatpush3.msra.mxu0 %v512_v2  ;;  %v474_v8 = vld [vmem:[%s13895_s1] sm:$0xff]  ;;  %v1191_v9 = vld [vmem:[%s13895_s1 + $0x58] sm:$0xff]  ;;  %s13818_s22 = scalar_lea.hbm %s13903_s9, %s8494_s14 }
  0x18   : > { %343 = vst.msk [vmem:[#allocation2 + $0x30] sm:$0x1] %vm340_vm2, %v13904_v4  ;;  %344 = vst.msk [vmem:[#allocation2 + $0x48] sm:$0x1] %vm340_vm2, %v13904_v4  ;;  %9212 = vmatpush3.msra.mxu1 %v476_v3  ;;  %9157 = vmatprep.subr.mxu0 %v511_v5  ;;  %s8493_s26 = sshll.u32 %s327_s21, 8  ;;  %v1190_v13 = vld [vmem:[%s13895_s1 + $0x50] sm:$0xff] }
  0x19   : > { %345 = vst.msk [vmem:[#allocation2 + $0x60] sm:$0x1] %vm340_vm2, %v13904_v4  ;;  %346 = vst.msk [vmem:[#allocation2 + $0x78] sm:$0x1] %vm340_vm2, %v13904_v4  ;;  %9213 = vmatprep.subr.mxu1 %v475_v6  ;;  %9158 = vmatpush3.msra.mxu0 %v511_v5  ;;  %s10511_s16 = scalar_lea.vmem %s13894_s0, %s8493_s26  ;;  %v1580_v14 = vld [vmem:[%s13895_s1 + $0x78] sm:$0xff]  ;;  %v1189_v21 = vld [vmem:[%s13895_s1 + $0x48] sm:$0xff] }
  0x1a   : > { %347 = vst.msk [vmem:[#allocation2 + $0x90] sm:$0x1] %vm340_vm2, %v13904_v4  ;;  %348 = vst.msk [vmem:[#allocation2 + $0xa8] sm:$0x1] %vm340_vm2, %v13904_v4  ;;  %9214 = vmatpush3.msra.mxu1 %v475_v6  ;;  %9159 = vmatprep.subr.mxu0 %v510_v7  ;;  %v377_v10 = vld [vmem:[%s10511_s16] sm:$0xff]  ;;  %v378_v11 = vld [vmem:[%s10511_s16 + $0x8] sm:$0xff] }
  0x1b   : > { %349 = vst.msk [vmem:[#allocation2 + $0xc0] sm:$0x1] %vm340_vm2, %v13904_v4  ;;  %350 = vst.msk [vmem:[#allocation2 + $0xd8] sm:$0x1] %vm340_vm2, %v13904_v4  ;;  %9215 = vmatprep.subr.mxu1 %v474_v8  ;;  %v379_v12 = vld [vmem:[%s10511_s16 + $0x10] sm:$0xff]  ;;  %9160 = vmatpush3.msra.mxu0 %v510_v7  ;;  %v478_v15 = vld [vmem:[#allocation2 + $0x1] sm:$0xff] }
  0x1c   : > { %351 = vst.msk [vmem:[#allocation2 + $0xf0] sm:$0x1] %vm340_vm2, %v13904_v4  ;;  %352 = vst.msk [vmem:[#allocation2 + $0x108] sm:$0x1] %vm340_vm2, %v13904_v4  ;;  %9216 = vmatpush3.msra.mxu1 %v474_v8  ;;  %v443_v17 = vld [vmem:[#allocation2 + $0x8] sm:$0xff]  ;;  %9161 = vmatprep.mubr.msk.f32.mxu0 %vm331_vm0, %v478_v15  ;;  %v380_v19 = vld [vmem:[%s10511_s16 + $0x18] sm:$0xff] }
  0x1d   : > { %353 = vst.msk [vmem:[#allocation2 + $0x120] sm:$0x1] %vm340_vm2, %v13904_v4  ;;  %354 = vst.msk [vmem:[#allocation2 + $0x138] sm:$0x1] %vm340_vm2, %v13904_v4  ;;  %v479_v16 = vld [vmem:[#allocation2 + $0x9] sm:$0xff]  ;;  %9265 = vmatprep.subr.mxu0 %v1191_v9  ;;  %v381_v20 = vld [vmem:[%s10511_s16 + $0x20] sm:$0xff]  ;;  %9321 = vmatprep.subr.mxu1 %v1580_v14 }
  0x1e   : > { %355 = vst.msk [vmem:[#allocation2 + $0x150] sm:$0x1] %vm340_vm2, %v13904_v4  ;;  %356 = vst.msk [vmem:[#allocation2 + $0x168] sm:$0x1] %vm340_vm2, %v13904_v4  ;;  %v442_v18 = vld [vmem:[#allocation2] sm:$0xff]  ;;  %v1579_v22 = vld [vmem:[%s13895_s1 + $0x70] sm:$0xff]  ;;  %9162 = vmatmul.mubr.msk.f32.vlgmr.msra.gmra.mxu0 %vm331_vm0, %v479_v16 }
  0x1f   : > { %357 = vst.msk [vmem:[#allocation2 + $0x180] sm:$0x1] %vm340_vm2, %v13904_v4  ;;  %358 = vst.msk [vmem:[#allocation2 + $0x198] sm:$0x1] %vm340_vm2, %v13904_v4  ;;  %9217 = vmatprep.mubr.msk.f32.mxu1 %vm331_vm0, %v442_v18  ;;  %v382_v23 = vld [vmem:[%s10511_s16 + $0x28] sm:$0xff]  ;;  %v383_v24 = vld [vmem:[%s10511_s16 + $0x30] sm:$0xff]  ;;  %9266 = vmatpush3.msra.mxu0 %v1191_v9 }
  0x20   : > { %359 = vst.msk [vmem:[#allocation2 + $0x11] sm:$0x1] %vm340_vm2, %v13904_v4  ;;  %360 = vst.msk [vmem:[#allocation2 + $0x29] sm:$0x1] %vm340_vm2, %v13904_v4  ;;  %v384_v25 = vld [vmem:[%s10511_s16 + $0x38] sm:$0xff]  ;;  %9218 = vmatmul.mubr.msk.f32.vlgmr.msra.gmra.mxu1 %vm331_vm0, %v443_v17  ;;  %v385_v26 = vld [vmem:[%s10511_s16 + $0x40] sm:$0xff]  ;;  %9267 = vmatprep.subr.mxu0 %v1190_v13 }
  0x21   : > { %361 = vst.msk [vmem:[#allocation2 + $0x41] sm:$0x1] %vm340_vm2, %v13904_v4  ;;  %362 = vst.msk [vmem:[#allocation2 + $0x59] sm:$0x1] %vm340_vm2, %v13904_v4  ;;  %v386_v27 = vld [vmem:[%s10511_s16 + $0x48] sm:$0xff]  ;;  %v387_v28 = vld [vmem:[%s10511_s16 + $0x50] sm:$0xff]  ;;  %9268 = vmatpush3.msra.mxu0 %v1190_v13  ;;  %9322 = vmatpush3.msra.mxu1 %v1580_v14 }
  0x22   : > { %363 = vst.msk [vmem:[#allocation2 + $0x71] sm:$0x1] %vm340_vm2, %v13904_v4  ;;  %364 = vst.msk [vmem:[#allocation2 + $0x89] sm:$0x1] %vm340_vm2, %v13904_v4  ;;  %v388_v29 = vld [vmem:[%s10511_s16 + $0x58] sm:$0xff]  ;;  %v389_v30 = vld [vmem:[%s10511_s16 + $0x60] sm:$0xff]  ;;  %9269 = vmatprep.subr.mxu0 %v1189_v21  ;;  %9323 = vmatprep.subr.mxu1 %v1579_v22 }
  0x23   : > { %365 = vst.msk [vmem:[#allocation2 + $0xa1] sm:$0x1] %vm340_vm2, %v13904_v4  ;;  %366 = vst.msk [vmem:[#allocation2 + $0xb9] sm:$0x1] %vm340_vm2, %v13904_v4  ;;  %v390_v31 = vld [vmem:[%s10511_s16 + $0x68] sm:$0xff]  ;;  %v391_v32 = vld [vmem:[%s10511_s16 + $0x70] sm:$0xff]  ;;  %9270 = vmatpush3.msra.mxu0 %v1189_v21  ;;  %9324 = vmatpush3.msra.mxu1 %v1579_v22 }
  0x24   : > { %367 = vst.msk [vmem:[#allocation2 + $0xd1] sm:$0x1] %vm340_vm2, %v13904_v4  ;;  %368 = vst.msk [vmem:[#allocation2 + $0xe9] sm:$0x1] %vm340_vm2, %v13904_v4  ;;  %v392_v33 = vld [vmem:[%s10511_s16 + $0x78] sm:$0xff]  ;;  %v393_v34 = vld [vmem:[%s10511_s16 + $0x80] sm:$0xff] }
  0x25   : > { %369 = vst.msk [vmem:[#allocation2 + $0x101] sm:$0x1] %vm340_vm2, %v13904_v4  ;;  %370 = vst.msk [vmem:[#allocation2 + $0x119] sm:$0x1] %vm340_vm2, %v13904_v4  ;;  %v394_v35 = vld [vmem:[%s10511_s16 + $0x88] sm:$0xff]  ;;  %v395_v36 = vld [vmem:[%s10511_s16 + $0x90] sm:$0xff] }
  0x26   : > { %371 = vst.msk [vmem:[#allocation2 + $0x131] sm:$0x1] %vm340_vm2, %v13904_v4  ;;  %372 = vst.msk [vmem:[#allocation2 + $0x149] sm:$0x1] %vm340_vm2, %v13904_v4  ;;  %v396_v37 = vld [vmem:[%s10511_s16 + $0x98] sm:$0xff]  ;;  %v1188_v38 = vld [vmem:[%s13895_s1 + $0x40] sm:$0xff] }
  0x27   : > { %373 = vst.msk [vmem:[#allocation2 + $0x161] sm:$0x1] %vm340_vm2, %v13904_v4  ;;  %374 = vst.msk [vmem:[#allocation2 + $0x179] sm:$0x1] %vm340_vm2, %v13904_v4  ;;  %v1578_v39 = vld [vmem:[%s13895_s1 + $0x68] sm:$0xff]  ;;  %9271 = vmatprep.subr.mxu0 %v1188_v38  ;;  %v10610_v50 = vld [vmem:[%s13895_s1 + $0x98] sm:$0xff] }
  0x28   : > { %375 = vst.msk [vmem:[#allocation2 + $0x191] sm:$0x1] %vm340_vm2, %v13904_v4  ;;  %376 = vst.msk [vmem:[#allocation2 + $0x1a9] sm:$0x1] %vm340_vm2, %v13904_v4  ;;  %9325 = vmatprep.subr.mxu1 %v1578_v39  ;;  %9272 = vmatpush3.msra.mxu0 %v1188_v38  ;;  %v1577_v51 = vld [vmem:[%s13895_s1 + $0x60] sm:$0xff]  ;;  %v10635_v56 = vld [vmem:[%s13895_s1 + $0xb8] sm:$0xff] }
  0x29   : > { %410 = vst.msk [vmem:[#allocation2 + $0x19] sm:$0xff] %vm331_vm0, %v377_v10  ;;  %411 = vst.msk [vmem:[#allocation2 + $0x21] sm:$0xff] %vm331_vm0, %v378_v11  ;;  %9326 = vmatpush3.msra.mxu1 %v1578_v39  ;;  %9377 = vmatprep.subr.mxu0 %v10610_v50  ;;  %v397_v63 = vld [vmem:[%s10511_s16 + $0xa0] sm:$0xff]  ;;  %v398_v0 = vld [vmem:[%s10511_s16 + $0xa8] sm:$0xff]  ;;  %s13674_s28 = sshll.u32 %s323_s27, 8  ;;  %s13854_s13 = scalar_lea.sflag [#allocation4], %s323_s27 }
  0x2a   : > { %412 = vst.msk [vmem:[#allocation2 + $0x31] sm:$0xff] %vm331_vm0, %v379_v12  ;;  %413 = vst.msk [vmem:[#allocation2 + $0x39] sm:$0xff] %vm331_vm0, %v380_v19  ;;  %9327 = vmatprep.subr.mxu1 %v1577_v51  ;;  %v399_v2 = vld [vmem:[%s10511_s16 + $0xb0] sm:$0xff]  ;;  %v400_v3 = vld [vmem:[%s10511_s16 + $0xb8] sm:$0xff]  ;;  %s13747_s29 = scalar_lea.vmem [#allocation3], %s13674_s28  ;;  %s10294_s24 = smov [#allocation3]  }
  0x2b   : > { %414 = vst.msk [vmem:[#allocation2 + $0x49] sm:$0xff] %vm331_vm0, %v381_v20  ;;  %415 = vst.msk [vmem:[#allocation2 + $0x51] sm:$0xff] %vm331_vm0, %v382_v23  ;;  %9328 = vmatpush3.msra.mxu1 %v1577_v51  ;;  %v401_v5 = vld [vmem:[%s10511_s16 + $0xc0] sm:$0xff]  ;;  %v402_v6 = vld [vmem:[%s10511_s16 + $0xc8] sm:$0xff]  ;;  %s7838_s17 = sshll.u32 %s13747_s29, 4  ;;  %s10234_s25 = sshll.u32 %s10294_s24, 4  ;;  %s13822_s17 = int_to_ptr.vmem [resolvable:$true] %s7838_s17  ;;  %s10235_s25 = int_to_ptr.vmem [resolvable:$false] %s10234_s25 }
  0x2c   : > { %416 = vst.msk [vmem:[#allocation2 + $0x61] sm:$0xff] %vm331_vm0, %v383_v24  ;;  %417 = vst.msk [vmem:[#allocation2 + $0x69] sm:$0xff] %vm331_vm0, %v384_v25  ;;  %9433 = vmatprep.subr.mxu1 %v10635_v56  ;;  %v403_v7 = vld [vmem:[%s10511_s16 + $0xd0] sm:$0xff]  ;;  %v404_v8 = vld [vmem:[%s10511_s16 + $0xd8] sm:$0xff]  ;;  %s10230_s23 = scalar_lea.vmem %s13822_s17, 4096  ;;  %s10236_s26 = scalar_lea.vmem %s10235_s25, 8192 }
  0x2d   : > { %418 = vst.msk [vmem:[#allocation2 + $0x79] sm:$0xff] %vm331_vm0, %v385_v26  ;;  %419 = vst.msk [vmem:[#allocation2 + $0x81] sm:$0xff] %vm331_vm0, %v386_v27  ;;  %v405_v10 = vld [vmem:[%s10511_s16 + $0xe0] sm:$0xff]  ;;  %v406_v11 = vld [vmem:[%s10511_s16 + $0xe8] sm:$0xff]  ;;  %p10231_p11 = scmp.ne.s32.totalorder %s13822_s17, %s10230_s23  ;;  %p10237_p0 = scmp.lt.s32.totalorder %s13822_s17, %s10235_s25 }
  0x2e   : > { %420 = vst.msk [vmem:[#allocation2 + $0x91] sm:$0xff] %vm331_vm0, %v387_v28  ;;  %421 = vst.msk [vmem:[#allocation2 + $0x99] sm:$0xff] %vm331_vm0, %v388_v29  ;;  %v407_v28 = vld [vmem:[%s10511_s16 + $0xf0] sm:$0xff]  ;;  %v408_v29 = vld [vmem:[%s10511_s16 + $0xf8] sm:$0xff]  ;;  %p10238_p1 = scmp.lt.s32.totalorder %s10236_s26, %s10230_s23 }
  0x2f   : > { %422 = vst.msk [vmem:[#allocation2 + $0xa9] sm:$0xff] %vm331_vm0, %v389_v30  ;;  %423 = vst.msk [vmem:[#allocation2 + $0xb1] sm:$0xff] %vm331_vm0, %v390_v31  ;;  %v1157_v4 = vld [vmem:[#allocation2 + $0xa] sm:$0xff]  ;;  %p10232_p12 = pnand %p10231_p11, %p10385_p5 }
  0x30   : > { %424 = vst.msk [vmem:[#allocation2 + $0xc1] sm:$0xff] %vm331_vm0, %v391_v32  ;;  %425 = vst.msk [vmem:[#allocation2 + $0xc9] sm:$0xff] %vm331_vm0, %v392_v33  ;;  %v10572_v40 = vld [vmem:[#allocation2 + $0x19] sm:$0xff]  ;;  %v10576_v42 = vld [vmem:[#allocation2 + $0x21] sm:$0xff]  ;;  %p10239_p2 = por %p10238_p1, %p10237_p0 }
  0x31   : > { %426 = vst.msk [vmem:[#allocation2 + $0xd9] sm:$0xff] %vm331_vm0, %v393_v34  ;;  %v10574_v41 = vld [vmem:[#allocation2 + $0x18] sm:$0xff]  ;;  %427 = vst.msk [vmem:[#allocation2 + $0xe1] sm:$0xff] %vm331_vm0, %v394_v35  ;;  %9164 = vmatprep.mubr.msk.f32.mxu0 %vm331_vm0, %v10572_v40  ;;  %v10585_v43 = vld [vmem:[#allocation2 + $0x20] sm:$0xff]  ;;  %p10233_p13 = pneg %p10232_p12 }
  0x32   : > { %428 = vst.msk [vmem:[#allocation2 + $0xf1] sm:$0xff] %vm331_vm0, %v395_v36  ;;  %429 = vst.msk [vmem:[#allocation2 + $0xf9] sm:$0xff] %vm331_vm0, %v396_v37  ;;  %9220 = vmatprep.mubr.msk.f32.mxu1 %vm331_vm0, %v10574_v41  ;;  %v10587_v44 = vld [vmem:[#allocation2 + $0x31] sm:$0xff]  ;;  %9165 = vmatmul.mubr.msk.f32.gmra.mxu0 %vm331_vm0, %v10576_v42  ;;  %v10599_v46 = vld [vmem:[#allocation2 + $0x39] sm:$0xff] }
  0x33   : > { %v10589_v45 = vld [vmem:[#allocation2 + $0x30] sm:$0xff]  ;;  %9221 = vmatmul.mubr.msk.f32.gmra.mxu1 %vm331_vm0, %v10585_v43  ;;  %9167 = vmatprep.mubr.msk.f32.mxu0 %vm331_vm0, %v10587_v44  ;;  %v10601_v47 = vld [vmem:[#allocation2 + $0x38] sm:$0xff]  ;;  %v10605_v49 = vld [vmem:[#allocation2 + $0x48] sm:$0xff]  ;;  %430 = vst.msk [vmem:[#allocation2 + $0x109] sm:$0xff] %vm331_vm0, %v397_v63  ;;  %p10240_p3 = pnand %p10239_p2, %p10233_p13 }
  0x34   : > { %13944 = vst [vmem:[#allocation6_spill] sm:$0xff] %v10589_v45  ;;  %9223 = vmatprep.mubr.msk.f32.mxu1 %vm331_vm0, %v10589_v45  ;;  %13945 = vst [vmem:[#allocation7_spill] sm:$0xff] %v10601_v47  ;;  %v10603_v48 = vld [vmem:[#allocation2 + $0x49] sm:$0xff]  ;;  %v10623_v52 = vld [vmem:[#allocation2 + $0x51] sm:$0xff] }
  0x35   : > { %13946 = vst [vmem:[#allocation8_spill] sm:$0xff] %v10605_v49  ;;  %v10625_v53 = vld [vmem:[#allocation2 + $0x50] sm:$0xff]  ;;  %v10627_v54 = vld [vmem:[#allocation2 + $0x61] sm:$0xff]  ;;  %v10649_v59 = vld [vmem:[#allocation2 + $0x79] sm:$0xff] }
  0x36   : > { %9168 = vmatmul.mubr.msk.f32.gmra.mxu0 %vm331_vm0, %v10599_v46  ;;  %13947 = vst [vmem:[#allocation9_spill] sm:$0xff] %v10625_v53  ;;  %v10629_v55 = vld [vmem:[#allocation2 + $0x60] sm:$0xff]  ;;  %v10645_v57 = vld [vmem:[#allocation2 + $0x69] sm:$0xff]  ;;  %v10651_v60 = vld [vmem:[#allocation2 + $0x78] sm:$0xff] }
  0x37   : > { %9224 = vmatmul.mubr.msk.f32.gmra.mxu1 %vm331_vm0, %v10601_v47  ;;  %9170 = vmatprep.mubr.msk.f32.mxu0 %vm331_vm0, %v10603_v48  ;;  %13948 = vst [vmem:[#allocation10_spill] sm:$0xff] %v10629_v55  ;;  %v10647_v58 = vld [vmem:[#allocation2 + $0x68] sm:$0xff]  ;;  %13950 = vst [vmem:[#allocation12_spill] sm:$0xff] %v10651_v60  ;;  %v10656_v62 = vld [vmem:[#allocation2 + $0x80] sm:$0xff] }
  0x38   : > { %9226 = vmatprep.mubr.msk.f32.mxu1 %vm331_vm0, %v10605_v49  ;;  %13949 = vst [vmem:[#allocation11_spill] sm:$0xff] %v10647_v58  ;;  %v10654_v61 = vld [vmem:[#allocation2 + $0x81] sm:$0xff]  ;;  %13951 = vst [vmem:[#allocation13_spill] sm:$0xff] %v10656_v62  ;;  %v10664_v1 = vld [vmem:[#allocation2 + $0x91] sm:$0xff] }
  0x39   : > { %431 = vst.msk [vmem:[#allocation2 + $0x111] sm:$0xff] %vm331_vm0, %v398_v0  ;;  %432 = vst.msk [vmem:[#allocation2 + $0x121] sm:$0xff] %vm331_vm0, %v399_v2  ;;  %v10681_v9 = vld [vmem:[#allocation2 + $0x90] sm:$0xff]  ;;  %v10698_v12 = vld [vmem:[#allocation2 + $0x99] sm:$0xff] }
  0x3a   : > { %9171 = vmatmul.mubr.msk.f32.gmra.mxu0 %vm331_vm0, %v10623_v52  ;;  %433 = vst.msk [vmem:[#allocation2 + $0x129] sm:$0xff] %vm331_vm0, %v400_v3  ;;  %434 = vst.msk [vmem:[#allocation2 + $0x139] sm:$0xff] %vm331_vm0, %v401_v5  ;;  %v10700_v13 = vld [vmem:[#allocation2 + $0x98] sm:$0xff]  ;;  %v10702_v14 = vld [vmem:[#allocation2 + $0xa9] sm:$0xff] }
  0x3b   : > { %9227 = vmatmul.mubr.msk.f32.gmra.mxu1 %vm331_vm0, %v10625_v53  ;;  %9173 = vmatprep.mubr.msk.f32.mxu0 %vm331_vm0, %v10627_v54  ;;  %13952 = vst [vmem:[#allocation14_spill] sm:$0xff] %v10681_v9  ;;  %435 = vst.msk [vmem:[#allocation2 + $0x141] sm:$0xff] %vm331_vm0, %v402_v6  ;;  %v10704_v15 = vld [vmem:[#allocation2 + $0xa8] sm:$0xff]  ;;  %v10714_v16 = vld [vmem:[#allocation2 + $0xb1] sm:$0xff] }
  0x3c   : > { %9229 = vmatprep.mubr.msk.f32.mxu1 %vm331_vm0, %v10629_v55  ;;  %436 = vst.msk [vmem:[#allocation2 + $0x151] sm:$0xff] %vm331_vm0, %v403_v7  ;;  %437 = vst.msk [vmem:[#allocation2 + $0x159] sm:$0xff] %vm331_vm0, %v404_v8  ;;  %v10716_v17 = vld [vmem:[#allocation2 + $0xb0] sm:$0xff]  ;;  %v10718_v18 = vld [vmem:[#allocation2 + $0xc1] sm:$0xff] }
  0x3d   : > { %438 = vst.msk [vmem:[#allocation2 + $0x169] sm:$0xff] %vm331_vm0, %v405_v10  ;;  %439 = vst.msk [vmem:[#allocation2 + $0x171] sm:$0xff] %vm331_vm0, %v406_v11  ;;  %v10720_v19 = vld [vmem:[#allocation2 + $0xc0] sm:$0xff]  ;;  %v10730_v20 = vld [vmem:[#allocation2 + $0xc9] sm:$0xff] }
  0x3e   : > { %9174 = vmatmul.mubr.msk.f32.gmra.mxu0 %vm331_vm0, %v10645_v57  ;;  %13953 = vst [vmem:[#allocation15_spill] sm:$0xff] %v10700_v13  ;;  %13954 = vst [vmem:[#allocation16_spill] sm:$0xff] %v10704_v15  ;;  %v10732_v21 = vld [vmem:[#allocation2 + $0xc8] sm:$0xff]  ;;  %v10734_v22 = vld [vmem:[#allocation2 + $0xd9] sm:$0xff] }
  0x3f   : > { %9230 = vmatmul.mubr.msk.f32.gmra.mxu1 %vm331_vm0, %v10647_v58  ;;  %9176 = vmatprep.mubr.msk.f32.mxu0 %vm331_vm0, %v10649_v59  ;;  %13955 = vst [vmem:[#allocation17_spill] sm:$0xff] %v10716_v17  ;;  %13956 = vst [vmem:[#allocation18_spill] sm:$0xff] %v10720_v19  ;;  %v10736_v23 = vld [vmem:[#allocation2 + $0xd8] sm:$0xff]  ;;  %v10746_v24 = vld [vmem:[#allocation2 + $0xe1] sm:$0xff] }
  0x40   : > { %9232 = vmatprep.mubr.msk.f32.mxu1 %vm331_vm0, %v10651_v60  ;;  %13957 = vst [vmem:[#allocation19_spill] sm:$0xff] %v10732_v21  ;;  %13958 = vst [vmem:[#allocation20_spill] sm:$0xff] %v10736_v23  ;;  %v10748_v25 = vld [vmem:[#allocation2 + $0xe0] sm:$0xff]  ;;  %v10750_v26 = vld [vmem:[#allocation2 + $0xf1] sm:$0xff] }
  0x41   : > { %13959 = vst [vmem:[#allocation21_spill] sm:$0xff] %v10748_v25  ;;  %v10752_v27 = vld [vmem:[#allocation2 + $0xf0] sm:$0xff]  ;;  %v10764_v30 = vld [vmem:[#allocation2 + $0xf9] sm:$0xff]  ;;  %440 = vst.msk [vmem:[#allocation2 + $0x181] sm:$0xff] %vm331_vm0, %v407_v28 }
  0x42   : > { %9177 = vmatmul.mubr.msk.f32.gmra.mxu0 %vm331_vm0, %v10654_v61  ;;  %13960 = vst [vmem:[#allocation22_spill] sm:$0xff] %v10752_v27  ;;  %v10766_v31 = vld [vmem:[#allocation2 + $0xf8] sm:$0xff]  ;;  %441 = vst.msk [vmem:[#allocation2 + $0x189] sm:$0xff] %vm331_vm0, %v408_v29  ;;  %v10770_v32 = vld [vmem:[#allocation2 + $0x109] sm:$0xff] }
  0x43   : > { %9233 = vmatmul.mubr.msk.f32.gmra.mxu1 %vm331_vm0, %v10656_v62  ;;  %9179 = vmatprep.mubr.msk.f32.mxu0 %vm331_vm0, %v10664_v1  ;;  %13961 = vst [vmem:[#allocation23_spill] sm:$0xff] %v10766_v31  ;;  %v10772_v33 = vld [vmem:[#allocation2 + $0x108] sm:$0xff]  ;;  %v10782_v34 = vld [vmem:[#allocation2 + $0x111] sm:$0xff]  ;;  %v10788_v37 = vld [vmem:[#allocation2 + $0x120] sm:$0xff] }
  0x44   : > { %9235 = vmatprep.mubr.msk.f32.mxu1 %vm331_vm0, %v10681_v9  ;;  %v10784_v35 = vld [vmem:[#allocation2 + $0x110] sm:$0xff]  ;;  %v10786_v36 = vld [vmem:[#allocation2 + $0x121] sm:$0xff]  ;;  %v10802_v51 = vld [vmem:[#allocation2 + $0x139] sm:$0xff] }
  0x45   : > { %v10798_v38 = vld [vmem:[#allocation2 + $0x129] sm:$0xff]  ;;  %v10804_v63 = vld [vmem:[#allocation2 + $0x138] sm:$0xff]  ;;  %v10814_v0 = vld [vmem:[#allocation2 + $0x141] sm:$0xff] }
  0x46   : > { %9180 = vmatmul.mubr.msk.f32.gmra.mxu0 %vm331_vm0, %v10698_v12  ;;  %v10800_v39 = vld [vmem:[#allocation2 + $0x128] sm:$0xff]  ;;  %v10816_v2 = vld [vmem:[#allocation2 + $0x140] sm:$0xff]  ;;  %v10818_v3 = vld [vmem:[#allocation2 + $0x151] sm:$0xff] }
  0x47   : > { %9236 = vmatmul.mubr.msk.f32.gmra.mxu1 %vm331_vm0, %v10700_v13  ;;  %9182 = vmatprep.mubr.msk.f32.mxu0 %vm331_vm0, %v10702_v14  ;;  %v10820_v5 = vld [vmem:[#allocation2 + $0x150] sm:$0xff]  ;;  %v10830_v6 = vld [vmem:[#allocation2 + $0x159] sm:$0xff]  ;;  %v10836_v10 = vld [vmem:[#allocation2 + $0x168] sm:$0xff] }
  0x48   : > { %9238 = vmatprep.mubr.msk.f32.mxu1 %vm331_vm0, %v10704_v15  ;;  %13962 = vst [vmem:[#allocation24_spill] sm:$0xff] %v10830_v6  ;;  %v10832_v7 = vld [vmem:[#allocation2 + $0x158] sm:$0xff]  ;;  %v10834_v8 = vld [vmem:[#allocation2 + $0x169] sm:$0xff] }
  0x49   : > { %13963 = vst [vmem:[#allocation25_spill] sm:$0xff] %v10834_v8  ;;  %v10846_v11 = vld [vmem:[#allocation2 + $0x171] sm:$0xff]  ;;  %v1156_v29 = vld [vmem:[#allocation2 + $0x2] sm:$0xff] }
  0x4a   : > { %9183 = vmatmul.mubr.msk.f32.gmra.mxu0 %vm331_vm0, %v10714_v16  ;;  %v10848_v28 = vld [vmem:[#allocation2 + $0x170] sm:$0xff] }
  0x4b   : > { %9239 = vmatmul.mubr.msk.f32.gmra.mxu1 %vm331_vm0, %v10716_v17  ;;  %9185 = vmatprep.mubr.msk.f32.mxu0 %vm331_vm0, %v10718_v18 }
  0x4c   : > { %9241 = vmatprep.mubr.msk.f32.mxu1 %vm331_vm0, %v10720_v19 }
  0x4e   : > { %9186 = vmatmul.mubr.msk.f32.gmra.mxu0 %vm331_vm0, %v10730_v20 }
  0x4f   : > { %9242 = vmatmul.mubr.msk.f32.gmra.mxu1 %vm331_vm0, %v10732_v21  ;;  %9188 = vmatprep.mubr.msk.f32.mxu0 %vm331_vm0, %v10734_v22 }
  0x50   : > { %9244 = vmatprep.mubr.msk.f32.mxu1 %vm331_vm0, %v10736_v23 }
  0x52   : > { %9189 = vmatmul.mubr.msk.f32.gmra.mxu0 %vm331_vm0, %v10746_v24 }
  0x53   : > { %9245 = vmatmul.mubr.msk.f32.gmra.mxu1 %vm331_vm0, %v10748_v25  ;;  %9191 = vmatprep.mubr.msk.f32.mxu0 %vm331_vm0, %v10750_v26 }
  0x54   : > { %9247 = vmatprep.mubr.msk.f32.mxu1 %vm331_vm0, %v10752_v27 }
  0x56   : > { %9192 = vmatmul.mubr.msk.f32.gmra.mxu0 %vm331_vm0, %v10764_v30 }
  0x57   : > { %9248 = vmatmul.mubr.msk.f32.gmra.mxu1 %vm331_vm0, %v10766_v31  ;;  %9194 = vmatprep.mubr.msk.f32.mxu0 %vm331_vm0, %v10770_v32 }
  0x58   : > { %9250 = vmatprep.mubr.msk.f32.mxu1 %vm331_vm0, %v10772_v33 }
  0x5a   : > { %9195 = vmatmul.mubr.msk.f32.gmra.mxu0 %vm331_vm0, %v10782_v34 }
  0x5b   : > { %9251 = vmatmul.mubr.msk.f32.gmra.mxu1 %vm331_vm0, %v10784_v35  ;;  %9197 = vmatprep.mubr.msk.f32.mxu0 %vm331_vm0, %v10786_v36 }
  0x5c   : > { %9253 = vmatprep.mubr.msk.f32.mxu1 %vm331_vm0, %v10788_v37 }
  0x5e   : > { %9198 = vmatmul.mubr.msk.f32.gmra.mxu0 %vm331_vm0, %v10798_v38 }
  0x5f   : > { %9254 = vmatmul.mubr.msk.f32.gmra.mxu1 %vm331_vm0, %v10800_v39  ;;  %9200 = vmatprep.mubr.msk.f32.mxu0 %vm331_vm0, %v10802_v51 }
  0x60   : > { %9256 = vmatprep.mubr.msk.f32.mxu1 %vm331_vm0, %v10804_v63 }
  0x62   : > { %9201 = vmatmul.mubr.msk.f32.gmra.mxu0 %vm331_vm0, %v10814_v0 }
  0x63   : > { %9257 = vmatmul.mubr.msk.f32.gmra.mxu1 %vm331_vm0, %v10816_v2  ;;  %9203 = vmatprep.mubr.msk.f32.mxu0 %vm331_vm0, %v10818_v3 }
  0x64   : > { %9259 = vmatprep.mubr.msk.f32.mxu1 %vm331_vm0, %v10820_v5 }
  0x66   : > { %9204 = vmatmul.mubr.msk.f32.gmra.mxu0 %vm331_vm0, %v10830_v6  ;;  %v1968_v6 = vld [vmem:[%s13895_s1 + $0x90] sm:$0xff] }
  0x67   : > { %9260 = vmatmul.mubr.msk.f32.gmra.mxu1 %vm331_vm0, %v10832_v7  ;;  %9206 = vmatprep.mubr.msk.f32.mxu0 %vm331_vm0, %v10834_v8  ;;  %v10857_v8 = vld [vmem:[#allocation2 + $0x1a] sm:$0xff] }
  0x68   : > { %9262 = vmatprep.mubr.msk.f32.mxu1 %vm331_vm0, %v10836_v10 }
  0x6a   : > { %9207 = vmatmul.mubr.msk.f32.gmra.mxu0 %vm331_vm0, %v10846_v11 }
  0x6b   : > { %9263 = vmatmul.mubr.msk.f32.gmra.mxu1 %vm331_vm0, %v10848_v28  ;;  %9273 = vmatprep.mubr.msk.f32.mxu0 %vm331_vm0, %v1156_v29  ;;  %v10868_v29 = vld [vmem:[#allocation2 + $0x22] sm:$0xff] }
  0x6c   : > { %9329 = vmatprep.mubr.msk.f32.mxu1 %vm331_vm0, %v10574_v41  ;;  %v10872_v41 = vld [vmem:[#allocation2 + $0x32] sm:$0xff] }
  0x6e   : > { %9274 = vmatmul.mubr.msk.f32.vlgmr.msra.gmra.mxu0 %vm331_vm0, %v1157_v4  ;;  %v1967_v4 = vld [vmem:[%s13895_s1 + $0x88] sm:$0xff] }
  0x6f   : > { %9330 = vmatmul.mubr.msk.f32.vlgmr.msra.gmra.mxu1 %vm331_vm0, %v10585_v43  ;;  %9378 = vmatpush3.msra.mxu0 %v10610_v50  ;;  %v2357_v43 = vld [vmem:[%s13895_s1 + $0xb0] sm:$0xff]  ;;  %v10887_v50 = vld [vmem:[#allocation2 + $0x3a] sm:$0xff] }
  0x70   : > { %9276 = vmatprep.mubr.msk.f32.mxu0 %vm331_vm0, %v10857_v8  ;;  %9332 = vmatprep.mubr.msk.f32.mxu1 %vm331_vm0, %v10589_v45  ;;  %v11058_v45 = vld [vmem:[#allocation2 + $0x180] sm:$0xff] }
  0x71   : > { %9379 = vmatprep.subr.mxu0 %v1968_v6  ;;  %9434 = vmatpush3.msra.mxu1 %v10635_v56  ;;  %v1966_v56 = vld [vmem:[%s13895_s1 + $0x80] sm:$0xff] }
  0x72   : > { %9380 = vmatpush3.msra.mxu0 %v1968_v6  ;;  %v10891_v6 = vld [vmem:[#allocation2 + $0x4a] sm:$0xff]  ;;  %9435 = vmatprep.subr.mxu1 %v2357_v43 }
  0x73   : > { %9277 = vmatmul.mubr.msk.f32.gmra.mxu0 %vm331_vm0, %v10868_v29  ;;  %9333 = vmatmul.mubr.msk.f32.gmra.mxu1 %vm331_vm0, %v10601_v47  ;;  %v2356_v47 = vld [vmem:[%s13895_s1 + $0xa8] sm:$0xff] }
  0x74   : > { %9279 = vmatprep.mubr.msk.f32.mxu0 %vm331_vm0, %v10872_v41  ;;  %9335 = vmatprep.mubr.msk.f32.mxu1 %vm331_vm0, %v10605_v49  ;;  %v10905_v49 = vld [vmem:[#allocation2 + $0x52] sm:$0xff] }
  0x75   : > { %9381 = vmatprep.subr.mxu0 %v1967_v4  ;;  %9436 = vmatpush3.msra.mxu1 %v2357_v43  ;;  %v10914_v43 = vld [vmem:[%s13895_s1 + $0xd8] sm:$0xff] }
  0x76   : > { %9382 = vmatpush3.msra.mxu0 %v1967_v4  ;;  %v10909_v4 = vld [vmem:[#allocation2 + $0x62] sm:$0xff]  ;;  %9437 = vmatprep.subr.mxu1 %v2356_v47 }
  0x77   : > { %9280 = vmatmul.mubr.msk.f32.gmra.mxu0 %vm331_vm0, %v10887_v50  ;;  %9336 = vmatmul.mubr.msk.f32.gmra.mxu1 %vm331_vm0, %v10625_v53  ;;  %v2355_v53 = vld [vmem:[%s13895_s1 + $0xa0] sm:$0xff] }
  0x78   : > { %9282 = vmatprep.mubr.msk.f32.mxu0 %vm331_vm0, %v10891_v6  ;;  %9338 = vmatprep.mubr.msk.f32.mxu1 %vm331_vm0, %v10629_v55  ;;  %v10935_v55 = vld [vmem:[%s13895_s1 + $0xf8] sm:$0xff] }
  0x79   : > { %9383 = vmatprep.subr.mxu0 %v1966_v56  ;;  %9438 = vmatpush3.msra.mxu1 %v2356_v47  ;;  %v10929_v47 = vld [vmem:[#allocation2 + $0x7a] sm:$0xff] }
  0x7a   : > { %9384 = vmatpush3.msra.mxu0 %v1966_v56  ;;  %v10925_v56 = vld [vmem:[#allocation2 + $0x6a] sm:$0xff]  ;;  %9439 = vmatprep.subr.mxu1 %v2355_v53 }
  0x7b   : > { %9283 = vmatmul.mubr.msk.f32.gmra.mxu0 %vm331_vm0, %v10905_v49  ;;  %9339 = vmatmul.mubr.msk.f32.gmra.mxu1 %vm331_vm0, %v10647_v58  ;;  %v10960_v58 = vld [vmem:[#allocation2 + $0xaa] sm:$0xff] }
  0x7c   : > { %9285 = vmatprep.mubr.msk.f32.mxu0 %vm331_vm0, %v10909_v4  ;;  %9341 = vmatprep.mubr.msk.f32.mxu1 %vm331_vm0, %v10651_v60  ;;  %v10943_v60 = vld [vmem:[#allocation2 + $0x82] sm:$0xff] }
  0x7d   : > { %9489 = vmatprep.subr.mxu0 %v10914_v43  ;;  %9440 = vmatpush3.msra.mxu1 %v2355_v53  ;;  %v10947_v53 = vld [vmem:[#allocation2 + $0x92] sm:$0xff] }
  0x7e   : > { %9545 = vmatprep.subr.mxu1 %v10935_v55 }
  0x7f   : > { %9286 = vmatmul.mubr.msk.f32.gmra.mxu0 %vm331_vm0, %v10925_v56  ;;  %9342 = vmatmul.mubr.msk.f32.gmra.mxu1 %vm331_vm0, %v10656_v62  ;;  %v10956_v62 = vld [vmem:[#allocation2 + $0x9a] sm:$0xff] }
  0x80   : > { %9288 = vmatprep.mubr.msk.f32.mxu0 %vm331_vm0, %v10929_v47  ;;  %9344 = vmatprep.mubr.msk.f32.mxu1 %vm331_vm0, %v10681_v9  ;;  %v10972_v9 = vld [vmem:[#allocation2 + $0xc2] sm:$0xff] }
  0x83   : > { %9289 = vmatmul.mubr.msk.f32.gmra.mxu0 %vm331_vm0, %v10943_v60  ;;  %9345 = vmatmul.mubr.msk.f32.gmra.mxu1 %vm331_vm0, %v10700_v13  ;;  %v10968_v13 = vld [vmem:[#allocation2 + $0xb2] sm:$0xff] }
  0x84   : > { %9291 = vmatprep.mubr.msk.f32.mxu0 %vm331_vm0, %v10947_v53  ;;  %9347 = vmatprep.mubr.msk.f32.mxu1 %vm331_vm0, %v10704_v15  ;;  %v10984_v15 = vld [vmem:[#allocation2 + $0xda] sm:$0xff] }
  0x87   : > { %9292 = vmatmul.mubr.msk.f32.gmra.mxu0 %vm331_vm0, %v10956_v62  ;;  %9348 = vmatmul.mubr.msk.f32.gmra.mxu1 %vm331_vm0, %v10716_v17  ;;  %v10980_v17 = vld [vmem:[#allocation2 + $0xca] sm:$0xff] }
  0x88   : > { %9294 = vmatprep.mubr.msk.f32.mxu0 %vm331_vm0, %v10960_v58  ;;  %9350 = vmatprep.mubr.msk.f32.mxu1 %vm331_vm0, %v10720_v19  ;;  %v10996_v19 = vld [vmem:[#allocation2 + $0xf2] sm:$0xff] }
  0x8b   : > { %9295 = vmatmul.mubr.msk.f32.gmra.mxu0 %vm331_vm0, %v10968_v13  ;;  %9351 = vmatmul.mubr.msk.f32.gmra.mxu1 %vm331_vm0, %v10732_v21  ;;  %v10992_v21 = vld [vmem:[#allocation2 + $0xe2] sm:$0xff] }
  0x8c   : > { %9297 = vmatprep.mubr.msk.f32.mxu0 %vm331_vm0, %v10972_v9  ;;  %9353 = vmatprep.mubr.msk.f32.mxu1 %vm331_vm0, %v10736_v23  ;;  %v11008_v23 = vld [vmem:[#allocation2 + $0x10a] sm:$0xff] }
  0x8f   : > { %9298 = vmatmul.mubr.msk.f32.gmra.mxu0 %vm331_vm0, %v10980_v17  ;;  %9354 = vmatmul.mubr.msk.f32.gmra.mxu1 %vm331_vm0, %v10748_v25  ;;  %v11004_v25 = vld [vmem:[#allocation2 + $0xfa] sm:$0xff] }
  0x90   : > { %9300 = vmatprep.mubr.msk.f32.mxu0 %vm331_vm0, %v10984_v15  ;;  %9356 = vmatprep.mubr.msk.f32.mxu1 %vm331_vm0, %v10752_v27  ;;  %v11020_v27 = vld [vmem:[#allocation2 + $0x122] sm:$0xff] }
  0x93   : > { %9301 = vmatmul.mubr.msk.f32.gmra.mxu0 %vm331_vm0, %v10992_v21  ;;  %9357 = vmatmul.mubr.msk.f32.gmra.mxu1 %vm331_vm0, %v10766_v31  ;;  %v11016_v31 = vld [vmem:[#allocation2 + $0x112] sm:$0xff] }
  0x94   : > { %9303 = vmatprep.mubr.msk.f32.mxu0 %vm331_vm0, %v10996_v19  ;;  %9359 = vmatprep.mubr.msk.f32.mxu1 %vm331_vm0, %v10772_v33  ;;  %v11028_v33 = vld [vmem:[#allocation2 + $0x12a] sm:$0xff] }
  0x97   : > { %9304 = vmatmul.mubr.msk.f32.gmra.mxu0 %vm331_vm0, %v11004_v25  ;;  %9360 = vmatmul.mubr.msk.f32.gmra.mxu1 %vm331_vm0, %v10784_v35  ;;  %v11032_v35 = vld [vmem:[#allocation2 + $0x13a] sm:$0xff] }
  0x98   : > { %9306 = vmatprep.mubr.msk.f32.mxu0 %vm331_vm0, %v11008_v23  ;;  %9362 = vmatprep.mubr.msk.f32.mxu1 %vm331_vm0, %v10788_v37  ;;  %v11040_v37 = vld [vmem:[#allocation2 + $0x142] sm:$0xff] }
  0x9b   : > { %9307 = vmatmul.mubr.msk.f32.gmra.mxu0 %vm331_vm0, %v11016_v31  ;;  %9363 = vmatmul.mubr.msk.f32.gmra.mxu1 %vm331_vm0, %v10800_v39  ;;  %v11044_v39 = vld [vmem:[#allocation2 + $0x152] sm:$0xff] }
  0x9c   : > { %9309 = vmatprep.mubr.msk.f32.mxu0 %vm331_vm0, %v11020_v27  ;;  %9365 = vmatprep.mubr.msk.f32.mxu1 %vm331_vm0, %v10804_v63  ;;  %v11052_v63 = vld [vmem:[#allocation2 + $0x15a] sm:$0xff] }
  0x9f   : > { %9310 = vmatmul.mubr.msk.f32.gmra.mxu0 %vm331_vm0, %v11028_v33  ;;  %9366 = vmatmul.mubr.msk.f32.gmra.mxu1 %vm331_vm0, %v10816_v2  ;;  %v11056_v2 = vld [vmem:[#allocation2 + $0x16a] sm:$0xff] }
  0xa0   : > { %9312 = vmatprep.mubr.msk.f32.mxu0 %vm331_vm0, %v11032_v35  ;;  %9368 = vmatprep.mubr.msk.f32.mxu1 %vm331_vm0, %v10820_v5  ;;  %v11066_v5 = vld [vmem:[#allocation2 + $0x172] sm:$0xff] }
  0xa3   : > { %9313 = vmatmul.mubr.msk.f32.gmra.mxu0 %vm331_vm0, %v11040_v37  ;;  %9369 = vmatmul.mubr.msk.f32.gmra.mxu1 %vm331_vm0, %v10832_v7  ;;  %v11070_v7 = vld [vmem:[#allocation2 + $0x188] sm:$0xff] }
  0xa4   : > { %9315 = vmatprep.mubr.msk.f32.mxu0 %vm331_vm0, %v11044_v39  ;;  %9371 = vmatprep.mubr.msk.f32.mxu1 %vm331_vm0, %v10836_v10  ;;  %v2747_v10 = vld [vmem:[%s13895_s1 + $0xd0] sm:$0xff] }
  0xa7   : > { %9316 = vmatmul.mubr.msk.f32.gmra.mxu0 %vm331_vm0, %v11052_v63  ;;  %9372 = vmatmul.mubr.msk.f32.gmra.mxu1 %vm331_vm0, %v10848_v28  ;;  %v11124_v28 = vld [vmem:[%s13895_s1 + $0x118] sm:$0xff] }
  0xa8   : > { %9318 = vmatprep.mubr.msk.f32.mxu0 %vm331_vm0, %v11056_v2  ;;  %9374 = vmatprep.mubr.msk.f32.mxu1 %vm331_vm0, %v11058_v45 }
  0xab   : > { %9319 = vmatmul.mubr.msk.f32.gmra.mxu0 %vm331_vm0, %v11066_v5  ;;  %9375 = vmatmul.mubr.msk.f32.gmra.mxu1 %vm331_vm0, %v11070_v7 }
  0xac   : > { %9385 = vmatprep.mubr.msk.f32.mxu0 %vm331_vm0, %v10572_v40  ;;  %9441 = vmatprep.mubr.msk.f32.mxu1 %vm331_vm0, %v10857_v8  ;;  %v2746_v40 = vld [vmem:[%s13895_s1 + $0xc8] sm:$0xff] }
  0xad   : > { %v3135_v8 = vld [vmem:[%s13895_s1 + $0xe8] sm:$0xff] }
  0xaf   : > { %9386 = vmatmul.mubr.msk.f32.vlgmr.msra.gmra.mxu0 %vm331_vm0, %v10576_v42  ;;  %9442 = vmatmul.mubr.msk.f32.vlgmr.msra.gmra.mxu1 %vm331_vm0, %v10868_v29  ;;  %v3136_v42 = vld [vmem:[%s13895_s1 + $0xf0] sm:$0xff]  ;;  %v3134_v29 = vld [vmem:[%s13895_s1 + $0xe0] sm:$0xff] }
  0xb0   : > { %9490 = vmatpush3.msra.mxu0 %v10914_v43  ;;  %9388 = vmatprep.mubr.msk.f32.mxu0 %vm331_vm0, %v10587_v44  ;;  %v3112_v43 = vld [vmem:[#allocation2 + $0xa9] sm:$0xff] }
  0xb1   : > { %9444 = vmatprep.mubr.msk.f32.mxu1 %vm331_vm0, %v10872_v41  ;;  %9491 = vmatprep.subr.mxu0 %v2747_v10 }
  0xb2   : > { %9492 = vmatpush3.msra.mxu0 %v2747_v10  ;;  %9546 = vmatpush3.msra.mxu1 %v10935_v55  ;;  %v2745_v55 = vld [vmem:[%s13895_s1 + $0xc0] sm:$0xff] }
  0xb3   : > { %9389 = vmatmul.mubr.msk.f32.gmra.mxu0 %vm331_vm0, %v10599_v46  ;;  %9445 = vmatmul.mubr.msk.f32.gmra.mxu1 %vm331_vm0, %v10887_v50  ;;  %v13973_v50 = vld [vmem:[#allocation13_spill] sm:$0xff] }
  0xb4   : > { %9391 = vmatprep.mubr.msk.f32.mxu0 %vm331_vm0, %v10603_v48  ;;  %9447 = vmatprep.mubr.msk.f32.mxu1 %vm331_vm0, %v10891_v6  ;;  %v13974_v6 = vld [vmem:[#allocation14_spill] sm:$0xff] }
  0xb5   : > { %9493 = vmatprep.subr.mxu0 %v2746_v40  ;;  %9547 = vmatprep.subr.mxu1 %v3136_v42 }
  0xb6   : > { %9494 = vmatpush3.msra.mxu0 %v2746_v40  ;;  %9548 = vmatpush3.msra.mxu1 %v3136_v42  ;;  %v13977_v42 = vld [vmem:[#allocation17_spill] sm:$0xff] }
  0xb7   : > { %9392 = vmatmul.mubr.msk.f32.gmra.mxu0 %vm331_vm0, %v10623_v52  ;;  %9448 = vmatmul.mubr.msk.f32.gmra.mxu1 %vm331_vm0, %v10905_v49  ;;  %v13964_v49 = vld [vmem:[#allocation24_spill] sm:$0xff] }
  0xb8   : > { %9394 = vmatprep.mubr.msk.f32.mxu0 %vm331_vm0, %v10627_v54  ;;  %9450 = vmatprep.mubr.msk.f32.mxu1 %vm331_vm0, %v10909_v4 }
  0xb9   : > { %9495 = vmatprep.subr.mxu0 %v2745_v55  ;;  %9549 = vmatprep.subr.mxu1 %v3135_v8 }
  0xba   : > { %9496 = vmatpush3.msra.mxu0 %v2745_v55  ;;  %9550 = vmatpush3.msra.mxu1 %v3135_v8  ;;  %v13978_v55 = vld [vmem:[#allocation18_spill] sm:$0xff] }
  0xbb   : > { %9395 = vmatmul.mubr.msk.f32.gmra.mxu0 %vm331_vm0, %v10645_v57  ;;  %9451 = vmatmul.mubr.msk.f32.gmra.mxu1 %vm331_vm0, %v10925_v56  ;;  %v3115_v8 = vld [vmem:[#allocation2 + $0xc9] sm:$0xff] }
  0xbc   : > { %9397 = vmatprep.mubr.msk.f32.mxu0 %vm331_vm0, %v10649_v59  ;;  %9453 = vmatprep.mubr.msk.f32.mxu1 %vm331_vm0, %v10929_v47 }
  0xbd   : > { %9601 = vmatprep.subr.mxu0 %v11124_v28  ;;  %9551 = vmatprep.subr.mxu1 %v3134_v29 }
  0xbe   : > { %9552 = vmatpush3.msra.mxu1 %v3134_v29 }
  0xbf   : > { %9398 = vmatmul.mubr.msk.f32.gmra.mxu0 %vm331_vm0, %v10654_v61  ;;  %9454 = vmatmul.mubr.msk.f32.gmra.mxu1 %vm331_vm0, %v10943_v60  ;;  %v11218_v60 = vld [vmem:[#allocation2 + $0x181] sm:$0xff] }
  0xc0   : > { %9400 = vmatprep.mubr.msk.f32.mxu0 %vm331_vm0, %v10664_v1  ;;  %9456 = vmatprep.mubr.msk.f32.mxu1 %vm331_vm0, %v10947_v53  ;;  %v11228_v1 = vld [vmem:[#allocation2 + $0x189] sm:$0xff] }
  0xc3   : > { %9401 = vmatmul.mubr.msk.f32.gmra.mxu0 %vm331_vm0, %v10698_v12  ;;  %9457 = vmatmul.mubr.msk.f32.gmra.mxu1 %vm331_vm0, %v10956_v62  ;;  %v11220_v62 = vld [vmem:[#allocation2 + $0x182] sm:$0xff] }
  0xc4   : > { %9403 = vmatprep.mubr.msk.f32.mxu0 %vm331_vm0, %v10702_v14  ;;  %9459 = vmatprep.mubr.msk.f32.mxu1 %vm331_vm0, %v10960_v58  ;;  %v13965_v58 = vld [vmem:[#allocation25_spill] sm:$0xff]  ;;  %v13966_v14 = vld [vmem:[#allocation6_spill] sm:$0xff] }
  0xc7   : > { %9404 = vmatmul.mubr.msk.f32.gmra.mxu0 %vm331_vm0, %v10714_v16  ;;  %9460 = vmatmul.mubr.msk.f32.gmra.mxu1 %vm331_vm0, %v10968_v13 }
  0xc8   : > { %9406 = vmatprep.mubr.msk.f32.mxu0 %vm331_vm0, %v10718_v18  ;;  %9462 = vmatprep.mubr.msk.f32.mxu1 %vm331_vm0, %v10972_v9  ;;  %v11232_v9 = vld [vmem:[#allocation2 + $0x18a] sm:$0xff] }
  0xc9   : > { %v3525_v18 = vld [vmem:[%s13895_s1 + $0x110] sm:$0xff] }
  0xcb   : > { %9407 = vmatmul.mubr.msk.f32.gmra.mxu0 %vm331_vm0, %v10730_v20  ;;  %9463 = vmatmul.mubr.msk.f32.gmra.mxu1 %vm331_vm0, %v10980_v17 }
  0xcc   : > { %9409 = vmatprep.mubr.msk.f32.mxu0 %vm331_vm0, %v10734_v22  ;;  %9465 = vmatprep.mubr.msk.f32.mxu1 %vm331_vm0, %v10984_v15  ;;  %v3524_v22 = vld [vmem:[%s13895_s1 + $0x108] sm:$0xff] }
  0xcf   : > { %9410 = vmatmul.mubr.msk.f32.gmra.mxu0 %vm331_vm0, %v10746_v24  ;;  %9466 = vmatmul.mubr.msk.f32.gmra.mxu1 %vm331_vm0, %v10992_v21 }
  0xd0   : > { %9412 = vmatprep.mubr.msk.f32.mxu0 %vm331_vm0, %v10750_v26  ;;  %9468 = vmatprep.mubr.msk.f32.mxu1 %vm331_vm0, %v10996_v19  ;;  %v13967_v19 = vld [vmem:[#allocation7_spill] sm:$0xff]  ;;  %v13970_v26 = vld [vmem:[#allocation10_spill] sm:$0xff] }
  0xd3   : > { %9413 = vmatmul.mubr.msk.f32.gmra.mxu0 %vm331_vm0, %v10764_v30  ;;  %9469 = vmatmul.mubr.msk.f32.gmra.mxu1 %vm331_vm0, %v11004_v25  ;;  %v13969_v25 = vld [vmem:[#allocation9_spill] sm:$0xff] }
  0xd4   : > { %9415 = vmatprep.mubr.msk.f32.mxu0 %vm331_vm0, %v10770_v32  ;;  %9471 = vmatprep.mubr.msk.f32.mxu1 %vm331_vm0, %v11008_v23 }
  0xd7   : > { %9416 = vmatmul.mubr.msk.f32.gmra.mxu0 %vm331_vm0, %v10782_v34  ;;  %9472 = vmatmul.mubr.msk.f32.gmra.mxu1 %vm331_vm0, %v11016_v31  ;;  %v3523_v31 = vld [vmem:[%s13895_s1 + $0x100] sm:$0xff]  ;;  %v13971_v34 = vld [vmem:[#allocation11_spill] sm:$0xff] }
  0xd8   : > { %9418 = vmatprep.mubr.msk.f32.mxu0 %vm331_vm0, %v10786_v36  ;;  %9474 = vmatprep.mubr.msk.f32.mxu1 %vm331_vm0, %v11020_v27 }
  0xdb   : > { %9419 = vmatmul.mubr.msk.f32.gmra.mxu0 %vm331_vm0, %v10798_v38  ;;  %9475 = vmatmul.mubr.msk.f32.gmra.mxu1 %vm331_vm0, %v11028_v33  ;;  %v13975_v33 = vld [vmem:[#allocation15_spill] sm:$0xff] }
  0xdc   : > { %9421 = vmatprep.mubr.msk.f32.mxu0 %vm331_vm0, %v10802_v51  ;;  %9477 = vmatprep.mubr.msk.f32.mxu1 %vm331_vm0, %v11032_v35  ;;  %v13976_v35 = vld [vmem:[#allocation16_spill] sm:$0xff] }
  0xde   : > { %v9163_v13 = vpop.f32.mrf.mxu0 }
  0xdf   : > { %9422 = vmatmul.mubr.msk.f32.gmra.mxu0 %vm331_vm0, %v10814_v0  ;;  %9478 = vmatmul.mubr.msk.f32.gmra.mxu1 %vm331_vm0, %v11040_v37  ;;  %v3110_v0 = vld [vmem:[#allocation2 + $0x91] sm:$0xff] }
  0xe0   : > { %9424 = vmatprep.mubr.msk.f32.mxu0 %vm331_vm0, %v10818_v3  ;;  %9480 = vmatprep.mubr.msk.f32.mxu1 %vm331_vm0, %v11044_v39  ;;  %v9219_v15 = vpop.f32.mrf.mxu1  ;;  %v676_v17 = vpop.f32.mrf.mxu0  ;;  %v3113_v37 = vld [vmem:[#allocation2 + $0xb1] sm:$0xff] }
  0xe1   : > { %v11242_v16 = vadd.f32 %v9219_v15, %v9163_v13  ;;  %v13979_v15 = vld [vmem:[#allocation19_spill] sm:$0xff] }
  0xe2   : > { %v997_v20 = vpop.f32.mrf.mxu1 }
  0xe3   : > { %9425 = vmatmul.mubr.msk.f32.gmra.mxu0 %vm331_vm0, %v13964_v49  ;;  %9481 = vmatmul.mubr.msk.f32.gmra.mxu1 %vm331_vm0, %v11052_v63  ;;  %v11252_v21 = vadd.f32 %v997_v20, %v676_v17  ;;  %v3116_v49 = vld [vmem:[#allocation2 + $0xd9] sm:$0xff] }
  0xe4   : > { %9427 = vmatprep.mubr.msk.f32.mxu0 %vm331_vm0, %v13965_v58  ;;  %9483 = vmatprep.mubr.msk.f32.mxu1 %vm331_vm0, %v11056_v2  ;;  %v3114_v2 = vld [vmem:[#allocation2 + $0xc1] sm:$0xff] }
  0xe7   : > { %9428 = vmatmul.mubr.msk.f32.gmra.mxu0 %vm331_vm0, %v10846_v11  ;;  %9484 = vmatmul.mubr.msk.f32.gmra.mxu1 %vm331_vm0, %v11066_v5 }
  0xe8   : > { %9430 = vmatprep.mubr.msk.f32.mxu0 %vm331_vm0, %v11218_v60  ;;  %9486 = vmatprep.mubr.msk.f32.mxu1 %vm331_vm0, %v11220_v62 }
  0xeb   : > { %9431 = vmatmul.mubr.msk.f32.gmra.mxu0 %vm331_vm0, %v11228_v1  ;;  %9487 = vmatmul.mubr.msk.f32.gmra.mxu1 %vm331_vm0, %v11232_v9 }
  0xec   : > { %9497 = vmatprep.mubr.msk.f32.mxu0 %vm331_vm0, %v13966_v14  ;;  %9553 = vmatprep.mubr.msk.f32.mxu1 %vm331_vm0, %v10587_v44  ;;  %v13968_v44 = vld [vmem:[#allocation8_spill] sm:$0xff] }
  0xef   : > { %9498 = vmatmul.mubr.msk.f32.vlgmr.msra.gmra.mxu0 %vm331_vm0, %v13967_v19  ;;  %9554 = vmatmul.mubr.msk.f32.vlgmr.msra.gmra.mxu1 %vm331_vm0, %v10599_v46  ;;  %v3117_v19 = vld [vmem:[#allocation2 + $0xe1] sm:$0xff] }
  0xf0   : > { %9602 = vmatpush3.msra.mxu0 %v11124_v28  ;;  %9500 = vmatprep.mubr.msk.f32.mxu0 %vm331_vm0, %v13968_v44 }
  0xf1   : > { %9556 = vmatprep.mubr.msk.f32.mxu1 %vm331_vm0, %v10603_v48  ;;  %9603 = vmatprep.subr.mxu0 %v3525_v18 }
  0xf2   : > { %9604 = vmatpush3.msra.mxu0 %v3525_v18  ;;  %v9166_v23 = vpop.f32.mrf.mxu0  ;;  %v13980_v18 = vld [vmem:[#allocation20_spill] sm:$0xff] }
  0xf3   : > { %v9222_v24 = vpop.f32.mrf.mxu1  ;;  %9501 = vmatmul.mubr.msk.f32.gmra.mxu0 %vm331_vm0, %v13969_v25  ;;  %9557 = vmatmul.mubr.msk.f32.gmra.mxu1 %vm331_vm0, %v10623_v52 }
  0xf4   : > { %v11265_v46 = vadd.f32 %v9222_v24, %v9166_v23  ;;  %9503 = vmatprep.mubr.msk.f32.mxu0 %vm331_vm0, %v13970_v26  ;;  %9559 = vmatprep.mubr.msk.f32.mxu1 %vm331_vm0, %v10627_v54  ;;  %v686_v48 = vpop.f32.mrf.mxu0  ;;  %v13972_v54 = vld [vmem:[#allocation12_spill] sm:$0xff]  ;;  %v13981_v26 = vld [vmem:[#allocation21_spill] sm:$0xff] }
  0xf5   : > { %v1007_v27 = vpop.f32.mrf.mxu1  ;;  %9605 = vmatprep.subr.mxu0 %v3524_v22 }
  0xf6   : > { %v11271_v30 = vadd.f32 %v1007_v27, %v686_v48  ;;  %9606 = vmatpush3.msra.mxu0 %v3524_v22  ;;  %v9169_v32 = vpop.f32.mrf.mxu0  ;;  %v3118_v22 = vld [vmem:[#allocation2 + $0xf1] sm:$0xff] }
  0xf7   : > { %v9225_v52 = vpop.f32.mrf.mxu1  ;;  %9504 = vmatmul.mubr.msk.f32.gmra.mxu0 %vm331_vm0, %v13971_v34  ;;  %9560 = vmatmul.mubr.msk.f32.gmra.mxu1 %vm331_vm0, %v10645_v57  ;;  %v13982_v27 = vld [vmem:[#allocation22_spill] sm:$0xff]  ;;  %v2731_v34 = vld [vmem:[#allocation2 + $0x108] sm:$0xff] }
  0xf8   : > { %v11280_v36 = vadd.f32 %v9225_v52, %v9169_v32  ;;  %9506 = vmatprep.mubr.msk.f32.mxu0 %vm331_vm0, %v13972_v54  ;;  %9562 = vmatprep.mubr.msk.f32.mxu1 %vm331_vm0, %v10649_v59  ;;  %v696_v38 = vpop.f32.mrf.mxu0  ;;  %v3120_v54 = vld [vmem:[#allocation2 + $0x109] sm:$0xff] }
  0xf9   : > { %v1017_v51 = vpop.f32.mrf.mxu1  ;;  %9607 = vmatprep.subr.mxu0 %v3523_v31 }
  0xfa   : > { %v11286_v3 = vadd.f32 %v1017_v51, %v696_v38  ;;  %9608 = vmatpush3.msra.mxu0 %v3523_v31  ;;  %v9172_v11 = vpop.f32.mrf.mxu0  ;;  %v3119_v31 = vld [vmem:[#allocation2 + $0xf9] sm:$0xff] }
  0xfb   : > { %v9228_v41 = vpop.f32.mrf.mxu1  ;;  %9507 = vmatmul.mubr.msk.f32.gmra.mxu0 %vm331_vm0, %v13973_v50  ;;  %9563 = vmatmul.mubr.msk.f32.gmra.mxu1 %vm331_vm0, %v10654_v61  ;;  %v2732_v50 = vld [vmem:[#allocation2 + $0x110] sm:$0xff] }
  0xfc   : > { %v11292_v57 = vadd.f32 %v9228_v41, %v9172_v11  ;;  %9509 = vmatprep.mubr.msk.f32.mxu0 %vm331_vm0, %v13974_v6  ;;  %9565 = vmatprep.mubr.msk.f32.mxu1 %vm331_vm0, %v3110_v0  ;;  %v706_v59 = vpop.f32.mrf.mxu0  ;;  %v13983_v11 = vld [vmem:[#allocation23_spill] sm:$0xff] }
  0xfd   : > { %v1027_v4 = vpop.f32.mrf.mxu1  ;;  %v3121_v6 = vld [vmem:[#allocation2 + $0x111] sm:$0xff] }
  0xfe   : > { %v11297_v56 = vadd.f32 %v1027_v4, %v706_v59  ;;  %v9175_v47 = vpop.f32.mrf.mxu0 }
  0xff   : > { %v9231_v53 = vpop.f32.mrf.mxu1  ;;  %9510 = vmatmul.mubr.msk.f32.gmra.mxu0 %vm331_vm0, %v13975_v33  ;;  %9566 = vmatmul.mubr.msk.f32.gmra.mxu1 %vm331_vm0, %v10698_v12 }
 0x100   : > { %v11303_v61 = vadd.f32 %v9231_v53, %v9175_v47  ;;  %9512 = vmatprep.mubr.msk.f32.mxu0 %vm331_vm0, %v13976_v35  ;;  %9568 = vmatprep.mubr.msk.f32.mxu1 %vm331_vm0, %v3112_v43  ;;  %v716_v39 = vpop.f32.mrf.mxu0  ;;  %v2733_v43 = vld [vmem:[#allocation2 + $0x120] sm:$0xff] }
 0x101   : > { %v1037_v63 = vpop.f32.mrf.mxu1  ;;  %v3122_v47 = vld [vmem:[#allocation2 + $0x121] sm:$0xff] }
 0x102   : > { %v11308_v5 = vadd.f32 %v1037_v63, %v716_v39  ;;  %v9178_v10 = vpop.f32.mrf.mxu0  ;;  %v3123_v39 = vld [vmem:[#allocation2 + $0x129] sm:$0xff] }
 0x103   : > { %v9234_v40 = vpop.f32.mrf.mxu1  ;;  %9513 = vmatmul.mubr.msk.f32.gmra.mxu0 %vm331_vm0, %v13977_v42  ;;  %9569 = vmatmul.mubr.msk.f32.gmra.mxu1 %vm331_vm0, %v3113_v37  ;;  %v2734_v37 = vld [vmem:[#allocation2 + $0x128] sm:$0xff] }
 0x104   : > { %v11313_v12 = vadd.f32 %v9234_v40, %v9178_v10  ;;  %9515 = vmatprep.mubr.msk.f32.mxu0 %vm331_vm0, %v13978_v55  ;;  %9571 = vmatprep.mubr.msk.f32.mxu1 %vm331_vm0, %v3114_v2  ;;  %v726_v28 = vpop.f32.mrf.mxu0  ;;  %v2735_v10 = vld [vmem:[#allocation2 + $0x138] sm:$0xff] }
 0x105   : > { %v1047_v29 = vpop.f32.mrf.mxu1  ;;  %v3124_v40 = vld [vmem:[#allocation2 + $0x139] sm:$0xff] }
 0x106   : > { %v11318_v58 = vadd.f32 %v1047_v29, %v726_v28  ;;  %v9181_v13 = vpop.f32.mrf.mxu0  ;;  %v2736_v28 = vld [vmem:[#allocation2 + $0x140] sm:$0xff] }
 0x107   : > { %v9237_v14 = vpop.f32.mrf.mxu1  ;;  %9516 = vmatmul.mubr.msk.f32.gmra.mxu0 %vm331_vm0, %v13979_v15  ;;  %9572 = vmatmul.mubr.msk.f32.gmra.mxu1 %vm331_vm0, %v3115_v8  ;;  %v3125_v29 = vld [vmem:[#allocation2 + $0x141] sm:$0xff]  ;;  %v3126_v15 = vld [vmem:[#allocation2 + $0x151] sm:$0xff] }
 0x108   : > { %v11323_v17 = vadd.f32 %v9237_v14, %v9181_v13  ;;  %9518 = vmatprep.mubr.msk.f32.mxu0 %vm331_vm0, %v13980_v18  ;;  %9574 = vmatprep.mubr.msk.f32.mxu1 %vm331_vm0, %v3116_v49  ;;  %v736_v20 = vpop.f32.mrf.mxu0  ;;  %v2737_v14 = vld [vmem:[#allocation2 + $0x150] sm:$0xff] }
 0x109   : > { %v1057_v44 = vpop.f32.mrf.mxu1 }
 0x10a   : > { %v11328_v23 = vadd.f32 %v1057_v44, %v736_v20  ;;  %v9184_v24 = vpop.f32.mrf.mxu0  ;;  %v2738_v44 = vld [vmem:[#allocation2 + $0x158] sm:$0xff] }
 0x10b   : > { %v9240_v25 = vpop.f32.mrf.mxu1  ;;  %9519 = vmatmul.mubr.msk.f32.gmra.mxu0 %vm331_vm0, %v13981_v26  ;;  %9575 = vmatmul.mubr.msk.f32.gmra.mxu1 %vm331_vm0, %v3117_v19  ;;  %v2739_v26 = vld [vmem:[#allocation2 + $0x168] sm:$0xff] }
 0x10c   : > { %v11333_v48 = vadd.f32 %v9240_v25, %v9184_v24  ;;  %9521 = vmatprep.mubr.msk.f32.mxu0 %vm331_vm0, %v13982_v27  ;;  %9577 = vmatprep.mubr.msk.f32.mxu1 %vm331_vm0, %v3118_v22  ;;  %v746_v32 = vpop.f32.mrf.mxu0  ;;  %v3127_v22 = vld [vmem:[#allocation2 + $0x159] sm:$0xff]  ;;  %v3128_v27 = vld [vmem:[#allocation2 + $0x169] sm:$0xff] }
 0x10d   : > { %v1067_v52 = vpop.f32.mrf.mxu1 }
 0x10e   : > { %v11338_v38 = vadd.f32 %v1067_v52, %v746_v32  ;;  %v9187_v51 = vpop.f32.mrf.mxu0 }
 0x10f   : > { %v9243_v0 = vpop.f32.mrf.mxu1  ;;  %9522 = vmatmul.mubr.msk.f32.gmra.mxu0 %vm331_vm0, %v13983_v11  ;;  %9578 = vmatmul.mubr.msk.f32.gmra.mxu1 %vm331_vm0, %v3119_v31 }
 0x110   : > { %v11343_v41 = vadd.f32 %v9243_v0, %v9187_v51  ;;  %9524 = vmatprep.mubr.msk.f32.mxu0 %vm331_vm0, %v2731_v34  ;;  %9580 = vmatprep.mubr.msk.f32.mxu1 %vm331_vm0, %v3120_v54  ;;  %v11347_v59 = vpop.f32.mrf.mxu0  ;;  %v2740_v34 = vld [vmem:[#allocation2 + $0x170] sm:$0xff] }
 0x111   : > { %v11349_v4 = vpop.f32.mrf.mxu1  ;;  %v3129_v54 = vld [vmem:[#allocation2 + $0x171] sm:$0xff] }
 0x112   : > { %v9190_v53 = vpop.f32.mrf.mxu0 }
 0x113   : > { %v9246_v33 = vpop.f32.mrf.mxu1  ;;  %9525 = vmatmul.mubr.msk.f32.gmra.mxu0 %vm331_vm0, %v2732_v50  ;;  %9581 = vmatmul.mubr.msk.f32.gmra.mxu1 %vm331_vm0, %v3121_v6 }
 0x114   : > { %v11353_v35 = vadd.f32 %v9246_v33, %v9190_v53  ;;  %9527 = vmatprep.mubr.msk.f32.mxu0 %vm331_vm0, %v2733_v43  ;;  %9583 = vmatprep.mubr.msk.f32.mxu1 %vm331_vm0, %v3122_v47  ;;  %v11357_v63 = vpop.f32.mrf.mxu0  ;;  %v2743_v53 = vld [vmem:[#allocation2 + $0x198] sm:$0xff] }
 0x115   : > { %v11359_v2 = vpop.f32.mrf.mxu1  ;;  %v3132_v33 = vld [vmem:[#allocation2 + $0x199] sm:$0xff] }
 0x116   : > { %v9193_v42 = vpop.f32.mrf.mxu0 }
 0x117   : > { %v9249_v55 = vpop.f32.mrf.mxu1  ;;  %9528 = vmatmul.mubr.msk.f32.gmra.mxu0 %vm331_vm0, %v2734_v37  ;;  %9584 = vmatmul.mubr.msk.f32.gmra.mxu1 %vm331_vm0, %v3123_v39 }
 0x118   : > { %v11363_v8 = vadd.f32 %v9249_v55, %v9193_v42  ;;  %9530 = vmatprep.mubr.msk.f32.mxu0 %vm331_vm0, %v2735_v10  ;;  %9586 = vmatprep.mubr.msk.f32.mxu1 %vm331_vm0, %v3124_v40  ;;  %v11367_v49 = vpop.f32.mrf.mxu0  ;;  %v3491_v55 = vld [vmem:[#allocation2 + $0x32] sm:$0xff] }
 0x119   : > { %v11369_v13 = vpop.f32.mrf.mxu1 }
 0x11a   : > { %v9196_v18 = vpop.f32.mrf.mxu0 }
 0x11b   : > { %v9252_v19 = vpop.f32.mrf.mxu1  ;;  %9531 = vmatmul.mubr.msk.f32.gmra.mxu0 %vm331_vm0, %v2736_v28  ;;  %9587 = vmatmul.mubr.msk.f32.gmra.mxu1 %vm331_vm0, %v3125_v29 }
 0x11c   : > { %v11373_v20 = vadd.f32 %v9252_v19, %v9196_v18  ;;  %9533 = vmatprep.mubr.msk.f32.mxu0 %vm331_vm0, %v2737_v14  ;;  %9589 = vmatprep.mubr.msk.f32.mxu1 %vm331_vm0, %v3126_v15  ;;  %v11377_v24 = vpop.f32.mrf.mxu0  ;;  %v3493_v18 = vld [vmem:[#allocation2 + $0x4a] sm:$0xff] }
 0x11d   : > { %v11379_v25 = vpop.f32.mrf.mxu1 }
 0x11e   : > { %v9199_v31 = vpop.f32.mrf.mxu0 }
 0x11f   : > { %v9255_v32 = vpop.f32.mrf.mxu1  ;;  %9534 = vmatmul.mubr.msk.f32.gmra.mxu0 %vm331_vm0, %v2738_v44  ;;  %9590 = vmatmul.mubr.msk.f32.gmra.mxu1 %vm331_vm0, %v3127_v22 }
 0x120   : > { %v11383_v52 = vadd.f32 %v9255_v32, %v9199_v31  ;;  %9536 = vmatprep.mubr.msk.f32.mxu0 %vm331_vm0, %v2739_v26  ;;  %9592 = vmatprep.mubr.msk.f32.mxu1 %vm331_vm0, %v3128_v27  ;;  %v11387_v51 = vpop.f32.mrf.mxu0  ;;  %v3494_v26 = vld [vmem:[#allocation2 + $0x52] sm:$0xff]  ;;  %v3495_v32 = vld [vmem:[#allocation2 + $0x62] sm:$0xff] }
 0x121   : > { %v11389_v0 = vpop.f32.mrf.mxu1 }
 0x122   : > { %v9202_v11 = vpop.f32.mrf.mxu0 }
 0x123   : > { %v9258_v50 = vpop.f32.mrf.mxu1  ;;  %9537 = vmatmul.mubr.msk.f32.gmra.mxu0 %vm331_vm0, %v2740_v34  ;;  %9593 = vmatmul.mubr.msk.f32.gmra.mxu1 %vm331_vm0, %v3129_v54 }
 0x124   : > { %v11393_v6 = vadd.f32 %v9258_v50, %v9202_v11  ;;  %9539 = vmatprep.mubr.msk.f32.mxu0 %vm331_vm0, %v11058_v45  ;;  %9595 = vmatprep.mubr.msk.f32.mxu1 %vm331_vm0, %v11218_v60  ;;  %v11399_v43 = vpop.f32.mrf.mxu0  ;;  %v2744_v45 = vld [vmem:[#allocation2 + $0x1a0] sm:$0xff] }
 0x125   : > { %13984 = vst [vmem:[#allocation24_spill] sm:$0xff] %v11399_v43  ;;  %v11401_v47 = vpop.f32.mrf.mxu1  ;;  %v3133_v60 = vld [vmem:[#allocation2 + $0x1a1] sm:$0xff] }
 0x126   : > { %13985 = vst [vmem:[#allocation25_spill] sm:$0xff] %v11401_v47  ;;  %v9205_v37 = vpop.f32.mrf.mxu0 }
 0x127   : > { %v9261_v39 = vpop.f32.mrf.mxu1  ;;  %9540 = vmatmul.mubr.msk.f32.gmra.mxu0 %vm331_vm0, %v11070_v7  ;;  %9596 = vmatmul.mubr.msk.f32.gmra.mxu1 %vm331_vm0, %v11228_v1  ;;  %v3492_v1 = vld [vmem:[#allocation2 + $0x3a] sm:$0xff] }
 0x128   : > { %v11407_v10 = vadd.f32 %v9261_v39, %v9205_v37  ;;  %9542 = vmatprep.mubr.msk.f32.mxu0 %vm331_vm0, %v2743_v53  ;;  %9598 = vmatprep.mubr.msk.f32.mxu1 %vm331_vm0, %v3132_v33  ;;  %v11411_v40 = vpop.f32.mrf.mxu0  ;;  %v3497_v39 = vld [vmem:[#allocation2 + $0x7a] sm:$0xff] }
 0x129   : > { %13986 = vst [vmem:[#allocation6_spill] sm:$0xff] %v11411_v40  ;;  %v11413_v42 = vpop.f32.mrf.mxu1 }
 0x12a   : > { %13987 = vst [vmem:[#allocation7_spill] sm:$0xff] %v11413_v42  ;;  %v9208_v28 = vpop.f32.mrf.mxu0 }
 0x12b   : > { %v9264_v29 = vpop.f32.mrf.mxu1  ;;  %9543 = vmatmul.mubr.msk.f32.gmra.mxu0 %vm331_vm0, %v2744_v45  ;;  %9599 = vmatmul.mubr.msk.f32.gmra.mxu1 %vm331_vm0, %v3133_v60 }
 0x12c   : > { %v11417_v7 = vadd.f32 %v9264_v29, %v9208_v28  ;;  %9609 = vmatprep.mubr.msk.f32.mxu0 %vm331_vm0, %v3491_v55  ;;  %v11420_v14 = vpop.f32.mrf.mxu0 }
 0x12d   : > { %13988 = vst [vmem:[#allocation8_spill] sm:$0xff] %v11420_v14  ;;  %v11422_v15 = vpop.f32.mrf.mxu1 }
 0x12e   : > { %13989 = vst [vmem:[#allocation9_spill] sm:$0xff] %v11422_v15  ;;  %v9275_v19 = vpop.f32.mrf.mxu0 }
 0x12f   : > { %9610 = vmatmul.mubr.msk.f32.vlgmr.msra.gmra.mxu0 %vm331_vm0, %v3492_v1  ;;  %v9331_v44 = vpop.f32.mrf.mxu1  ;;  %v1514_v22 = vadd.f32 %v9275_v19, %v11242_v16  ;;  %v3496_v16 = vld [vmem:[#allocation2 + $0x6a] sm:$0xff] }
 0x130   : > { %9612 = vmatprep.mubr.msk.f32.mxu0 %vm331_vm0, %v3493_v18  ;;  %v1354_v27 = vpop.f32.mrf.mxu0  ;;  %v3499_v18 = vld [vmem:[#allocation2 + $0x92] sm:$0xff] }
 0x131   : > { %v11427_v31 = vpop.f32.mrf.mxu1  ;;  %v11430_v34 = vadd.f32 %v1354_v27, %v11252_v21  ;;  %v11432_v54 = vadd.f32 %v9331_v44, %v1514_v22  ;;  %v4054_v27 = vld [vmem:[%s13897_s3 + $0x38] sm:$0xff] }
 0x132   : > { %9657 = vmatprep.subr.mxu1 %v4054_v27 }
 0x133   : > { %v9278_v11 = vpop.f32.mrf.mxu0  ;;  %9613 = vmatmul.mubr.msk.f32.gmra.mxu0 %vm331_vm0, %v3494_v26  ;;  %v9334_v50 = vpop.f32.mrf.mxu1  ;;  %9658 = vmatpush3.msra.mxu1 %v4054_v27 }
 0x134   : > { %v1516_v53 = vadd.f32 %v9278_v11, %v11265_v46  ;;  %9615 = vmatprep.mubr.msk.f32.mxu0 %vm331_vm0, %v3495_v32  ;;  %v3498_v46 = vld [vmem:[#allocation2 + $0x82] sm:$0xff] }
 0x135   : > { %v1364_v33 = vpop.f32.mrf.mxu0  ;;  %v11437_v37 = vpop.f32.mrf.mxu1 }
 0x136   : > { %v11440_v45 = vadd.f32 %v1364_v33, %v11271_v30  ;;  %v11442_v21 = vadd.f32 %v9334_v50, %v1516_v53 }
 0x137   : > { %v9281_v60 = vpop.f32.mrf.mxu0  ;;  %9616 = vmatmul.mubr.msk.f32.gmra.mxu0 %vm331_vm0, %v3496_v16  ;;  %v9337_v55 = vpop.f32.mrf.mxu1 }
 0x138   : > { %v1518_v28 = vadd.f32 %v9281_v60, %v11280_v36  ;;  %9618 = vmatprep.mubr.msk.f32.mxu0 %vm331_vm0, %v3497_v39  ;;  %v3500_v36 = vld [vmem:[#allocation2 + $0x9a] sm:$0xff]  ;;  %v3502_v39 = vld [vmem:[#allocation2 + $0xb2] sm:$0xff] }
 0x139   : > { %v1374_v29 = vpop.f32.mrf.mxu0  ;;  %v11447_v1 = vpop.f32.mrf.mxu1 }
 0x13a   : > { %v11450_v19 = vadd.f32 %v1374_v29, %v11286_v3  ;;  %v11452_v30 = vadd.f32 %v9337_v55, %v1518_v28  ;;  %v3501_v3 = vld [vmem:[#allocation2 + $0xaa] sm:$0xff]  ;;  %v3503_v28 = vld [vmem:[#allocation2 + $0xc2] sm:$0xff] }
 0x13b   : > { %v9284_v44 = vpop.f32.mrf.mxu0  ;;  %9619 = vmatmul.mubr.msk.f32.gmra.mxu0 %vm331_vm0, %v3498_v46  ;;  %v9340_v22 = vpop.f32.mrf.mxu1 }
 0x13c   : > { %v1520_v26 = vadd.f32 %v9284_v44, %v11292_v57  ;;  %9621 = vmatprep.mubr.msk.f32.mxu0 %vm331_vm0, %v3499_v18 }
 0x13d   : > { %v1384_v32 = vpop.f32.mrf.mxu0  ;;  %v11460_v11 = vpop.f32.mrf.mxu1 }
 0x13e   : > { %v11463_v50 = vadd.f32 %v1384_v32, %v11297_v56  ;;  %v11465_v53 = vadd.f32 %v9340_v22, %v1520_v26 }
 0x13f   : > { %v9287_v16 = vpop.f32.mrf.mxu0  ;;  %9622 = vmatmul.mubr.msk.f32.gmra.mxu0 %vm331_vm0, %v3500_v36  ;;  %v9343_v57 = vpop.f32.mrf.mxu1  ;;  %v3505_v36 = vld [vmem:[#allocation2 + $0xda] sm:$0xff] }
 0x140   : > { %v1522_v33 = vadd.f32 %v9287_v16, %v11303_v61  ;;  %9624 = vmatprep.mubr.msk.f32.mxu0 %vm331_vm0, %v3501_v3  ;;  %v3504_v61 = vld [vmem:[#allocation2 + $0xca] sm:$0xff] }
 0x141   : > { %v1394_v60 = vpop.f32.mrf.mxu0  ;;  %v11470_v55 = vpop.f32.mrf.mxu1 }
 0x142   : > { %v11473_v46 = vadd.f32 %v1394_v60, %v11308_v5  ;;  %v11475_v56 = vadd.f32 %v9343_v57, %v1522_v33 }
 0x143   : > { %v9290_v29 = vpop.f32.mrf.mxu0  ;;  %9625 = vmatmul.mubr.msk.f32.gmra.mxu0 %vm331_vm0, %v3502_v39  ;;  %v9346_v18 = vpop.f32.mrf.mxu1  ;;  %v3507_v39 = vld [vmem:[#allocation2 + $0xf2] sm:$0xff] }
 0x144   : > { %v1524_v44 = vadd.f32 %v9290_v29, %v11313_v12  ;;  %9627 = vmatprep.mubr.msk.f32.mxu0 %vm331_vm0, %v3503_v28  ;;  %v3506_v12 = vld [vmem:[#allocation2 + $0xe2] sm:$0xff] }
 0x145   : > { %v1404_v22 = vpop.f32.mrf.mxu0  ;;  %v11480_v26 = vpop.f32.mrf.mxu1 }
 0x146   : > { %v11483_v27 = vadd.f32 %v1404_v22, %v11318_v58  ;;  %v11485_v5 = vadd.f32 %v9346_v18, %v1524_v44  ;;  %v4053_v44 = vld [vmem:[%s13897_s3 + $0x30] sm:$0xff] }
 0x147   : > { %v9293_v32 = vpop.f32.mrf.mxu0  ;;  %9628 = vmatmul.mubr.msk.f32.gmra.mxu0 %vm331_vm0, %v3504_v61  ;;  %v9349_v3 = vpop.f32.mrf.mxu1  ;;  %9659 = vmatprep.subr.mxu1 %v4053_v44 }
 0x148   : > { %v1526_v16 = vadd.f32 %v9293_v32, %v11323_v17  ;;  %9630 = vmatprep.mubr.msk.f32.mxu0 %vm331_vm0, %v3505_v36  ;;  %v3508_v17 = vld [vmem:[#allocation2 + $0xfa] sm:$0xff]  ;;  %9660 = vmatpush3.msra.mxu1 %v4053_v44 }
 0x149   : > { %v1414_v57 = vpop.f32.mrf.mxu0  ;;  %v11490_v33 = vpop.f32.mrf.mxu1 }
 0x14a   : > { %13990 = vst [vmem:[#allocation10_spill] sm:$0xff] %v11490_v33  ;;  %v11493_v60 = vadd.f32 %v1414_v57, %v11328_v23  ;;  %v11495_v58 = vadd.f32 %v9349_v3, %v1526_v16  ;;  %v3509_v23 = vld [vmem:[#allocation2 + $0x10a] sm:$0xff]  ;;  %v1078_v16 = vadd.f32 %v11349_v4, %v11347_v59  ;;  %v3510_v57 = vld [vmem:[#allocation2 + $0x112] sm:$0xff] }
 0x14b   : > { %v9296_v28 = vpop.f32.mrf.mxu0  ;;  %9631 = vmatmul.mubr.msk.f32.gmra.mxu0 %vm331_vm0, %v3506_v12  ;;  %v9352_v29 = vpop.f32.mrf.mxu1 }
 0x14c   : > { %13991 = vst [vmem:[#allocation11_spill] sm:$0xff] %v11493_v60  ;;  %v1528_v18 = vadd.f32 %v9296_v28, %v11333_v48  ;;  %9633 = vmatprep.mubr.msk.f32.mxu0 %vm331_vm0, %v3507_v39 }
 0x14d   : > { %v1424_v61 = vpop.f32.mrf.mxu0  ;;  %v11503_v22 = vpop.f32.mrf.mxu1 }
 0x14e   : > { %13992 = vst [vmem:[#allocation12_spill] sm:$0xff] %v11503_v22  ;;  %v11506_v36 = vadd.f32 %v1424_v61, %v11338_v38  ;;  %v11508_v32 = vadd.f32 %v9352_v29, %v1528_v18  ;;  %v3511_v38 = vld [vmem:[#allocation2 + $0x122] sm:$0xff] }
 0x14f   : > { %v9299_v3 = vpop.f32.mrf.mxu0  ;;  %9634 = vmatmul.mubr.msk.f32.gmra.mxu0 %vm331_vm0, %v3508_v17  ;;  %v9355_v48 = vpop.f32.mrf.mxu1 }
 0x150   : > { %13993 = vst [vmem:[#allocation13_spill] sm:$0xff] %v11506_v36  ;;  %v1530_v12 = vadd.f32 %v9299_v3, %v11343_v41  ;;  %9636 = vmatprep.mubr.msk.f32.mxu0 %vm331_vm0, %v3509_v23  ;;  %v3512_v41 = vld [vmem:[#allocation2 + $0x12a] sm:$0xff]  ;;  %v3513_v23 = vld [vmem:[#allocation2 + $0x13a] sm:$0xff] }
 0x151   : > { %v1434_v39 = vpop.f32.mrf.mxu0  ;;  %v11515_v28 = vpop.f32.mrf.mxu1 }
 0x152   : > { %13994 = vst [vmem:[#allocation14_spill] sm:$0xff] %v11515_v28  ;;  %v11517_v61 = vadd.f32 %v1434_v39, %v1078_v16  ;;  %v11519_v29 = vadd.f32 %v9355_v48, %v1530_v12  ;;  %v3984_v28 = vld [vmem:[#allocation2 + $0x8] sm:$0xff] }
 0x153   : > { %v9302_v18 = vpop.f32.mrf.mxu0  ;;  %9637 = vmatmul.mubr.msk.f32.gmra.mxu0 %vm331_vm0, %v3510_v57  ;;  %v9358_v17 = vpop.f32.mrf.mxu1  ;;  %v3514_v57 = vld [vmem:[#allocation2 + $0x142] sm:$0xff] }
 0x154   : > { %13995 = vst [vmem:[#allocation15_spill] sm:$0xff] %v11517_v61  ;;  %v1532_v44 = vadd.f32 %v9302_v18, %v11353_v35  ;;  %9639 = vmatprep.mubr.msk.f32.mxu0 %vm331_vm0, %v3511_v38  ;;  %v3515_v38 = vld [vmem:[#allocation2 + $0x152] sm:$0xff] }
 0x155   : > { %v11524_v59 = vpop.f32.mrf.mxu0  ;;  %v11526_v4 = vpop.f32.mrf.mxu1 }
 0x156   : > { %13996 = vst [vmem:[#allocation16_spill] sm:$0xff] %v11524_v59  ;;  %13997 = vst [vmem:[#allocation17_spill] sm:$0xff] %v11526_v4  ;;  %v11528_v3 = vadd.f32 %v9358_v17, %v1532_v44  ;;  %v4020_v59 = vld [vmem:[#allocation2 + $0x9] sm:$0xff] }
 0x157   : > { %v9305_v16 = vpop.f32.mrf.mxu0  ;;  %9640 = vmatmul.mubr.msk.f32.gmra.mxu0 %vm331_vm0, %v3512_v41  ;;  %v9361_v48 = vpop.f32.mrf.mxu1  ;;  %v3516_v41 = vld [vmem:[#allocation2 + $0x15a] sm:$0xff] }
 0x158   : > { %v1534_v12 = vadd.f32 %v9305_v16, %v11363_v8  ;;  %9642 = vmatprep.mubr.msk.f32.mxu0 %vm331_vm0, %v3513_v23  ;;  %v4052_v8 = vld [vmem:[%s13897_s3 + $0x28] sm:$0xff] }
 0x159   : > { %v11533_v35 = vpop.f32.mrf.mxu0  ;;  %v11535_v39 = vpop.f32.mrf.mxu1  ;;  %9661 = vmatprep.subr.mxu1 %v4052_v8 }
 0x15a   : > { %13998 = vst [vmem:[#allocation18_spill] sm:$0xff] %v11533_v35  ;;  %13999 = vst [vmem:[#allocation19_spill] sm:$0xff] %v11535_v39  ;;  %v11537_v18 = vadd.f32 %v9361_v48, %v1534_v12  ;;  %v3517_v39 = vld [vmem:[#allocation2 + $0x16a] sm:$0xff]  ;;  %9662 = vmatpush3.msra.mxu1 %v4052_v8 }
 0x15b   : > { %v9308_v4 = vpop.f32.mrf.mxu0  ;;  %9643 = vmatmul.mubr.msk.f32.gmra.mxu0 %vm331_vm0, %v3514_v57  ;;  %v9364_v17 = vpop.f32.mrf.mxu1  ;;  %v3518_v57 = vld [vmem:[#allocation2 + $0x172] sm:$0xff] }
 0x15c   : > { %v1536_v44 = vadd.f32 %v9308_v4, %v11373_v20  ;;  %9645 = vmatprep.mubr.msk.f32.mxu0 %vm331_vm0, %v3515_v38 }
 0x15d   : > { %v11545_v23 = vpop.f32.mrf.mxu0  ;;  %v11547_v16 = vpop.f32.mrf.mxu1 }
 0x15e   : > { %14000 = vst [vmem:[#allocation20_spill] sm:$0xff] %v11545_v23  ;;  %14001 = vst [vmem:[#allocation21_spill] sm:$0xff] %v11547_v16  ;;  %v11549_v48 = vadd.f32 %v9364_v17, %v1536_v44 }
 0x15f   : > { %v9311_v12 = vpop.f32.mrf.mxu0  ;;  %9646 = vmatmul.mubr.msk.f32.gmra.mxu0 %vm331_vm0, %v3516_v41  ;;  %v9367_v20 = vpop.f32.mrf.mxu1 }
 0x160   : > { %v1538_v4 = vadd.f32 %v9311_v12, %v11383_v52  ;;  %9648 = vmatprep.mubr.msk.f32.mxu0 %vm331_vm0, %v3517_v39  ;;  %v3521_v39 = vld [vmem:[#allocation2 + $0x19a] sm:$0xff] }
 0x161   : > { %v11554_v38 = vpop.f32.mrf.mxu0  ;;  %v11556_v35 = vpop.f32.mrf.mxu1 }
 0x162   : > { %14002 = vst [vmem:[#allocation22_spill] sm:$0xff] %v11554_v38  ;;  %14003 = vst [vmem:[#allocation23_spill] sm:$0xff] %v11556_v35  ;;  %v11558_v23 = vadd.f32 %v9367_v20, %v1538_v4  ;;  %v3983_v38 = vld [vmem:[#allocation2] sm:$0xff] }
 0x163   : > { %v9314_v16 = vpop.f32.mrf.mxu0  ;;  %9649 = vmatmul.mubr.msk.f32.gmra.mxu0 %vm331_vm0, %v3518_v57  ;;  %v9370_v17 = vpop.f32.mrf.mxu1 }
 0x164   : > { %v1540_v44 = vadd.f32 %v9314_v16, %v11393_v6  ;;  %9651 = vmatprep.mubr.msk.f32.mxu0 %vm331_vm0, %v11220_v62  ;;  %v3522_v6 = vld [vmem:[#allocation2 + $0x1a2] sm:$0xff] }
 0x165   : > { %v11564_v41 = vpop.f32.mrf.mxu0  ;;  %v11566_v52 = vpop.f32.mrf.mxu1 }
 0x166   : > { %14004 = vst [vmem:[#allocation26_spill] sm:$0xff] %v11564_v41  ;;  %14005 = vst [vmem:[#allocation27_spill] sm:$0xff] %v11566_v52  ;;  %v11568_v8 = vadd.f32 %v9370_v17, %v1540_v44 }
 0x167   : > { %v9317_v12 = vpop.f32.mrf.mxu0  ;;  %9652 = vmatmul.mubr.msk.f32.gmra.mxu0 %vm331_vm0, %v11232_v9  ;;  %v9373_v20 = vpop.f32.mrf.mxu1  ;;  %v4051_v9 = vld [vmem:[%s13897_s3 + $0x20] sm:$0xff] }
 0x168   : > { %v1542_v4 = vadd.f32 %v9317_v12, %v11407_v10  ;;  %9654 = vmatprep.mubr.msk.f32.mxu0 %vm331_vm0, %v3521_v39  ;;  %9663 = vmatprep.subr.mxu1 %v4051_v9 }
 0x169   : > { %v11574_v16 = vpop.f32.mrf.mxu0  ;;  %v11576_v62 = vpop.f32.mrf.mxu1  ;;  %9664 = vmatpush3.msra.mxu1 %v4051_v9 }
 0x16a   : > { %14006 = vst [vmem:[#allocation28_spill] sm:$0xff] %v11574_v16  ;;  %14007 = vst [vmem:[#allocation29_spill] sm:$0xff] %v11576_v62  ;;  %v11578_v57 = vadd.f32 %v9373_v20, %v1542_v4 }
 0x16b   : > { %v9320_v52 = vpop.f32.mrf.mxu0  ;;  %9655 = vmatmul.mubr.msk.f32.gmra.mxu0 %vm331_vm0, %v3522_v6  ;;  %v9376_v17 = vpop.f32.mrf.mxu1 }
 0x16c   : > { %v1544_v44 = vadd.f32 %v9320_v52, %v11417_v7  ;;  %v4018_v52 = vld [vmem:[%s13897_s3 + $0x18] sm:$0xff]  ;;  %9721 = vmatprep.mubr.msk.f32.mxu0 %vm331_vm0, %v3983_v38 }
 0x16d   : > { %v11585_v10 = vpop.f32.mrf.mxu0  ;;  %v11587_v39 = vpop.f32.mrf.mxu1  ;;  %9713 = vmatprep.subr.mxu0 %v4018_v52 }
 0x16e   : > { %14008 = vst [vmem:[#allocation30_spill] sm:$0xff] %v11585_v10  ;;  %14009 = vst [vmem:[#allocation31_spill] sm:$0xff] %v11587_v39  ;;  %v11589_v12 = vadd.f32 %v9376_v17, %v1544_v44  ;;  %9714 = vmatpush3.msra.mxu0 %v4018_v52 }
 0x16f   : > { %v9387_v20 = vpop.f32.mrf.mxu0  ;;  %v11591_v4 = vpop.f32.mrf.mxu1 }
 0x170   : > { %v11594_v6 = vadd.f32 %v9387_v20, %v11432_v54  ;;  %v4017_v54 = vld [vmem:[%s13897_s3 + $0x10] sm:$0xff]  ;;  %v4016_v20 = vld [vmem:[%s13897_s3 + $0x8] sm:$0xff] }
 0x171   : > { %v11596_v62 = vpop.f32.mrf.mxu0  ;;  %v11598_v7 = vpop.f32.mrf.mxu1  ;;  %9715 = vmatprep.subr.mxu0 %v4017_v54 }
 0x172   : > { %9716 = vmatpush3.msra.mxu0 %v4017_v54  ;;  %v4019_v54 = vld [vmem:[#allocation2 + $0x1] sm:$0xff] }
 0x173   : > { %v9390_v10 = vpop.f32.mrf.mxu0  ;;  %v11603_v39 = vpop.f32.mrf.mxu1  ;;  %9717 = vmatprep.subr.mxu0 %v4016_v20  ;;  %9665 = vmatprep.mubr.msk.f32.mxu1 %vm331_vm0, %v4019_v54 }
 0x174   : > { %v11606_v17 = vadd.f32 %v9390_v10, %v11442_v21  ;;  %9718 = vmatpush3.msra.mxu0 %v4016_v20  ;;  %v4015_v10 = vld [vmem:[%s13897_s3] sm:$0xff]  ;;  %9666 = vmatmul.mubr.msk.f32.vlgmr.msra.gmra.mxu1 %vm331_vm0, %v4020_v59 }
 0x175   : > { %v11611_v44 = vpop.f32.mrf.mxu0  ;;  %v11613_v9 = vpop.f32.mrf.mxu1  ;;  %9719 = vmatprep.subr.mxu0 %v4015_v10 }
 0x176   : > { %9720 = vmatpush3.msra.mxu0 %v4015_v10 }
 0x177   : > { %v9393_v16 = vpop.f32.mrf.mxu0  ;;  %v11618_v41 = vpop.f32.mrf.mxu1  ;;  %9722 = vmatmul.mubr.msk.f32.vlgmr.msra.gmra.mxu0 %vm331_vm0, %v3984_v28 }
 0x178   : > { %v11621_v21 = vadd.f32 %v9393_v16, %v11452_v30 }
 0x179   : > { %v11626_v52 = vpop.f32.mrf.mxu0  ;;  %v11628_v35 = vpop.f32.mrf.mxu1 }
 0x17b   : > { %v9396_v61 = vpop.f32.mrf.mxu0  ;;  %v11631_v30 = vpop.f32.mrf.mxu1 }
 0x17c   : > { %v11636_v16 = vadd.f32 %v9396_v61, %v11465_v53  ;;  %v4732_v53 = vld [vmem:[%s13897_s3 + $0x58] sm:$0xff] }
 0x17d   : > { %v11639_v20 = vpop.f32.mrf.mxu0  ;;  %v11641_v22 = vpop.f32.mrf.mxu1  ;;  %9769 = vmatprep.subr.mxu1 %v4732_v53 }
 0x17e   : > { %9770 = vmatpush3.msra.mxu1 %v4732_v53 }
 0x17f   : > { %v9399_v54 = vpop.f32.mrf.mxu0  ;;  %v11643_v10 = vpop.f32.mrf.mxu1 }
 0x180   : > { %v11646_v36 = vadd.f32 %v9399_v54, %v11475_v56 }
 0x181   : > { %v11648_v15 = vpop.f32.mrf.mxu0  ;;  %v11650_v38 = vpop.f32.mrf.mxu1 }
 0x182   : > { %14010 = vst [vmem:[#allocation32_spill] sm:$0xff] %v11650_v38 }
 0x183   : > { %v9402_v61 = vpop.f32.mrf.mxu0  ;;  %v11655_v28 = vpop.f32.mrf.mxu1 }
 0x184   : > { %14011 = vst [vmem:[#allocation33_spill] sm:$0xff] %v11655_v28  ;;  %v11658_v59 = vadd.f32 %v9402_v61, %v11485_v5 }
 0x185   : > { %v11660_v14 = vpop.f32.mrf.mxu0  ;;  %v11662_v56 = vpop.f32.mrf.mxu1 }
 0x186   : > { %14012 = vst [vmem:[#allocation34_spill] sm:$0xff] %v11658_v59  ;;  %14013 = vst [vmem:[#allocation35_spill] sm:$0xff] %v11660_v14 }
 0x187   : > { %14014 = vst [vmem:[#allocation36_spill] sm:$0xff] %v11662_v56  ;;  %v9405_v54 = vpop.f32.mrf.mxu0  ;;  %v11664_v42 = vpop.f32.mrf.mxu1 }
 0x188   : > { %14015 = vst [vmem:[#allocation37_spill] sm:$0xff] %v11664_v42  ;;  %v11667_v40 = vadd.f32 %v9405_v54, %v11495_v58 }
 0x189   : > { %v11669_v33 = vpop.f32.mrf.mxu0  ;;  %v11671_v60 = vpop.f32.mrf.mxu1 }
 0x18a   : > { %14016 = vst [vmem:[#allocation38_spill] sm:$0xff] %v11667_v40  ;;  %14017 = vst [vmem:[#allocation39_spill] sm:$0xff] %v11669_v33 }
 0x18b   : > { %14018 = vst [vmem:[#allocation40_spill] sm:$0xff] %v11671_v60  ;;  %v9408_v28 = vpop.f32.mrf.mxu0  ;;  %v11673_v47 = vpop.f32.mrf.mxu1 }
 0x18c   : > { %14019 = vst [vmem:[#allocation41_spill] sm:$0xff] %v11673_v47  ;;  %v11676_v5 = vadd.f32 %v9408_v28, %v11508_v32  ;;  %v4731_v47 = vld [vmem:[%s13897_s3 + $0x50] sm:$0xff] }
 0x18d   : > { %v11678_v53 = vpop.f32.mrf.mxu0  ;;  %v11680_v61 = vpop.f32.mrf.mxu1  ;;  %9771 = vmatprep.subr.mxu1 %v4731_v47 }
 0x18e   : > { %14020 = vst [vmem:[#allocation42_spill] sm:$0xff] %v11676_v5  ;;  %14021 = vst [vmem:[#allocation43_spill] sm:$0xff] %v11678_v53  ;;  %9772 = vmatpush3.msra.mxu1 %v4731_v47 }
 0x18f   : > { %14022 = vst [vmem:[#allocation44_spill] sm:$0xff] %v11680_v61  ;;  %v9411_v56 = vpop.f32.mrf.mxu0  ;;  %v11682_v59 = vpop.f32.mrf.mxu1 }
 0x190   : > { %14023 = vst [vmem:[#allocation45_spill] sm:$0xff] %v11682_v59  ;;  %v11685_v58 = vadd.f32 %v9411_v56, %v11519_v29 }
 0x191   : > { %v11687_v54 = vpop.f32.mrf.mxu0  ;;  %v11689_v42 = vpop.f32.mrf.mxu1 }
 0x192   : > { %14024 = vst [vmem:[#allocation46_spill] sm:$0xff] %v11685_v58  ;;  %14025 = vst [vmem:[#allocation47_spill] sm:$0xff] %v11687_v54 }
 0x193   : > { %14026 = vst [vmem:[#allocation48_spill] sm:$0xff] %v11689_v42  ;;  %v9414_v32 = vpop.f32.mrf.mxu0  ;;  %v11694_v28 = vpop.f32.mrf.mxu1 }
 0x194   : > { %14027 = vst [vmem:[#allocation49_spill] sm:$0xff] %v11694_v28  ;;  %v11697_v61 = vadd.f32 %v9414_v32, %v11528_v3 }
 0x195   : > { %v11699_v59 = vpop.f32.mrf.mxu0  ;;  %v11701_v29 = vpop.f32.mrf.mxu1 }
 0x196   : > { %14028 = vst [vmem:[#allocation50_spill] sm:$0xff] %v11697_v61  ;;  %14029 = vst [vmem:[#allocation51_spill] sm:$0xff] %v11699_v59 }
 0x197   : > { %14030 = vst [vmem:[#allocation52_spill] sm:$0xff] %v11701_v29  ;;  %v9417_v56 = vpop.f32.mrf.mxu0  ;;  %v11703_v58 = vpop.f32.mrf.mxu1 }
 0x198   : > { %14031 = vst [vmem:[#allocation53_spill] sm:$0xff] %v11703_v58  ;;  %v11706_v42 = vadd.f32 %v9417_v56, %v11537_v18 }
 0x199   : > { %v11708_v54 = vpop.f32.mrf.mxu0  ;;  %v11710_v5 = vpop.f32.mrf.mxu1 }
 0x19a   : > { %14032 = vst [vmem:[#allocation54_spill] sm:$0xff] %v11706_v42  ;;  %14033 = vst [vmem:[#allocation55_spill] sm:$0xff] %v11708_v54 }
 0x19b   : > { %14034 = vst [vmem:[#allocation56_spill] sm:$0xff] %v11710_v5  ;;  %v9420_v28 = vpop.f32.mrf.mxu0  ;;  %v11712_v53 = vpop.f32.mrf.mxu1 }
 0x19c   : > { %14035 = vst [vmem:[#allocation57_spill] sm:$0xff] %v11712_v53  ;;  %v11715_v3 = vadd.f32 %v9420_v28, %v11549_v48  ;;  %v4730_v53 = vld [vmem:[%s13897_s3 + $0x48] sm:$0xff] }
 0x19d   : > { %v11717_v47 = vpop.f32.mrf.mxu0  ;;  %v11719_v32 = vpop.f32.mrf.mxu1  ;;  %9773 = vmatprep.subr.mxu1 %v4730_v53 }
 0x19e   : > { %14036 = vst [vmem:[#allocation58_spill] sm:$0xff] %v11715_v3  ;;  %14037 = vst [vmem:[#allocation59_spill] sm:$0xff] %v11717_v47  ;;  %9774 = vmatpush3.msra.mxu1 %v4730_v53 }
 0x19f   : > { %14038 = vst [vmem:[#allocation60_spill] sm:$0xff] %v11719_v32  ;;  %v9423_v29 = vpop.f32.mrf.mxu0  ;;  %v11721_v61 = vpop.f32.mrf.mxu1 }
 0x1a0   : > { %14039 = vst [vmem:[#allocation61_spill] sm:$0xff] %v11721_v61  ;;  %v11724_v18 = vadd.f32 %v9423_v29, %v11558_v23 }
 0x1a1   : > { %v11726_v56 = vpop.f32.mrf.mxu0  ;;  %v11728_v58 = vpop.f32.mrf.mxu1 }
 0x1a2   : > { %14040 = vst [vmem:[#allocation62_spill] sm:$0xff] %v11724_v18  ;;  %14041 = vst [vmem:[#allocation63_spill] sm:$0xff] %v11726_v56 }
 0x1a3   : > { %14042 = vst [vmem:[#allocation64_spill] sm:$0xff] %v11728_v58  ;;  %v9426_v48 = vpop.f32.mrf.mxu0  ;;  %v11733_v28 = vpop.f32.mrf.mxu1 }
 0x1a4   : > { %14043 = vst [vmem:[#allocation65_spill] sm:$0xff] %v11733_v28  ;;  %v11736_v32 = vadd.f32 %v9426_v48, %v11568_v8 }
 0x1a5   : > { %v11738_v61 = vpop.f32.mrf.mxu0  ;;  %v11740_v23 = vpop.f32.mrf.mxu1 }
 0x1a6   : > { %14044 = vst [vmem:[#allocation66_spill] sm:$0xff] %v11736_v32  ;;  %14045 = vst [vmem:[#allocation67_spill] sm:$0xff] %v11738_v61  ;;  %v5118_v32 = vld [vmem:[%s13897_s3 + $0x60] sm:$0xff] }
 0x1a7   : > { %14046 = vst [vmem:[#allocation68_spill] sm:$0xff] %v11740_v23  ;;  %v9429_v29 = vpop.f32.mrf.mxu0  ;;  %v11742_v18 = vpop.f32.mrf.mxu1 }
 0x1a8   : > { %14047 = vst [vmem:[#allocation69_spill] sm:$0xff] %v11742_v18  ;;  %v11745_v58 = vadd.f32 %v9429_v29, %v11578_v57 }
 0x1a9   : > { %v11747_v56 = vpop.f32.mrf.mxu0  ;;  %v11749_v3 = vpop.f32.mrf.mxu1 }
 0x1aa   : > { %14048 = vst [vmem:[#allocation70_spill] sm:$0xff] %v11745_v58  ;;  %14049 = vst [vmem:[#allocation71_spill] sm:$0xff] %v11747_v56 }
 0x1ab   : > { %14050 = vst [vmem:[#allocation72_spill] sm:$0xff] %v11749_v3  ;;  %v9432_v28 = vpop.f32.mrf.mxu0  ;;  %v11751_v47 = vpop.f32.mrf.mxu1  ;;  %v4729_v3 = vld [vmem:[%s13897_s3 + $0x40] sm:$0xff] }
 0x1ac   : > { %14051 = vst [vmem:[#allocation73_spill] sm:$0xff] %v11751_v47  ;;  %v11754_v8 = vadd.f32 %v9432_v28, %v11589_v12  ;;  %9775 = vmatprep.subr.mxu1 %v4729_v3  ;;  %v5121_v12 = vld [vmem:[%s13897_s3 + $0x78] sm:$0xff] }
 0x1ad   : > { %v11756_v53 = vpop.f32.mrf.mxu0  ;;  %v11758_v48 = vpop.f32.mrf.mxu1  ;;  %9776 = vmatpush3.msra.mxu1 %v4729_v3  ;;  %9825 = vmatprep.subr.mxu0 %v5121_v12  ;;  %v5119_v3 = vld [vmem:[%s13897_s3 + $0x68] sm:$0xff] }
 0x1ae   : > { %14052 = vst [vmem:[#allocation74_spill] sm:$0xff] %v11754_v8  ;;  %14053 = vst [vmem:[#allocation75_spill] sm:$0xff] %v11756_v53  ;;  %v5120_v8 = vld [vmem:[%s13897_s3 + $0x70] sm:$0xff]  ;;  %9826 = vmatpush3.msra.mxu0 %v5121_v12  ;;  %v11798_v12 = vld [vmem:[%s13897_s3 + $0x98] sm:$0xff] }
 0x1af   : > { %14054 = vst [vmem:[#allocation76_spill] sm:$0xff] %v11758_v48  ;;  %v11760_v23 = vpop.f32.mrf.mxu0  ;;  %v11762_v18 = vpop.f32.mrf.mxu1  ;;  %9827 = vmatprep.subr.mxu0 %v5120_v8  ;;  %14055 = vst [vmem:[#allocation77_spill] sm:$0xff] %v11798_v12  ;;  %9881 = vmatprep.subr.mxu1 %v11798_v12 }
 0x1b0   : > { %9828 = vmatpush3.msra.mxu0 %v5120_v8 }
 0x1b1   : > { %v11764_v57 = vpop.f32.mrf.mxu0  ;;  %v11766_v29 = vpop.f32.mrf.mxu1  ;;  %9829 = vmatprep.subr.mxu0 %v5119_v3 }
 0x1b2   : > { %9830 = vmatpush3.msra.mxu0 %v5119_v3 }
 0x1b3   : > { %v11771_v47 = vpop.f32.mrf.mxu0  ;;  %v11778_v48 = vpop.f32.mrf.mxu1  ;;  %9831 = vmatprep.subr.mxu0 %v5118_v32 }
 0x1b4   : > { %9832 = vmatpush3.msra.mxu0 %v5118_v32 }
 0x1b5   : > { %v11776_v28 = vpop.f32.mrf.mxu0  ;;  %v11788_v58 = vpop.f32.mrf.mxu1 }
 0x1b7   : > { %v11783_v53 = vpop.f32.mrf.mxu0  ;;  %v11803_v61 = vpop.f32.mrf.mxu1 }
 0x1b9   : > { %v11790_v56 = vpop.f32.mrf.mxu0  ;;  %v11809_v42 = vpop.f32.mrf.mxu1 }
 0x1bb   : > { %v11800_v8 = vpop.f32.mrf.mxu0  ;;  %v11815_v60 = vpop.f32.mrf.mxu1 }
 0x1bc   : > { %14059 = vst [vmem:[#allocation81_spill] sm:$0xff] %v11815_v60 }
 0x1bd   : > { %v11805_v5 = vpop.f32.mrf.mxu0  ;;  %v11821_v12 = vpop.f32.mrf.mxu1 }
 0x1be   : > { %14062 = vst [vmem:[#allocation84_spill] sm:$0xff] %v11821_v12 }
 0x1bf   : > { %v11807_v3 = vpop.f32.mrf.mxu0  ;;  %v11827_v14 = vpop.f32.mrf.mxu1 }
 0x1c0   : > { %14056 = vst [vmem:[#allocation78_spill] sm:$0xff] %v11807_v3  ;;  %14065 = vst [vmem:[#allocation87_spill] sm:$0xff] %v11827_v14 }
 0x1c1   : > { %v11811_v54 = vpop.f32.mrf.mxu0 }
 0x1c2   : > { %14057 = vst [vmem:[#allocation79_spill] sm:$0xff] %v11811_v54  ;;  %v11833_v54 = vpop.f32.mrf.mxu1 }
 0x1c3   : > { %v11813_v59 = vpop.f32.mrf.mxu0  ;;  %14068 = vst [vmem:[#allocation90_spill] sm:$0xff] %v11833_v54 }
 0x1c4   : > { %14058 = vst [vmem:[#allocation80_spill] sm:$0xff] %v11813_v59 }
 0x1c5   : > { %v11817_v40 = vpop.f32.mrf.mxu0 }
 0x1c6   : > { %14060 = vst [vmem:[#allocation82_spill] sm:$0xff] %v11817_v40  ;;  %v11839_v40 = vpop.f32.mrf.mxu1 }
 0x1c7   : > { %v11819_v33 = vpop.f32.mrf.mxu0  ;;  %14071 = vst [vmem:[#allocation93_spill] sm:$0xff] %v11839_v40 }
 0x1c8   : > { %14061 = vst [vmem:[#allocation83_spill] sm:$0xff] %v11819_v33 }
 0x1c9   : > { %v11823_v32 = vpop.f32.mrf.mxu0 }
 0x1ca   : > { %14063 = vst [vmem:[#allocation85_spill] sm:$0xff] %v11823_v32  ;;  %v11845_v32 = vpop.f32.mrf.mxu1 }
 0x1cb   : > { %v11825_v43 = vpop.f32.mrf.mxu0 }
 0x1cc   : > { %14064 = vst [vmem:[#allocation86_spill] sm:$0xff] %v11825_v43 }
 0x1cd   : > { %v11829_v3 = vpop.f32.mrf.mxu0 }
 0x1ce   : > { %14066 = vst [vmem:[#allocation88_spill] sm:$0xff] %v11829_v3  ;;  %v11851_v3 = vpop.f32.mrf.mxu1 }
 0x1cf   : > { %v11831_v38 = vpop.f32.mrf.mxu0  ;;  %14076 = vst [vmem:[#allocation98_spill] sm:$0xff] %v11851_v3 }
 0x1d0   : > { %14067 = vst [vmem:[#allocation89_spill] sm:$0xff] %v11831_v38 }
 0x1d1   : > { %v11835_v59 = vpop.f32.mrf.mxu0 }
 0x1d2   : > { %14069 = vst [vmem:[#allocation91_spill] sm:$0xff] %v11835_v59  ;;  %v11857_v59 = vpop.f32.mrf.mxu1 }
 0x1d3   : > { %v11837_v60 = vpop.f32.mrf.mxu0 }
 0x1d4   : > { %14070 = vst [vmem:[#allocation92_spill] sm:$0xff] %v11837_v60 }
 0x1d5   : > { %v11841_v33 = vpop.f32.mrf.mxu0 }
 0x1d6   : > { %14072 = vst [vmem:[#allocation94_spill] sm:$0xff] %v11841_v33  ;;  %v11865_v33 = vpop.f32.mrf.mxu1 }
 0x1d7   : > { %v11843_v12 = vpop.f32.mrf.mxu0 }
 0x1d8   : > { %14073 = vst [vmem:[#allocation95_spill] sm:$0xff] %v11843_v12  ;;  %v1902_v12 = vadd.f32 %v11427_v31, %v11430_v34 }
 0x1d9   : > { %v11847_v43 = vpop.f32.mrf.mxu0 }
 0x1da   : > { %14074 = vst [vmem:[#allocation96_spill] sm:$0xff] %v11847_v43 }
 0x1db   : > { %v11849_v14 = vpop.f32.mrf.mxu0 }
 0x1dc   : > { %14075 = vst [vmem:[#allocation97_spill] sm:$0xff] %v11849_v14  ;;  %v2291_v14 = vadd.f32 %v11596_v62, %v1902_v12  ;;  %v1906_v62 = vadd.f32 %v11447_v1, %v11450_v19  ;;  %v1908_v1 = vadd.f32 %v11460_v11, %v11463_v50  ;;  %v2685_v19 = vadd.f32 %v11618_v41, %v11621_v21 }
 0x1dd   : > { %v11853_v38 = vpop.f32.mrf.mxu0 }
 0x1de   : > { %14077 = vst [vmem:[#allocation99_spill] sm:$0xff] %v11853_v38  ;;  %v2681_v38 = vadd.f32 %v11591_v4, %v11594_v6  ;;  %v2680_v31 = vadd.f32 %v11598_v7, %v2291_v14  ;;  %v2295_v4 = vadd.f32 %v11626_v52, %v1906_v62  ;;  %v3075_v11 = vadd.f32 %v11783_v53, %v2685_v19 }
 0x1df   : > { %v11855_v54 = vpop.f32.mrf.mxu0 }
 0x1e0   : > { %14078 = vst [vmem:[#allocation100_spill] sm:$0xff] %v11855_v54  ;;  %v1904_v54 = vadd.f32 %v11437_v37, %v11440_v45  ;;  %v2683_v37 = vadd.f32 %v11603_v39, %v11606_v17  ;;  %v3070_v45 = vadd.f32 %v11764_v57, %v2680_v31  ;;  %v11905_v17 = vld [vmem:[%s13896_s2] ss:$0 sm:$0xff]  ;;  %v1910_v57 = vadd.f32 %v11470_v55, %v11473_v46 }
 0x1e1   : > { %v11859_v60 = vpop.f32.mrf.mxu0  ;;  %v3464_v55 = vadd.f32 %v11803_v61, %v3075_v11  ;;  %v1912_v61 = vadd.f32 %v11480_v26, %v11483_v27  ;;  %v14084_v27 = vld [vmem:[#allocation35_spill] sm:$0xff]  ;;  %v14091_v11 = vld [vmem:[#allocation34_spill] sm:$0xff] }
 0x1e2   : > { %14079 = vst [vmem:[#allocation101_spill] sm:$0xff] %v11859_v60  ;;  %v11876_v60 = vpop.f32.mrf.mxu1  ;;  %v2293_v34 = vadd.f32 %v11611_v44, %v1904_v54  ;;  %v3073_v44 = vadd.f32 %v11771_v47, %v2683_v37  ;;  %v3459_v52 = vadd.f32 %v11766_v29, %v3070_v45  ;;  %v2297_v54 = vadd.f32 %v11639_v20, %v1908_v1 }
 0x1e3   : > { %v11861_v40 = vpop.f32.mrf.mxu0 }
 0x1e4   : > { %14080 = vst [vmem:[#allocation102_spill] sm:$0xff] %v11861_v40  ;;  %v11891_v6 = vpop.f32.mrf.mxu1  ;;  %v2682_v14 = vadd.f32 %v11613_v9, %v2293_v34  ;;  %v3462_v21 = vadd.f32 %v11778_v48, %v3073_v44  ;;  %v11929_v34 = vadd.f32 %v11369_v13, %v11367_v49 }
 0x1e5   : > { %v11867_v43 = vpop.f32.mrf.mxu0 }
 0x1e6   : > { %14081 = vst [vmem:[#allocation103_spill] sm:$0xff] %v11867_v43  ;;  %v3071_v43 = vadd.f32 %v11760_v23, %v2681_v38  ;;  %v3072_v9 = vadd.f32 %v11776_v28, %v2682_v14  ;;  %v11912_v50 = vpop.f32.mrf.mxu1  ;;  %v11918_v23 = vadd.f32 %v11359_v2, %v11357_v63  ;;  %v2686_v63 = vadd.f32 %v11641_v22, %v2297_v54 }
 0x1e7   : > { %v11870_v3 = vpop.f32.mrf.mxu0  ;;  %v2299_v2 = vadd.f32 %v11648_v15, %v1910_v57  ;;  %v11947_v15 = vadd.f32 %v11379_v25, %v11377_v24  ;;  %v11959_v24 = vadd.f32 %v11389_v0, %v11387_v51  ;;  %v14083_v25 = vld [vmem:[#allocation32_spill] sm:$0xff]  ;;  %v14088_v51 = vld [vmem:[#allocation25_spill] sm:$0xff] }
 0x1e8   : > { %v3460_v7 = vadd.f32 %v11762_v18, %v3071_v43  ;;  %v2684_v43 = vadd.f32 %v11628_v35, %v2295_v4  ;;  %v2687_v35 = vadd.f32 %v11631_v30, %v11636_v16  ;;  %v3461_v29 = vadd.f32 %v11788_v58, %v3072_v9  ;;  %v11934_v46 = vpop.f32.mrf.mxu1  ;;  %v11939_v16 = vld [vmem:[%s13897_s3 + $0xb8] sm:$0xff]  ;;  %v14087_v9 = vld [vmem:[#allocation24_spill] sm:$0xff] }
 0x1e9   : > { %v11878_v40 = vpop.f32.mrf.mxu0  ;;  %9937 = vmatprep.subr.mxu0 %v11939_v16  ;;  %v3076_v37 = vadd.f32 %v11805_v5, %v2686_v63  ;;  %v2688_v26 = vadd.f32 %v14083_v25, %v2299_v2  ;;  %v14086_v5 = vld [vmem:[#allocation81_spill] sm:$0xff]  ;;  %v11971_v0 = vadd.f32 %v14088_v51, %v14087_v9  ;;  %v14097_v2 = vld [vmem:[#allocation36_spill] sm:$0xff]  ;;  %v14108_v51 = vld [vmem:[#allocation82_spill] sm:$0xff] }
 0x1ea   : > { %14082 = vst [vmem:[#allocation104_spill] sm:$0xff] %v11878_v40  ;;  %v3074_v20 = vadd.f32 %v11790_v56, %v2684_v43  ;;  %v3077_v58 = vadd.f32 %v11800_v8, %v2687_v35  ;;  %v2689_v56 = vadd.f32 %v11643_v10, %v11646_v36  ;;  %v14085_v36 = vld [vmem:[#allocation78_spill] sm:$0xff]  ;;  %v14094_v35 = vld [vmem:[#allocation84_spill] sm:$0xff] }
 0x1eb   : > { %v11885_v12 = vpop.f32.mrf.mxu0  ;;  %v14090_v43 = vld [vmem:[#allocation10_spill] sm:$0xff] }
 0x1ec   : > { %v3463_v8 = vadd.f32 %v11809_v42, %v3074_v20  ;;  %v3079_v10 = vadd.f32 %v14085_v36, %v2689_v56  ;;  %v11964_v42 = vpop.f32.mrf.mxu1  ;;  %v3466_v1 = vadd.f32 %v14086_v5, %v3077_v58  ;;  %v3465_v20 = vadd.f32 %v14094_v35, %v3076_v37  ;;  %v14100_v56 = vld [vmem:[#allocation80_spill] sm:$0xff]  ;;  %v14105_v36 = vld [vmem:[#allocation38_spill] sm:$0xff]  ;;  %v14111_v35 = vld [vmem:[#allocation83_spill] sm:$0xff] }
 0x1ed   : > { %v11893_v40 = vpop.f32.mrf.mxu0  ;;  %v14107_v5 = vld [vmem:[#allocation90_spill] sm:$0xff] }
 0x1ef   : > { %v9611_v39 = vpop.f32.mrf.mxu0 }
 0x1f0   : > { %v3849_v38 = vadd.f32 %v9611_v39, %v3460_v7  ;;  %v2301_v7 = vadd.f32 %v14084_v27, %v1912_v61  ;;  %v14104_v27 = vld [vmem:[#allocation12_spill] sm:$0xff] }
 0x1f1   : > { %v3689_v41 = vpop.f32.mrf.mxu0 }
 0x1f2   : > { %v3888_v47 = vadd.f32 %v11905_v17, %v3849_v38  ;;  %v3848_v18 = vadd.f32 %v3689_v41, %v3459_v52  ;;  %v14089_v38 = vld [vmem:[#allocation11_spill] sm:$0xff]  ;;  %v14092_v41 = vld [vmem:[#allocation33_spill] sm:$0xff] }
 0x1f3   : > { %v9614_v53 = vpop.f32.mrf.mxu0  ;;  %v1914_v54 = vadd.f32 %v14090_v43, %v14089_v38 }
 0x1f4   : > { %v3920_v28 = vmax.f32 %v3888_v47, 0.0  ;;  %v3887_v48 = vadd.f32 %v11905_v17, %v3848_v18  ;;  %v3851_v31 = vadd.f32 %v9614_v53, %v3462_v21  ;;  %v2691_v21 = vadd.f32 %v14092_v41, %v14091_v11  ;;  %v14093_v47 = vld [vmem:[#allocation79_spill] sm:$0xff] }
 0x1f5   : > { %v3699_v30 = vpop.f32.mrf.mxu0  ;;  %v3078_v18 = vadd.f32 %v14093_v47, %v2688_v26  ;;  %v14103_v26 = vld [vmem:[#allocation13_spill] sm:$0xff] }
 0x1f6   : > { %3952 = vst.msk [vmem:[#allocation2 + $0x21] sm:$0xff] %vm331_vm0, %v3920_v28  ;;  %v3919_v49 = vmax.f32 %v3887_v48, 0.0  ;;  %v3890_v13 = vadd.f32 %v11905_v17, %v3851_v31  ;;  %v3850_v22 = vadd.f32 %v3699_v30, %v3461_v29  ;;  %v14095_v48 = vld [vmem:[#allocation6_spill] sm:$0xff]  ;;  %v14096_v31 = vld [vmem:[#allocation7_spill] sm:$0xff] }
 0x1f7   : > { %v9617_v62 = vpop.f32.mrf.mxu0  ;;  %v11983_v63 = vadd.f32 %v14096_v31, %v14095_v48  ;;  %v14098_v30 = vld [vmem:[#allocation39_spill] sm:$0xff] }
 0x1f8   : > { %3951 = vst.msk [vmem:[#allocation2 + $0x19] sm:$0xff] %vm331_vm0, %v3919_v49  ;;  %v3922_v45 = vmax.f32 %v3890_v13, 0.0  ;;  %v3889_v4 = vadd.f32 %v11905_v17, %v3850_v22  ;;  %v3853_v14 = vadd.f32 %v9617_v62, %v3464_v55  ;;  %v2690_v55 = vadd.f32 %v14097_v2, %v2301_v7  ;;  %v14099_v49 = vld [vmem:[#allocation87_spill] sm:$0xff]  ;;  %v11988_v22 = vpop.f32.mrf.mxu1 }
 0x1f9   : > { %v3709_v44 = vpop.f32.mrf.mxu0  ;;  %v2303_v58 = vadd.f32 %v14098_v30, %v1914_v54  ;;  %v3468_v13 = vadd.f32 %v14099_v49, %v3079_v10  ;;  %v1916_v7 = vadd.f32 %v14104_v27, %v14103_v26  ;;  %v14106_v10 = vld [vmem:[#allocation37_spill] sm:$0xff]  ;;  %v14113_v30 = vld [vmem:[#allocation15_spill] sm:$0xff] }
 0x1fa   : > { %3954 = vst.msk [vmem:[#allocation2 + $0x39] sm:$0xff] %vm331_vm0, %v3922_v45  ;;  %v3921_v19 = vmax.f32 %v3889_v4, 0.0  ;;  %v3892_v39 = vadd.f32 %v11905_v17, %v3853_v14  ;;  %v3852_v52 = vadd.f32 %v3709_v44, %v3463_v8  ;;  %v3081_v8 = vadd.f32 %v14100_v56, %v2691_v21  ;;  %v14101_v4 = vld [vmem:[#allocation8_spill] sm:$0xff]  ;;  %v14102_v14 = vld [vmem:[#allocation9_spill] sm:$0xff]  ;;  %v14116_v56 = vld [vmem:[#allocation42_spill] sm:$0xff] }
 0x1fb   : > { %v9620_v57 = vpop.f32.mrf.mxu0  ;;  %v11995_v25 = vadd.f32 %v14102_v14, %v14101_v4  ;;  %v2693_v44 = vadd.f32 %v14106_v10, %v14105_v36  ;;  %v3080_v38 = vadd.f32 %v14108_v51, %v2690_v55  ;;  %v14109_v21 = vld [vmem:[#allocation40_spill] sm:$0xff] }
 0x1fc   : > { %3953 = vst.msk [vmem:[#allocation2 + $0x31] sm:$0xff] %vm331_vm0, %v3921_v19  ;;  %v3924_v53 = vmax.f32 %v3892_v39, 0.0  ;;  %v3891_v29 = vadd.f32 %v11905_v17, %v3852_v52  ;;  %v3855_v28 = vadd.f32 %v9620_v57, %v3466_v1  ;;  %v3467_v1 = vadd.f32 %v14107_v5, %v3078_v18  ;;  %v14110_v18 = vld [vmem:[#allocation43_spill] sm:$0xff]  ;;  %v14119_v5 = vld [vmem:[#allocation44_spill] sm:$0xff] }
 0x1fd   : > { %v3719_v61 = vpop.f32.mrf.mxu0  ;;  %v12015_v41 = vld [vmem:[#allocation2 + $0x21] sm:$0xff]  ;;  %v2692_v47 = vadd.f32 %v14109_v21, %v2303_v58  ;;  %v2305_v57 = vadd.f32 %v14110_v18, %v1916_v7  ;;  %v14114_v58 = vld [vmem:[#allocation14_spill] sm:$0xff]  ;;  %v3469_v7 = vadd.f32 %v11845_v32, %v3080_v38 }
 0x1fe   : > { %3956 = vst.msk [vmem:[#allocation2 + $0x51] sm:$0xff] %vm331_vm0, %v3924_v53  ;;  %v3923_v62 = vmax.f32 %v3891_v29, 0.0  ;;  %v3894_v37 = vadd.f32 %v11905_v17, %v3855_v28  ;;  %v3854_v45 = vadd.f32 %v3719_v61, %v3465_v20  ;;  %v3083_v20 = vadd.f32 %v14111_v35, %v2693_v44  ;;  %v12020_v53 = vpop.f32.mrf.mxu1  ;;  %v14112_v28 = vld [vmem:[#allocation93_spill] sm:$0xff] }
 0x1ff   : > { %v9623_v19 = vpop.f32.mrf.mxu0  ;;  %v12002_v39 = vld [vmem:[#allocation2 + $0x19] sm:$0xff]  ;;  %v3470_v48 = vadd.f32 %v14112_v28, %v3081_v8  ;;  %v1918_v49 = vadd.f32 %v14114_v58, %v14113_v30  ;;  %v14123_v35 = vld [vmem:[#allocation17_spill] sm:$0xff] }
 0x200   : > { %v12004_v52 = vld [vmem:[#allocation2 + $0x18] sm:$0xff]  ;;  %v12006_v9 = vld [vmem:[#allocation2 + $0x20] sm:$0xff]  ;;  %3955 = vst.msk [vmem:[#allocation2 + $0x49] sm:$0xff] %vm331_vm0, %v3923_v62  ;;  %v3926_v43 = vmax.f32 %v3894_v37, 0.0  ;;  %v3893_v54 = vadd.f32 %v11905_v17, %v3854_v45  ;;  %v3857_v11 = vadd.f32 %v9623_v19, %v3468_v13  ;;  %9668 = vmatprep.mubr.msk.f32.mxu1 %vm331_vm0, %v12002_v39  ;;  %v14117_v62 = vld [vmem:[#allocation41_spill] sm:$0xff]  ;;  %v12054_v38 = vpop.f32.mrf.mxu1 }
 0x201   : > { %9724 = vmatprep.mubr.msk.f32.mxu0 %vm331_vm0, %v12004_v52  ;;  %v3729_v29 = vpop.f32.mrf.mxu0  ;;  %9669 = vmatmul.mubr.msk.f32.gmra.mxu1 %vm331_vm0, %v12015_v41  ;;  %v14115_v13 = vld [vmem:[#allocation16_spill] sm:$0xff]  ;;  %v2695_v37 = vadd.f32 %v14117_v62, %v14116_v56  ;;  %v14118_v45 = vld [vmem:[#allocation85_spill] sm:$0xff]  ;;  %v14120_v19 = vld [vmem:[#allocation47_spill] sm:$0xff] }
 0x202   : > { %9725 = vmatmul.mubr.msk.f32.gmra.mxu0 %vm331_vm0, %v12006_v9  ;;  %3958 = vst.msk [vmem:[#allocation2 + $0x69] sm:$0xff] %vm331_vm0, %v3926_v43  ;;  %v3925_v31 = vmax.f32 %v3893_v54, 0.0  ;;  %v3896_v2 = vadd.f32 %v11905_v17, %v3857_v11  ;;  %v3856_v55 = vadd.f32 %v3729_v29, %v3467_v1  ;;  %v1531_v61 = vadd.f32 %v14115_v13, %v11918_v23  ;;  %v12049_v44 = vld [vmem:[#allocation2 + $0x39] sm:$0xff]  ;;  %v14121_v43 = vld [vmem:[#allocation98_spill] sm:$0xff] }
 0x203   : > { %v3082_v4 = vadd.f32 %v14118_v45, %v2692_v47  ;;  %v9626_v14 = vpop.f32.mrf.mxu0  ;;  %v12036_v26 = vld [vmem:[#allocation2 + $0x31] sm:$0xff]  ;;  %v2694_v1 = vadd.f32 %v14119_v5, %v2305_v57  ;;  %v2307_v51 = vadd.f32 %v14120_v19, %v1918_v49  ;;  %v3472_v32 = vadd.f32 %v14121_v43, %v3083_v20  ;;  %v14127_v56 = vld [vmem:[#allocation88_spill] sm:$0xff] }
 0x204   : > { %v12038_v8 = vld [vmem:[#allocation2 + $0x30] sm:$0xff]  ;;  %v12040_v27 = vld [vmem:[#allocation2 + $0x38] sm:$0xff]  ;;  %3957 = vst.msk [vmem:[#allocation2 + $0x61] sm:$0xff] %vm331_vm0, %v3925_v31  ;;  %v3928_v36 = vmax.f32 %v3896_v2, 0.0  ;;  %v3895_v10 = vadd.f32 %v11905_v17, %v3856_v55  ;;  %v3859_v23 = vadd.f32 %v9626_v14, %v3470_v48  ;;  %9671 = vmatprep.mubr.msk.f32.mxu1 %vm331_vm0, %v12036_v26  ;;  %v1920_v29 = vadd.f32 %v14123_v35, %v1531_v61  ;;  %v14126_v31 = vld [vmem:[#allocation45_spill] sm:$0xff] }
 0x205   : > { %9727 = vmatprep.mubr.msk.f32.mxu0 %vm331_vm0, %v12038_v8  ;;  %v3739_v54 = vpop.f32.mrf.mxu0  ;;  %9672 = vmatmul.mubr.msk.f32.gmra.mxu1 %vm331_vm0, %v12049_v44  ;;  %v14122_v11 = vld [vmem:[#allocation86_spill] sm:$0xff]  ;;  %v3471_v55 = vadd.f32 %v11857_v59, %v3082_v4  ;;  %v3084_v62 = vadd.f32 %v14127_v56, %v2694_v1  ;;  %v14128_v45 = vld [vmem:[#allocation48_spill] sm:$0xff]  ;;  %v14129_v14 = vld [vmem:[#allocation51_spill] sm:$0xff] }
 0x206   : > { %9728 = vmatmul.mubr.msk.f32.gmra.mxu0 %vm331_vm0, %v12040_v27  ;;  %v3085_v21 = vadd.f32 %v14122_v11, %v2695_v37  ;;  %3960 = vst.msk [vmem:[#allocation2 + $0x81] sm:$0xff] %vm331_vm0, %v3928_v36  ;;  %v3927_v47 = vmax.f32 %v3895_v10, 0.0  ;;  %v3898_v18 = vadd.f32 %v11905_v17, %v3859_v23  ;;  %v3858_v57 = vadd.f32 %v3739_v54, %v3469_v7  ;;  %v14124_v20 = vld [vmem:[#allocation18_spill] sm:$0xff]  ;;  %v14130_v36 = vld [vmem:[#allocation89_spill] sm:$0xff]  ;;  %v12087_v23 = vpop.f32.mrf.mxu1  ;;  %v14132_v11 = vld [vmem:[#allocation20_spill] sm:$0xff] }
 0x207   : > { %v1533_v28 = vadd.f32 %v14124_v20, %v11929_v34  ;;  %v14125_v48 = vld [vmem:[#allocation46_spill] sm:$0xff]  ;;  %v9629_v30 = vpop.f32.mrf.mxu0  ;;  %v12071_v49 = vld [vmem:[#allocation2 + $0x48] sm:$0xff]  ;;  %v2696_v4 = vadd.f32 %v14128_v45, %v2307_v51  ;;  %v2309_v7 = vadd.f32 %v14129_v14, %v1920_v29  ;;  %v14135_v29 = vld [vmem:[#allocation91_spill] sm:$0xff] }
 0x208   : > { %v2697_v2 = vadd.f32 %v14126_v31, %v14125_v48  ;;  %v12069_v58 = vld [vmem:[#allocation2 + $0x49] sm:$0xff]  ;;  %3959 = vst.msk [vmem:[#allocation2 + $0x79] sm:$0xff] %vm331_vm0, %v3927_v47  ;;  %v3930_v61 = vmax.f32 %v3898_v18, 0.0  ;;  %v3897_v37 = vadd.f32 %v11905_v17, %v3858_v57  ;;  %v3861_v34 = vadd.f32 %v9629_v30, %v3472_v32  ;;  %9730 = vmatprep.mubr.msk.f32.mxu0 %vm331_vm0, %v12071_v49  ;;  %v12082_v59 = vld [vmem:[#allocation2 + $0x51] sm:$0xff]  ;;  %v14136_v56 = vld [vmem:[#allocation52_spill] sm:$0xff] }
 0x209   : > { %v12073_v13 = vld [vmem:[#allocation2 + $0x50] sm:$0xff]  ;;  %9674 = vmatprep.mubr.msk.f32.mxu1 %vm331_vm0, %v12069_v58  ;;  %v3749_v5 = vpop.f32.mrf.mxu0  ;;  %v3474_v1 = vadd.f32 %v11865_v33, %v3085_v21  ;;  %v14131_v32 = vld [vmem:[#allocation19_spill] sm:$0xff]  ;;  %v1535_v47 = vadd.f32 %v14132_v11, %v11947_v15  ;;  %v14134_v57 = vld [vmem:[#allocation49_spill] sm:$0xff]  ;;  %v3086_v20 = vadd.f32 %v14135_v29, %v2696_v4 }
 0x20a   : > { %v3087_v10 = vadd.f32 %v14130_v36, %v2697_v2  ;;  %9675 = vmatmul.mubr.msk.f32.gmra.mxu1 %vm331_vm0, %v12082_v59  ;;  %9731 = vmatmul.mubr.msk.f32.gmra.mxu0 %vm331_vm0, %v12073_v13  ;;  %3962 = vst.msk [vmem:[#allocation2 + $0x99] sm:$0xff] %vm331_vm0, %v3930_v61  ;;  %v3929_v19 = vmax.f32 %v3897_v37, 0.0  ;;  %v3900_v51 = vadd.f32 %v11905_v17, %v3861_v34  ;;  %v14133_v18 = vld [vmem:[#allocation50_spill] sm:$0xff]  ;;  %v14137_v37 = vld [vmem:[#allocation55_spill] sm:$0xff]  ;;  %v14138_v4 = vld [vmem:[#allocation92_spill] sm:$0xff] }
 0x20b   : > { %v3860_v43 = vadd.f32 %v3749_v5, %v3471_v55  ;;  %v1922_v54 = vadd.f32 %v14131_v32, %v1533_v28  ;;  %v2699_v35 = vadd.f32 %v14134_v57, %v14133_v18  ;;  %v9632_v48 = vpop.f32.mrf.mxu0  ;;  %v12102_v31 = vld [vmem:[#allocation2 + $0x61] sm:$0xff]  ;;  %v3473_v2 = vadd.f32 %v11876_v60, %v3084_v62  ;;  %v12115_v30 = vld [vmem:[#allocation2 + $0x69] sm:$0xff]  ;;  %v12120_v62 = vpop.f32.mrf.mxu1 }
 0x20c   : > { %v12104_v33 = vld [vmem:[#allocation2 + $0x60] sm:$0xff]  ;;  %v12106_v21 = vld [vmem:[#allocation2 + $0x68] sm:$0xff]  ;;  %3961 = vst.msk [vmem:[#allocation2 + $0x91] sm:$0xff] %vm331_vm0, %v3929_v19  ;;  %v3932_v28 = vmax.f32 %v3900_v51, 0.0  ;;  %v3863_v15 = vadd.f32 %v9632_v48, %v3474_v1  ;;  %9677 = vmatprep.mubr.msk.f32.mxu1 %vm331_vm0, %v12102_v31  ;;  %v2698_v61 = vadd.f32 %v14136_v56, %v2309_v7  ;;  %v3476_v60 = vadd.f32 %v11891_v6, %v3087_v10  ;;  %v14140_v6 = vld [vmem:[#allocation22_spill] sm:$0xff] }
 0x20d   : > { %v3899_v55 = vadd.f32 %v11905_v17, %v3860_v43  ;;  %9733 = vmatprep.mubr.msk.f32.mxu0 %vm331_vm0, %v12104_v33  ;;  %v2311_v34 = vadd.f32 %v14137_v37, %v1922_v54  ;;  %v3759_v45 = vpop.f32.mrf.mxu0  ;;  %v3089_v14 = vadd.f32 %v14138_v4, %v2699_v35  ;;  %v14139_v1 = vld [vmem:[#allocation21_spill] sm:$0xff]  ;;  %v1537_v10 = vadd.f32 %v14140_v6, %v11959_v24  ;;  %v14141_v51 = vld [vmem:[#allocation54_spill] sm:$0xff]  ;;  %v14146_v56 = vld [vmem:[#allocation95_spill] sm:$0xff]  ;;  %v12153_v37 = vpop.f32.mrf.mxu1 }
 0x20e   : > { %9678 = vmatmul.mubr.msk.f32.gmra.mxu1 %vm331_vm0, %v12115_v30  ;;  %9734 = vmatmul.mubr.msk.f32.gmra.mxu0 %vm331_vm0, %v12106_v21  ;;  %3964 = vst.msk [vmem:[#allocation2 + $0xb1] sm:$0xff] %vm331_vm0, %v3932_v28  ;;  %v3902_v7 = vadd.f32 %v11905_v17, %v3863_v15  ;;  %v3862_v5 = vadd.f32 %v3759_v45, %v3473_v2  ;;  %v14142_v43 = vld [vmem:[#allocation53_spill] sm:$0xff]  ;;  %v14143_v29 = vld [vmem:[#allocation94_spill] sm:$0xff] }
 0x20f   : > { %v3931_v36 = vmax.f32 %v3899_v55, 0.0  ;;  %v1924_v19 = vadd.f32 %v14139_v1, %v1535_v47  ;;  %v2701_v32 = vadd.f32 %v14142_v43, %v14141_v51  ;;  %v3475_v54 = vadd.f32 %v11912_v50, %v3086_v20  ;;  %v9635_v11 = vpop.f32.mrf.mxu0  ;;  %v12135_v18 = vld [vmem:[#allocation2 + $0x79] sm:$0xff]  ;;  %v12148_v50 = vld [vmem:[#allocation2 + $0x81] sm:$0xff]  ;;  %v14148_v1 = vld [vmem:[#allocation26_spill] sm:$0xff] }
 0x210   : > { %v12137_v57 = vld [vmem:[#allocation2 + $0x78] sm:$0xff]  ;;  %v12139_v35 = vld [vmem:[#allocation2 + $0x80] sm:$0xff]  ;;  %v3088_v48 = vadd.f32 %v14143_v29, %v2698_v61  ;;  %v3934_v47 = vmax.f32 %v3902_v7, 0.0  ;;  %v3901_v2 = vadd.f32 %v11905_v17, %v3862_v5  ;;  %v3865_v24 = vadd.f32 %v9635_v11, %v3476_v60  ;;  %9680 = vmatprep.mubr.msk.f32.mxu1 %vm331_vm0, %v12135_v18  ;;  %v14149_v6 = vld [vmem:[#allocation58_spill] sm:$0xff] }
 0x211   : > { %3963 = vst.msk [vmem:[#allocation2 + $0xa9] sm:$0xff] %vm331_vm0, %v3931_v36  ;;  %9736 = vmatprep.mubr.msk.f32.mxu0 %vm331_vm0, %v12137_v57  ;;  %v14144_v20 = vld [vmem:[#allocation56_spill] sm:$0xff]  ;;  %v14145_v55 = vld [vmem:[#allocation59_spill] sm:$0xff]  ;;  %v3091_v61 = vadd.f32 %v14146_v56, %v2701_v32  ;;  %v3769_v45 = vpop.f32.mrf.mxu0  ;;  %v3478_v60 = vadd.f32 %v11934_v46, %v3089_v14  ;;  %v14150_v51 = vld [vmem:[#allocation57_spill] sm:$0xff] }
 0x212   : > { %v2700_v28 = vadd.f32 %v14144_v20, %v2311_v34  ;;  %v2313_v15 = vadd.f32 %v14145_v55, %v1924_v19  ;;  %9681 = vmatmul.mubr.msk.f32.gmra.mxu1 %vm331_vm0, %v12148_v50  ;;  %9737 = vmatmul.mubr.msk.f32.gmra.mxu0 %vm331_vm0, %v12139_v35  ;;  %3966 = vst.msk [vmem:[#allocation2 + $0xc9] sm:$0xff] %vm331_vm0, %v3934_v47  ;;  %v3933_v4 = vmax.f32 %v3901_v2, 0.0  ;;  %v14147_v7 = vld [vmem:[#allocation23_spill] sm:$0xff]  ;;  %v14151_v32 = vld [vmem:[#allocation96_spill] sm:$0xff] }
 0x213   : > { %v3904_v34 = vadd.f32 %v11905_v17, %v3865_v24  ;;  %v3864_v36 = vadd.f32 %v3769_v45, %v3475_v54  ;;  %v1926_v5 = vadd.f32 %v14147_v7, %v1537_v10  ;;  %v1539_v19 = vadd.f32 %v14148_v1, %v11971_v0  ;;  %v9638_v29 = vpop.f32.mrf.mxu0  ;;  %v12168_v20 = vld [vmem:[#allocation2 + $0x91] sm:$0xff]  ;;  %v12181_v2 = vld [vmem:[#allocation2 + $0x99] sm:$0xff] }
 0x214   : > { %v2703_v43 = vadd.f32 %v14150_v51, %v14149_v6  ;;  %v3090_v11 = vadd.f32 %v14151_v32, %v2700_v28  ;;  %v12170_v46 = vld [vmem:[#allocation2 + $0x90] sm:$0xff]  ;;  %v12172_v14 = vld [vmem:[#allocation2 + $0x98] sm:$0xff]  ;;  %v3477_v47 = vadd.f32 %v11964_v42, %v3088_v48  ;;  %3965 = vst.msk [vmem:[#allocation2 + $0xc1] sm:$0xff] %vm331_vm0, %v3933_v4  ;;  %v3867_v0 = vadd.f32 %v9638_v29, %v3478_v60  ;;  %v14152_v24 = vld [vmem:[#allocation60_spill] sm:$0xff]  ;;  %v12186_v48 = vpop.f32.mrf.mxu1 }
 0x215   : > { %v3936_v10 = vmax.f32 %v3904_v34, 0.0  ;;  %v3903_v54 = vadd.f32 %v11905_v17, %v3864_v36  ;;  %9683 = vmatprep.mubr.msk.f32.mxu1 %vm331_vm0, %v12168_v20  ;;  %9739 = vmatprep.mubr.msk.f32.mxu0 %vm331_vm0, %v12170_v46  ;;  %v2702_v28 = vadd.f32 %v14152_v24, %v2313_v15  ;;  %v14153_v55 = vld [vmem:[#allocation63_spill] sm:$0xff]  ;;  %v3480_v42 = vadd.f32 %v11988_v22, %v3091_v61  ;;  %v3779_v45 = vpop.f32.mrf.mxu0  ;;  %v14154_v60 = vld [vmem:[#allocation97_spill] sm:$0xff]  ;;  %v14156_v22 = vld [vmem:[#allocation28_spill] sm:$0xff] }
 0x216   : > { %v2315_v56 = vadd.f32 %v14153_v55, %v1926_v5  ;;  %9684 = vmatmul.mubr.msk.f32.gmra.mxu1 %vm331_vm0, %v12181_v2  ;;  %9740 = vmatmul.mubr.msk.f32.gmra.mxu0 %vm331_vm0, %v12172_v14  ;;  %v3093_v4 = vadd.f32 %v14154_v60, %v2703_v43  ;;  %v3906_v15 = vadd.f32 %v11905_v17, %v3867_v0  ;;  %v14155_v7 = vld [vmem:[#allocation27_spill] sm:$0xff]  ;;  %v14157_v1 = vld [vmem:[#allocation62_spill] sm:$0xff]  ;;  %v14158_v6 = vld [vmem:[#allocation61_spill] sm:$0xff] }
 0x217   : > { %3968 = vst.msk [vmem:[#allocation2 + $0xe1] sm:$0xff] %vm331_vm0, %v3936_v10  ;;  %v3935_v34 = vmax.f32 %v3903_v54, 0.0  ;;  %v3866_v36 = vadd.f32 %v3779_v45, %v3477_v47  ;;  %v1928_v5 = vadd.f32 %v14155_v7, %v1539_v19  ;;  %v1541_v61 = vadd.f32 %v14156_v22, %v11983_v63  ;;  %v9641_v29 = vpop.f32.mrf.mxu0  ;;  %v14160_v54 = vld [vmem:[#allocation99_spill] sm:$0xff]  ;;  %v14164_v7 = vld [vmem:[#allocation100_spill] sm:$0xff]  ;;  %v12219_v22 = vpop.f32.mrf.mxu1 }
 0x218   : > { %v2705_v51 = vadd.f32 %v14158_v6, %v14157_v1  ;;  %v3479_v32 = vadd.f32 %v12020_v53, %v3090_v11  ;;  %v12201_v24 = vld [vmem:[#allocation2 + $0xa9] sm:$0xff]  ;;  %v3092_v0 = vadd.f32 %v14160_v54, %v2702_v28  ;;  %v3938_v19 = vmax.f32 %v3906_v15, 0.0  ;;  %v12214_v53 = vld [vmem:[#allocation2 + $0xb1] sm:$0xff]  ;;  %v14162_v11 = vld [vmem:[#allocation64_spill] sm:$0xff] }
 0x219   : > { %14159 = vst [vmem:[#allocation32_spill] sm:$0xff] %v12201_v24  ;;  %v12203_v43 = vld [vmem:[#allocation2 + $0xa8] sm:$0xff]  ;;  %v12205_v10 = vld [vmem:[#allocation2 + $0xb0] sm:$0xff]  ;;  %3967 = vst.msk [vmem:[#allocation2 + $0xd9] sm:$0xff] %vm331_vm0, %v3935_v34  ;;  %v3905_v47 = vadd.f32 %v11905_v17, %v3866_v36  ;;  %v3869_v63 = vadd.f32 %v9641_v29, %v3480_v42  ;;  %9686 = vmatprep.mubr.msk.f32.mxu1 %vm331_vm0, %v12201_v24  ;;  %v2704_v55 = vadd.f32 %v14162_v11, %v2315_v56  ;;  %v3789_v34 = vpop.f32.mrf.mxu0 }
 0x21a   : > { %9742 = vmatprep.mubr.msk.f32.mxu0 %vm331_vm0, %v12203_v43  ;;  %14161 = vst [vmem:[#allocation35_spill] sm:$0xff] %v12214_v53  ;;  %v14163_v45 = vld [vmem:[#allocation67_spill] sm:$0xff]  ;;  %v3095_v28 = vadd.f32 %v14164_v7, %v2705_v51  ;;  %9687 = vmatmul.mubr.msk.f32.gmra.mxu1 %vm331_vm0, %v12214_v53  ;;  %v3482_v42 = vadd.f32 %v12054_v38, %v3093_v4  ;;  %3970 = vst.msk [vmem:[#allocation2 + $0xf9] sm:$0xff] %vm331_vm0, %v3938_v19  ;;  %v14166_v6 = vld [vmem:[#allocation30_spill] sm:$0xff] }
 0x21b   : > { %v2317_v60 = vadd.f32 %v14163_v45, %v1928_v5  ;;  %9743 = vmatmul.mubr.msk.f32.gmra.mxu0 %vm331_vm0, %v12205_v10  ;;  %v3937_v15 = vmax.f32 %v3905_v47, 0.0  ;;  %v3908_v56 = vadd.f32 %v11905_v17, %v3869_v63  ;;  %v3868_v36 = vadd.f32 %v3789_v34, %v3479_v32  ;;  %v14165_v5 = vld [vmem:[#allocation29_spill] sm:$0xff]  ;;  %v14167_v29 = vld [vmem:[#allocation66_spill] sm:$0xff]  ;;  %v9644_v53 = vpop.f32.mrf.mxu0  ;;  %v12236_v38 = vld [vmem:[#allocation2 + $0xc0] sm:$0xff] }
 0x21c   : > { %v1930_v1 = vadd.f32 %v14165_v5, %v1541_v61  ;;  %v1543_v51 = vadd.f32 %v14166_v6, %v11995_v25  ;;  %v14168_v54 = vld [vmem:[#allocation65_spill] sm:$0xff]  ;;  %v3481_v19 = vadd.f32 %v12087_v23, %v3092_v0  ;;  %v3871_v25 = vadd.f32 %v9644_v53, %v3482_v42  ;;  %9745 = vmatprep.mubr.msk.f32.mxu0 %vm331_vm0, %v12236_v38  ;;  %v14171_v63 = vld [vmem:[#allocation68_spill] sm:$0xff]  ;;  %v14172_v34 = vld [vmem:[#allocation71_spill] sm:$0xff]  ;;  %v9597_v0 = vpop.f32.mrf.mxu1 }
 0x21d   : > { %v2707_v11 = vadd.f32 %v14168_v54, %v14167_v29  ;;  %v14169_v45 = vld [vmem:[#allocation101_spill] sm:$0xff]  ;;  %3969 = vst.msk [vmem:[#allocation2 + $0xf1] sm:$0xff] %vm331_vm0, %v3937_v15  ;;  %v3940_v61 = vmax.f32 %v3908_v56, 0.0  ;;  %v3907_v32 = vadd.f32 %v11905_v17, %v3868_v36  ;;  %v3484_v23 = vadd.f32 %v12120_v62, %v3095_v28  ;;  %v3799_v15 = vpop.f32.mrf.mxu0  ;;  %v14173_v53 = vld [vmem:[#allocation102_spill] sm:$0xff]  ;;  %v14174_v6 = vld [vmem:[#allocation31_spill] sm:$0xff] }
 0x21e   : > { %v3094_v7 = vadd.f32 %v14169_v45, %v2704_v55  ;;  %v12234_v24 = vld [vmem:[#allocation2 + $0xc1] sm:$0xff]  ;;  %v12247_v47 = vld [vmem:[#allocation2 + $0xc9] sm:$0xff]  ;;  %v2706_v55 = vadd.f32 %v14171_v63, %v2317_v60  ;;  %v2319_v5 = vadd.f32 %v14172_v34, %v1930_v1  ;;  %v3910_v36 = vadd.f32 %v11905_v17, %v3871_v25 }
 0x21f   : > { %v12238_v4 = vld [vmem:[#allocation2 + $0xc8] sm:$0xff]  ;;  %9689 = vmatprep.mubr.msk.f32.mxu1 %vm331_vm0, %v12234_v24  ;;  %14170 = vst [vmem:[#allocation78_spill] sm:$0xff] %v12247_v47  ;;  %v3097_v42 = vadd.f32 %v14173_v53, %v2707_v11  ;;  %3972 = vst.msk [vmem:[#allocation2 + $0x111] sm:$0xff] %vm331_vm0, %v3940_v61  ;;  %v3939_v56 = vmax.f32 %v3907_v32, 0.0  ;;  %v3870_v60 = vadd.f32 %v3799_v15, %v3481_v19  ;;  %v14175_v29 = vld [vmem:[#allocation70_spill] sm:$0xff]  ;;  %v9647_v45 = vpop.f32.mrf.mxu0 }
 0x220   : > { %9690 = vmatmul.mubr.msk.f32.gmra.mxu1 %vm331_vm0, %v12247_v47  ;;  %9746 = vmatmul.mubr.msk.f32.gmra.mxu0 %vm331_vm0, %v12238_v4  ;;  %v1932_v1 = vadd.f32 %v14174_v6, %v1543_v51  ;;  %v14176_v62 = vld [vmem:[#allocation69_spill] sm:$0xff]  ;;  %v3483_v54 = vadd.f32 %v12153_v37, %v3094_v7  ;;  %v12263_v63 = vld [vmem:[#allocation2 + $0xd9] sm:$0xff]  ;;  %v3942_v32 = vmax.f32 %v3910_v36, 0.0  ;;  %v3873_v51 = vadd.f32 %v9647_v45, %v3484_v23  ;;  %v3440_v6 = vpop.f32.mrf.mxu1 }
 0x221   : > { %v2709_v28 = vadd.f32 %v14176_v62, %v14175_v29  ;;  %v12265_v34 = vld [vmem:[#allocation2 + $0xd8] sm:$0xff]  ;;  %v12267_v47 = vld [vmem:[#allocation2 + $0xe0] sm:$0xff]  ;;  %3971 = vst.msk [vmem:[#allocation2 + $0x109] sm:$0xff] %vm331_vm0, %v3939_v56  ;;  %v3909_v19 = vadd.f32 %v11905_v17, %v3870_v60  ;;  %9692 = vmatprep.mubr.msk.f32.mxu1 %vm331_vm0, %v12263_v63  ;;  %v3809_v56 = vpop.f32.mrf.mxu0  ;;  %v3486_v23 = vadd.f32 %v12186_v48, %v3097_v42  ;;  %v14180_v29 = vld [vmem:[#allocation74_spill] sm:$0xff] }
 0x222   : > { %v14177_v11 = vld [vmem:[#allocation103_spill] sm:$0xff]  ;;  %9748 = vmatprep.mubr.msk.f32.mxu0 %vm331_vm0, %v12265_v34  ;;  %v12276_v37 = vld [vmem:[#allocation2 + $0xe1] sm:$0xff]  ;;  %3974 = vst.msk [vmem:[#allocation2 + $0x129] sm:$0xff] %vm331_vm0, %v3942_v32  ;;  %v3912_v60 = vadd.f32 %v11905_v17, %v3873_v51 }
 0x223   : > { %v3096_v61 = vadd.f32 %v14177_v11, %v2706_v55  ;;  %v14178_v7 = vld [vmem:[#allocation72_spill] sm:$0xff]  ;;  %v14179_v15 = vld [vmem:[#allocation75_spill] sm:$0xff]  ;;  %v3099_v55 = vadd.f32 %v11870_v3, %v2709_v28  ;;  %v3941_v36 = vmax.f32 %v3909_v19, 0.0  ;;  %v9650_v45 = vpop.f32.mrf.mxu0 }
 0x224   : > { %v2708_v25 = vadd.f32 %v14178_v7, %v2319_v5  ;;  %v2321_v53 = vadd.f32 %v14179_v15, %v1932_v1  ;;  %9693 = vmatmul.mubr.msk.f32.gmra.mxu1 %vm331_vm0, %v12276_v37  ;;  %9749 = vmatmul.mubr.msk.f32.gmra.mxu0 %vm331_vm0, %v12267_v47  ;;  %v3872_v5 = vadd.f32 %v3809_v56, %v3483_v54  ;;  %v14181_v1 = vld [vmem:[#allocation73_spill] sm:$0xff]  ;;  %v14182_v3 = vld [vmem:[#allocation104_spill] sm:$0xff]  ;;  %v12291_v11 = vld [vmem:[#allocation2 + $0xf1] sm:$0xff]  ;;  %v3944_v42 = vmax.f32 %v3912_v60, 0.0 }
 0x225   : > { %v2711_v62 = vadd.f32 %v14181_v1, %v14180_v29  ;;  %v12293_v7 = vld [vmem:[#allocation2 + $0xf0] sm:$0xff]  ;;  %v12295_v15 = vld [vmem:[#allocation2 + $0xf8] sm:$0xff]  ;;  %v3485_v48 = vadd.f32 %v12219_v22, %v3096_v61  ;;  %3973 = vst.msk [vmem:[#allocation2 + $0x121] sm:$0xff] %vm331_vm0, %v3941_v36  ;;  %v3875_v54 = vadd.f32 %v9650_v45, %v3486_v23  ;;  %9695 = vmatprep.mubr.msk.f32.mxu1 %vm331_vm0, %v12291_v11  ;;  %v14183_v51 = vld [vmem:[#allocation76_spill] sm:$0xff]  ;;  %v9600_v29 = vpop.f32.mrf.mxu1  ;;  %v3819_v1 = vpop.f32.mrf.mxu0 }
 0x226   : > { %v3098_v28 = vadd.f32 %v14182_v3, %v2708_v25  ;;  %v3911_v32 = vadd.f32 %v11905_v17, %v3872_v5  ;;  %9751 = vmatprep.mubr.msk.f32.mxu0 %vm331_vm0, %v12293_v7  ;;  %v12304_v19 = vld [vmem:[#allocation2 + $0xf9] sm:$0xff]  ;;  %v2710_v25 = vadd.f32 %v14183_v51, %v2321_v53  ;;  %v3488_v56 = vadd.f32 %v9597_v0, %v3099_v55 }
 0x227   : > { %v3101_v22 = vadd.f32 %v11885_v12, %v2711_v62  ;;  %3976 = vst.msk [vmem:[#allocation2 + $0x141] sm:$0xff] %vm331_vm0, %v3944_v42  ;;  %v3914_v23 = vadd.f32 %v11905_v17, %v3875_v54  ;;  %v3874_v36 = vadd.f32 %v3819_v1, %v3485_v48  ;;  %v9653_v5 = vpop.f32.mrf.mxu0 }
 0x228   : > { %9696 = vmatmul.mubr.msk.f32.gmra.mxu1 %vm331_vm0, %v12304_v19  ;;  %9752 = vmatmul.mubr.msk.f32.gmra.mxu0 %vm331_vm0, %v12295_v15  ;;  %v3943_v61 = vmax.f32 %v3911_v32, 0.0  ;;  %v3487_v60 = vadd.f32 %v3440_v6, %v3098_v28  ;;  %v12314_v53 = vld [vmem:[#allocation2 + $0x109] sm:$0xff]  ;;  %v3100_v3 = vadd.f32 %v11893_v40, %v2710_v25  ;;  %v3877_v62 = vadd.f32 %v9653_v5, %v3488_v56  ;;  %v12327_v6 = vld [vmem:[#allocation2 + $0x111] sm:$0xff]  ;;  %v3450_v28 = vpop.f32.mrf.mxu1 }
 0x229   : > { %v12316_v0 = vld [vmem:[#allocation2 + $0x108] sm:$0xff]  ;;  %v12318_v55 = vld [vmem:[#allocation2 + $0x110] sm:$0xff]  ;;  %v3946_v45 = vmax.f32 %v3914_v23, 0.0  ;;  %v3913_v12 = vadd.f32 %v11905_v17, %v3874_v36  ;;  %9698 = vmatprep.mubr.msk.f32.mxu1 %vm331_vm0, %v12314_v53  ;;  %v3829_v48 = vpop.f32.mrf.mxu0  ;;  %v3490_v40 = vadd.f32 %v9600_v29, %v3101_v22 }
 0x22a   : > { %14184 = vst [vmem:[#allocation81_spill] sm:$0xff] %v12316_v0  ;;  %14185 = vst [vmem:[#allocation24_spill] sm:$0xff] %v12318_v55  ;;  %9754 = vmatprep.mubr.msk.f32.mxu0 %vm331_vm0, %v12316_v0  ;;  %v3916_v32 = vadd.f32 %v11905_v17, %v3877_v62  ;;  %v3876_v54 = vadd.f32 %v3829_v48, %v3487_v60  ;;  %v12347_v22 = vld [vmem:[#allocation2 + $0x129] sm:$0xff] }
 0x22b   : > { %3975 = vst.msk [vmem:[#allocation2 + $0x139] sm:$0xff] %vm331_vm0, %v3943_v61  ;;  %3978 = vst.msk [vmem:[#allocation2 + $0x159] sm:$0xff] %vm331_vm0, %v3946_v45  ;;  %v3945_v42 = vmax.f32 %v3913_v12, 0.0  ;;  %v9656_v51 = vpop.f32.mrf.mxu0  ;;  %v3489_v61 = vadd.f32 %v3450_v28, %v3100_v3 }
 0x22c   : > { %9699 = vmatmul.mubr.msk.f32.gmra.mxu1 %vm331_vm0, %v12327_v6  ;;  %9755 = vmatmul.mubr.msk.f32.gmra.mxu0 %vm331_vm0, %v12318_v55  ;;  %v12335_v25 = vld [vmem:[#allocation2 + $0x121] sm:$0xff]  ;;  %v3948_v23 = vmax.f32 %v3916_v32, 0.0  ;;  %v3915_v36 = vadd.f32 %v11905_v17, %v3876_v54  ;;  %v3879_v29 = vadd.f32 %v9656_v51, %v3490_v40 }
 0x22d   : > { %v12337_v56 = vld [vmem:[#allocation2 + $0x120] sm:$0xff]  ;;  %v12339_v1 = vld [vmem:[#allocation2 + $0x128] sm:$0xff]  ;;  %3977 = vst.msk [vmem:[#allocation2 + $0x151] sm:$0xff] %vm331_vm0, %v3945_v42  ;;  %9701 = vmatprep.mubr.msk.f32.mxu1 %vm331_vm0, %v12335_v25  ;;  %v3839_v60 = vpop.f32.mrf.mxu0 }
 0x22e   : > { %14186 = vst [vmem:[#allocation25_spill] sm:$0xff] %v12337_v56  ;;  %14187 = vst [vmem:[#allocation11_spill] sm:$0xff] %v12339_v1  ;;  %9757 = vmatprep.mubr.msk.f32.mxu0 %vm331_vm0, %v12337_v56  ;;  %v3947_v5 = vmax.f32 %v3915_v36, 0.0  ;;  %v3918_v3 = vadd.f32 %v11905_v17, %v3879_v29  ;;  %v3878_v45 = vadd.f32 %v3839_v60, %v3489_v61  ;;  %v12367_v42 = vld [vmem:[#allocation2 + $0x141] sm:$0xff] }
 0x22f   : > { %3980 = vst.msk [vmem:[#allocation2 + $0x171] sm:$0xff] %vm331_vm0, %v3948_v23  ;;  %v4697_v23 = vld [vmem:[#allocation2 + $0x2] sm:$0xff] }
 0x230   : > { %9702 = vmatmul.mubr.msk.f32.gmra.mxu1 %vm331_vm0, %v12347_v22  ;;  %9758 = vmatmul.mubr.msk.f32.gmra.mxu0 %vm331_vm0, %v12339_v1  ;;  %3979 = vst.msk [vmem:[#allocation2 + $0x169] sm:$0xff] %vm331_vm0, %v3947_v5  ;;  %v3950_v48 = vmax.f32 %v3918_v3, 0.0  ;;  %v3917_v40 = vadd.f32 %v11905_v17, %v3878_v45  ;;  %v4698_v3 = vld [vmem:[#allocation2 + $0xa] sm:$0xff] }
 0x231   : > { %v5509_v45 = vld [vmem:[%s13897_s3 + $0x90] sm:$0xff] }
 0x232   : > { %v12355_v12 = vld [vmem:[#allocation2 + $0x139] sm:$0xff]  ;;  %3982 = vst.msk [vmem:[#allocation2 + $0x189] sm:$0xff] %vm331_vm0, %v3950_v48  ;;  %v3949_v32 = vmax.f32 %v3917_v40, 0.0 }
 0x233   : > { %v12357_v62 = vld [vmem:[#allocation2 + $0x138] sm:$0xff]  ;;  %v12359_v28 = vld [vmem:[#allocation2 + $0x140] sm:$0xff]  ;;  %9704 = vmatprep.mubr.msk.f32.mxu1 %vm331_vm0, %v12355_v12 }
 0x234   : > { %14188 = vst [vmem:[#allocation10_spill] sm:$0xff] %v12357_v62  ;;  %14189 = vst [vmem:[#allocation34_spill] sm:$0xff] %v12359_v28  ;;  %9760 = vmatprep.mubr.msk.f32.mxu0 %vm331_vm0, %v12357_v62  ;;  %9705 = vmatmul.mubr.msk.f32.gmra.mxu1 %vm331_vm0, %v12367_v42  ;;  %v12374_v54 = vld [vmem:[#allocation2 + $0x151] sm:$0xff]  ;;  %v12385_v61 = vld [vmem:[#allocation2 + $0x159] sm:$0xff]  ;;  %v9667_v48 = vpop.f32.mrf.mxu1 }
 0x235   : > { %9761 = vmatmul.mubr.msk.f32.gmra.mxu0 %vm331_vm0, %v12359_v28  ;;  %v12376_v17 = vld [vmem:[#allocation2 + $0x150] sm:$0xff]  ;;  %v12378_v51 = vld [vmem:[#allocation2 + $0x158] sm:$0xff]  ;;  %3981 = vst.msk [vmem:[#allocation2 + $0x181] sm:$0xff] %vm331_vm0, %v3949_v32  ;;  %9707 = vmatprep.mubr.msk.f32.mxu1 %vm331_vm0, %v12374_v54 }
 0x236   : > { %14190 = vst [vmem:[#allocation33_spill] sm:$0xff] %v12376_v17  ;;  %14191 = vst [vmem:[#allocation79_spill] sm:$0xff] %v12378_v51  ;;  %9763 = vmatprep.mubr.msk.f32.mxu0 %vm331_vm0, %v12376_v17  ;;  %v12401_v5 = vld [vmem:[#allocation2 + $0x171] sm:$0xff]  ;;  %v12416_v32 = vld [vmem:[#allocation2 + $0x1a] sm:$0xff] }
 0x237   : > { %v12391_v36 = vld [vmem:[#allocation2 + $0x169] sm:$0xff]  ;;  %14194 = vst [vmem:[#allocation7_spill] sm:$0xff] %v12401_v5  ;;  %v9723_v40 = vpop.f32.mrf.mxu0 }
 0x238   : > { %9708 = vmatmul.mubr.msk.f32.gmra.mxu1 %vm331_vm0, %v12385_v61  ;;  %14192 = vst [vmem:[#allocation84_spill] sm:$0xff] %v12391_v36  ;;  %v12393_v29 = vld [vmem:[#allocation2 + $0x168] sm:$0xff]  ;;  %v12395_v60 = vld [vmem:[#allocation2 + $0x170] sm:$0xff] }
 0x239   : > { %9764 = vmatmul.mubr.msk.f32.gmra.mxu0 %vm331_vm0, %v12378_v51  ;;  %14193 = vst [vmem:[#allocation6_spill] sm:$0xff] %v12393_v29  ;;  %9710 = vmatprep.mubr.msk.f32.mxu1 %vm331_vm0, %v12391_v36  ;;  %v14196_v36 = vld [vmem:[#allocation77_spill] sm:$0xff] }
 0x23a   : > { %9766 = vmatprep.mubr.msk.f32.mxu0 %vm331_vm0, %v12393_v29 }
 0x23c   : > { %9711 = vmatmul.mubr.msk.f32.gmra.mxu1 %vm331_vm0, %v12401_v5  ;;  %v12418_v5 = vadd.f32 %v9723_v40, %v9667_v48  ;;  %v12483_v48 = vld [vmem:[#allocation2 + $0x6a] sm:$0xff]  ;;  %v12488_v40 = vld [vmem:[%s13897_s3 + $0xf8] sm:$0xff] }
 0x23d   : > { %9767 = vmatmul.mubr.msk.f32.gmra.mxu0 %vm331_vm0, %v12395_v60  ;;  %9777 = vmatprep.mubr.msk.f32.mxu1 %vm331_vm0, %v4697_v23  ;;  %v5898_v23 = vld [vmem:[%s13897_s3 + $0xb0] sm:$0xff] }
 0x23e   : > { %9833 = vmatprep.mubr.msk.f32.mxu0 %vm331_vm0, %v12004_v52  ;;  %14195 = vst [vmem:[#allocation36_spill] sm:$0xff] %v12418_v5  ;;  %v12425_v52 = vld [vmem:[#allocation2 + $0x22] sm:$0xff] }
 0x23f   : > { %v12579_v5 = vld [vmem:[#allocation2 + $0x122] sm:$0xff] }
 0x240   : > { %9778 = vmatmul.mubr.msk.f32.vlgmr.msra.gmra.mxu1 %vm331_vm0, %v4698_v3  ;;  %v12462_v3 = vld [vmem:[#allocation2 + $0x52] sm:$0xff] }
 0x241   : > { %9834 = vmatmul.mubr.msk.f32.vlgmr.msra.gmra.mxu0 %vm331_vm0, %v12006_v9  ;;  %9882 = vmatpush3.msra.mxu1 %v14196_v36  ;;  %v5508_v9 = vld [vmem:[%s13897_s3 + $0x88] sm:$0xff]  ;;  %v5507_v36 = vld [vmem:[%s13897_s3 + $0x80] sm:$0xff] }
 0x242   : > { %9780 = vmatprep.mubr.msk.f32.mxu1 %vm331_vm0, %v12416_v32  ;;  %9836 = vmatprep.mubr.msk.f32.mxu0 %vm331_vm0, %v12038_v8  ;;  %v12438_v8 = vld [vmem:[#allocation2 + $0x32] sm:$0xff] }
 0x243   : > { %9883 = vmatprep.subr.mxu1 %v5509_v45  ;;  %9938 = vmatpush3.msra.mxu0 %v11939_v16  ;;  %v12444_v16 = vld [vmem:[#allocation2 + $0x3a] sm:$0xff] }
 0x244   : > { %9884 = vmatpush3.msra.mxu1 %v5509_v45  ;;  %9939 = vmatprep.subr.mxu0 %v5898_v23  ;;  %v5896_v45 = vld [vmem:[%s13897_s3 + $0xa0] sm:$0xff] }
 0x245   : > { %9781 = vmatmul.mubr.msk.f32.gmra.mxu1 %vm331_vm0, %v12425_v52  ;;  %9837 = vmatmul.mubr.msk.f32.gmra.mxu0 %vm331_vm0, %v12040_v27  ;;  %v5897_v27 = vld [vmem:[%s13897_s3 + $0xa8] sm:$0xff] }
 0x246   : > { %9783 = vmatprep.mubr.msk.f32.mxu1 %vm331_vm0, %v12438_v8  ;;  %9839 = vmatprep.mubr.msk.f32.mxu0 %vm331_vm0, %v12071_v49  ;;  %v12456_v49 = vld [vmem:[#allocation2 + $0x4a] sm:$0xff] }
 0x247   : > { %9885 = vmatprep.subr.mxu1 %v5508_v9  ;;  %9940 = vmatpush3.msra.mxu0 %v5898_v23  ;;  %v12555_v23 = vld [vmem:[#allocation2 + $0xf2] sm:$0xff] }
 0x248   : > { %9886 = vmatpush3.msra.mxu1 %v5508_v9  ;;  %9941 = vmatprep.subr.mxu0 %v5897_v27  ;;  %v12507_v9 = vld [vmem:[#allocation2 + $0x92] sm:$0xff] }
 0x249   : > { %9784 = vmatmul.mubr.msk.f32.gmra.mxu1 %vm331_vm0, %v12444_v16  ;;  %9840 = vmatmul.mubr.msk.f32.gmra.mxu0 %vm331_vm0, %v12073_v13  ;;  %v12470_v13 = vld [vmem:[%s13897_s3 + $0xd8] sm:$0xff] }
 0x24a   : > { %9786 = vmatprep.mubr.msk.f32.mxu1 %vm331_vm0, %v12456_v49  ;;  %9842 = vmatprep.mubr.msk.f32.mxu0 %vm331_vm0, %v12104_v33  ;;  %v12476_v33 = vld [vmem:[#allocation2 + $0x62] sm:$0xff] }
 0x24b   : > { %9887 = vmatprep.subr.mxu1 %v5507_v36  ;;  %9942 = vmatpush3.msra.mxu0 %v5897_v27  ;;  %v12567_v27 = vld [vmem:[#allocation2 + $0x10a] sm:$0xff] }
 0x24c   : > { %9888 = vmatpush3.msra.mxu1 %v5507_v36  ;;  %9943 = vmatprep.subr.mxu0 %v5896_v45  ;;  %v12561_v36 = vld [vmem:[#allocation2 + $0xfa] sm:$0xff] }
 0x24d   : > { %9787 = vmatmul.mubr.msk.f32.gmra.mxu1 %vm331_vm0, %v12462_v3  ;;  %9843 = vmatmul.mubr.msk.f32.gmra.mxu0 %vm331_vm0, %v12106_v21  ;;  %v12494_v21 = vld [vmem:[#allocation2 + $0x7a] sm:$0xff] }
 0x24e   : > { %9789 = vmatprep.mubr.msk.f32.mxu1 %vm331_vm0, %v12476_v33  ;;  %9845 = vmatprep.mubr.msk.f32.mxu0 %vm331_vm0, %v12137_v57  ;;  %v12501_v57 = vld [vmem:[#allocation2 + $0x82] sm:$0xff] }
 0x24f   : > { %9993 = vmatprep.subr.mxu1 %v12470_v13  ;;  %9944 = vmatpush3.msra.mxu0 %v5896_v45  ;;  %v12573_v45 = vld [vmem:[#allocation2 + $0x112] sm:$0xff] }
 0x250   : > { %10049 = vmatprep.subr.mxu0 %v12488_v40 }
 0x251   : > { %9790 = vmatmul.mubr.msk.f32.gmra.mxu1 %vm331_vm0, %v12483_v48  ;;  %9846 = vmatmul.mubr.msk.f32.gmra.mxu0 %vm331_vm0, %v12139_v35  ;;  %v12513_v35 = vld [vmem:[#allocation2 + $0x9a] sm:$0xff] }
 0x252   : > { %9792 = vmatprep.mubr.msk.f32.mxu1 %vm331_vm0, %v12494_v21  ;;  %9848 = vmatprep.mubr.msk.f32.mxu0 %vm331_vm0, %v12170_v46  ;;  %v12519_v46 = vld [vmem:[#allocation2 + $0xaa] sm:$0xff] }
 0x255   : > { %9793 = vmatmul.mubr.msk.f32.gmra.mxu1 %vm331_vm0, %v12501_v57  ;;  %9849 = vmatmul.mubr.msk.f32.gmra.mxu0 %vm331_vm0, %v12172_v14  ;;  %v12525_v14 = vld [vmem:[#allocation2 + $0xb2] sm:$0xff] }
 0x256   : > { %9795 = vmatprep.mubr.msk.f32.mxu1 %vm331_vm0, %v12507_v9  ;;  %9851 = vmatprep.mubr.msk.f32.mxu0 %vm331_vm0, %v12203_v43  ;;  %v12531_v43 = vld [vmem:[#allocation2 + $0xc2] sm:$0xff] }
 0x259   : > { %9796 = vmatmul.mubr.msk.f32.gmra.mxu1 %vm331_vm0, %v12513_v35  ;;  %9852 = vmatmul.mubr.msk.f32.gmra.mxu0 %vm331_vm0, %v12205_v10  ;;  %v12537_v10 = vld [vmem:[#allocation2 + $0xca] sm:$0xff] }
 0x25a   : > { %9798 = vmatprep.mubr.msk.f32.mxu1 %vm331_vm0, %v12519_v46  ;;  %9854 = vmatprep.mubr.msk.f32.mxu0 %vm331_vm0, %v12236_v38  ;;  %v12543_v38 = vld [vmem:[#allocation2 + $0xda] sm:$0xff] }
 0x25d   : > { %9799 = vmatmul.mubr.msk.f32.gmra.mxu1 %vm331_vm0, %v12525_v14  ;;  %9855 = vmatmul.mubr.msk.f32.gmra.mxu0 %vm331_vm0, %v12238_v4  ;;  %v12549_v4 = vld [vmem:[#allocation2 + $0xe2] sm:$0xff] }
 0x25e   : > { %9801 = vmatprep.mubr.msk.f32.mxu1 %vm331_vm0, %v12531_v43  ;;  %9857 = vmatprep.mubr.msk.f32.mxu0 %vm331_vm0, %v12265_v34 }
 0x261   : > { %9802 = vmatmul.mubr.msk.f32.gmra.mxu1 %vm331_vm0, %v12537_v10  ;;  %9858 = vmatmul.mubr.msk.f32.gmra.mxu0 %vm331_vm0, %v12267_v47 }
 0x262   : > { %9804 = vmatprep.mubr.msk.f32.mxu1 %vm331_vm0, %v12543_v38  ;;  %9860 = vmatprep.mubr.msk.f32.mxu0 %vm331_vm0, %v12293_v7 }
 0x265   : > { %9805 = vmatmul.mubr.msk.f32.gmra.mxu1 %vm331_vm0, %v12549_v4  ;;  %9861 = vmatmul.mubr.msk.f32.gmra.mxu0 %vm331_vm0, %v12295_v15 }
 0x266   : > { %9807 = vmatprep.mubr.msk.f32.mxu1 %vm331_vm0, %v12555_v23  ;;  %9863 = vmatprep.mubr.msk.f32.mxu0 %vm331_vm0, %v12316_v0  ;;  %v12617_v0 = vld [vmem:[#allocation2 + $0x180] sm:$0xff] }
 0x269   : > { %9808 = vmatmul.mubr.msk.f32.gmra.mxu1 %vm331_vm0, %v12561_v36  ;;  %9864 = vmatmul.mubr.msk.f32.gmra.mxu0 %vm331_vm0, %v12318_v55  ;;  %v12585_v55 = vld [vmem:[#allocation2 + $0x12a] sm:$0xff] }
 0x26a   : > { %9810 = vmatprep.mubr.msk.f32.mxu1 %vm331_vm0, %v12567_v27  ;;  %9866 = vmatprep.mubr.msk.f32.mxu0 %vm331_vm0, %v12337_v56  ;;  %v12591_v56 = vld [vmem:[#allocation2 + $0x13a] sm:$0xff] }
 0x26d   : > { %9811 = vmatmul.mubr.msk.f32.gmra.mxu1 %vm331_vm0, %v12573_v45  ;;  %9867 = vmatmul.mubr.msk.f32.gmra.mxu0 %vm331_vm0, %v12339_v1  ;;  %v12597_v1 = vld [vmem:[#allocation2 + $0x142] sm:$0xff] }
 0x26e   : > { %9813 = vmatprep.mubr.msk.f32.mxu1 %vm331_vm0, %v12579_v5  ;;  %9869 = vmatprep.mubr.msk.f32.mxu0 %vm331_vm0, %v12357_v62  ;;  %v12603_v62 = vld [vmem:[#allocation2 + $0x152] sm:$0xff] }
 0x271   : > { %9814 = vmatmul.mubr.msk.f32.gmra.mxu1 %vm331_vm0, %v12585_v55  ;;  %9870 = vmatmul.mubr.msk.f32.gmra.mxu0 %vm331_vm0, %v12359_v28  ;;  %v12609_v28 = vld [vmem:[#allocation2 + $0x15a] sm:$0xff] }
 0x272   : > { %9816 = vmatprep.mubr.msk.f32.mxu1 %vm331_vm0, %v12591_v56  ;;  %9872 = vmatprep.mubr.msk.f32.mxu0 %vm331_vm0, %v12376_v17  ;;  %v12615_v17 = vld [vmem:[#allocation2 + $0x16a] sm:$0xff] }
 0x275   : > { %9817 = vmatmul.mubr.msk.f32.gmra.mxu1 %vm331_vm0, %v12597_v1  ;;  %9873 = vmatmul.mubr.msk.f32.gmra.mxu0 %vm331_vm0, %v12378_v51  ;;  %v12623_v51 = vld [vmem:[#allocation2 + $0x172] sm:$0xff] }
 0x276   : > { %9819 = vmatprep.mubr.msk.f32.mxu1 %vm331_vm0, %v12603_v62  ;;  %9875 = vmatprep.mubr.msk.f32.mxu0 %vm331_vm0, %v12393_v29  ;;  %v12625_v29 = vld [vmem:[#allocation2 + $0x188] sm:$0xff] }
 0x279   : > { %9820 = vmatmul.mubr.msk.f32.gmra.mxu1 %vm331_vm0, %v12609_v28  ;;  %9876 = vmatmul.mubr.msk.f32.gmra.mxu0 %vm331_vm0, %v12395_v60  ;;  %v6287_v60 = vld [vmem:[%s13897_s3 + $0xd0] sm:$0xff] }
 0x27a   : > { %9822 = vmatprep.mubr.msk.f32.mxu1 %vm331_vm0, %v12615_v17  ;;  %9878 = vmatprep.mubr.msk.f32.mxu0 %vm331_vm0, %v12617_v0 }
 0x27d   : > { %9823 = vmatmul.mubr.msk.f32.gmra.mxu1 %vm331_vm0, %v12623_v51  ;;  %9879 = vmatmul.mubr.msk.f32.gmra.mxu0 %vm331_vm0, %v12625_v29 }
 0x27e   : > { %9889 = vmatprep.mubr.msk.f32.mxu1 %vm331_vm0, %v12002_v39  ;;  %9945 = vmatprep.mubr.msk.f32.mxu0 %vm331_vm0, %v12416_v32  ;;  %v6286_v39 = vld [vmem:[%s13897_s3 + $0xc8] sm:$0xff]  ;;  %v12805_v32 = vpop.f32.mrf.mxu0 }
 0x281   : > { %9890 = vmatmul.mubr.msk.f32.vlgmr.msra.gmra.mxu1 %vm331_vm0, %v12015_v41  ;;  %9946 = vmatmul.mubr.msk.f32.vlgmr.msra.gmra.mxu0 %vm331_vm0, %v12425_v52  ;;  %v6676_v41 = vld [vmem:[%s13897_s3 + $0xf0] sm:$0xff] }
 0x282   : > { %9994 = vmatpush3.msra.mxu1 %v12470_v13  ;;  %9892 = vmatprep.mubr.msk.f32.mxu1 %vm331_vm0, %v12036_v26  ;;  %v6285_v26 = vld [vmem:[%s13897_s3 + $0xc0] sm:$0xff]  ;;  %v6256_v52 = vld [vmem:[#allocation2 + $0x50] sm:$0xff] }
 0x283   : > { %9948 = vmatprep.mubr.msk.f32.mxu0 %vm331_vm0, %v12438_v8  ;;  %9995 = vmatprep.subr.mxu1 %v6287_v60  ;;  %v6645_v8 = vld [vmem:[#allocation2 + $0x51] sm:$0xff]  ;;  %v6257_v13 = vld [vmem:[#allocation2 + $0x60] sm:$0xff] }
 0x284   : > { %9996 = vmatpush3.msra.mxu1 %v6287_v60  ;;  %10050 = vmatpush3.msra.mxu0 %v12488_v40  ;;  %v6649_v60 = vld [vmem:[#allocation2 + $0x81] sm:$0xff] }
 0x285   : > { %9893 = vmatmul.mubr.msk.f32.gmra.mxu1 %vm331_vm0, %v12049_v44  ;;  %9949 = vmatmul.mubr.msk.f32.gmra.mxu0 %vm331_vm0, %v12444_v16  ;;  %v6675_v44 = vld [vmem:[%s13897_s3 + $0xe8] sm:$0xff] }
 0x286   : > { %9895 = vmatprep.mubr.msk.f32.mxu1 %vm331_vm0, %v12069_v58  ;;  %9951 = vmatprep.mubr.msk.f32.mxu0 %vm331_vm0, %v12456_v49  ;;  %v6674_v58 = vld [vmem:[%s13897_s3 + $0xe0] sm:$0xff]  ;;  %v7064_v16 = vld [vmem:[%s13897_s3 + $0x108] sm:$0xff] }
 0x287   : > { %9997 = vmatprep.subr.mxu1 %v6286_v39  ;;  %10051 = vmatprep.subr.mxu0 %v6676_v41 }
 0x288   : > { %9998 = vmatpush3.msra.mxu1 %v6286_v39  ;;  %10052 = vmatpush3.msra.mxu0 %v6676_v41 }
 0x289   : > { %9896 = vmatmul.mubr.msk.f32.gmra.mxu1 %vm331_vm0, %v12082_v59  ;;  %9952 = vmatmul.mubr.msk.f32.gmra.mxu0 %vm331_vm0, %v12462_v3  ;;  %v12682_v59 = vld [vmem:[%s13897_s3 + $0x118] sm:$0xff] }
 0x28a   : > { %9898 = vmatprep.mubr.msk.f32.mxu1 %vm331_vm0, %v12102_v31  ;;  %9954 = vmatprep.mubr.msk.f32.mxu0 %vm331_vm0, %v12476_v33  ;;  %v14197_v31 = vmov 0.0   ;;  %v6646_v33 = vld [vmem:[#allocation2 + $0x61] sm:$0xff] }
 0x28b   : > { %9999 = vmatprep.subr.mxu1 %v6285_v26  ;;  %10053 = vmatprep.subr.mxu0 %v6675_v44 }
 0x28c   : > { %10000 = vmatpush3.msra.mxu1 %v6285_v26  ;;  %10054 = vmatpush3.msra.mxu0 %v6675_v44  ;;  %v6261_v26 = vld [vmem:[#allocation2 + $0x90] sm:$0xff] }
 0x28d   : > { %9899 = vmatmul.mubr.msk.f32.gmra.mxu1 %vm331_vm0, %v12115_v30  ;;  %9955 = vmatmul.mubr.msk.f32.gmra.mxu0 %vm331_vm0, %v12483_v48  ;;  %v14198_v30 = vld [vmem:[#allocation32_spill] sm:$0xff]  ;;  %v6650_v44 = vld [vmem:[#allocation2 + $0x91] sm:$0xff] }
 0x28e   : > { %9901 = vmatprep.mubr.msk.f32.mxu1 %vm331_vm0, %v12135_v18  ;;  %9957 = vmatprep.mubr.msk.f32.mxu0 %vm331_vm0, %v12494_v21  ;;  %v14199_v18 = vld [vmem:[#allocation35_spill] sm:$0xff] }
 0x28f   : > { %10055 = vmatprep.subr.mxu0 %v6674_v58  ;;  %10105 = vmatprep.subr.mxu1 %v12682_v59 }
 0x290   : > { %10056 = vmatpush3.msra.mxu0 %v6674_v58 }
 0x291   : > { %9902 = vmatmul.mubr.msk.f32.gmra.mxu1 %vm331_vm0, %v12148_v50  ;;  %9958 = vmatmul.mubr.msk.f32.gmra.mxu0 %vm331_vm0, %v12501_v57  ;;  %v14200_v50 = vld [vmem:[#allocation78_spill] sm:$0xff] }
 0x292   : > { %9904 = vmatprep.mubr.msk.f32.mxu1 %vm331_vm0, %v12168_v20  ;;  %9960 = vmatprep.mubr.msk.f32.mxu0 %vm331_vm0, %v12507_v9  ;;  %v14201_v20 = vld [vmem:[#allocation84_spill] sm:$0xff]  ;;  %v6258_v9 = vld [vmem:[#allocation2 + $0x68] sm:$0xff] }
 0x293   : > { %10161 = vmatprep.subr.mxu0 %v14197_v31 }
 0x295   : > { %9905 = vmatmul.mubr.msk.f32.gmra.mxu1 %vm331_vm0, %v12181_v2  ;;  %9961 = vmatmul.mubr.msk.f32.gmra.mxu0 %vm331_vm0, %v12513_v35  ;;  %v14202_v2 = vld [vmem:[#allocation7_spill] sm:$0xff]  ;;  %v6647_v35 = vld [vmem:[#allocation2 + $0x69] sm:$0xff] }
 0x296   : > { %9907 = vmatprep.mubr.msk.f32.mxu1 %vm331_vm0, %v14198_v30  ;;  %9963 = vmatprep.mubr.msk.f32.mxu0 %vm331_vm0, %v12519_v46  ;;  %v7063_v46 = vld [vmem:[%s13897_s3 + $0x100] sm:$0xff] }
 0x299   : > { %9908 = vmatmul.mubr.msk.f32.gmra.mxu1 %vm331_vm0, %v14199_v18  ;;  %9964 = vmatmul.mubr.msk.f32.gmra.mxu0 %vm331_vm0, %v12525_v14 }
 0x29a   : > { %9910 = vmatprep.mubr.msk.f32.mxu1 %vm331_vm0, %v12234_v24  ;;  %9966 = vmatprep.mubr.msk.f32.mxu0 %vm331_vm0, %v12531_v43  ;;  %v12778_v24 = vld [vmem:[#allocation2 + $0x181] sm:$0xff] }
 0x29d   : > { %9911 = vmatmul.mubr.msk.f32.gmra.mxu1 %vm331_vm0, %v14200_v50  ;;  %9967 = vmatmul.mubr.msk.f32.gmra.mxu0 %vm331_vm0, %v12537_v10  ;;  %v6259_v10 = vld [vmem:[#allocation2 + $0x78] sm:$0xff] }
 0x29e   : > { %9913 = vmatprep.mubr.msk.f32.mxu1 %vm331_vm0, %v12263_v63  ;;  %9969 = vmatprep.mubr.msk.f32.mxu0 %vm331_vm0, %v12543_v38  ;;  %v12780_v63 = vld [vmem:[#allocation2 + $0x182] sm:$0xff]  ;;  %v6648_v38 = vld [vmem:[#allocation2 + $0x79] sm:$0xff] }
 0x29f   : > { %v6262_v50 = vld [vmem:[#allocation2 + $0x98] sm:$0xff] }
 0x2a1   : > { %9914 = vmatmul.mubr.msk.f32.gmra.mxu1 %vm331_vm0, %v12276_v37  ;;  %9970 = vmatmul.mubr.msk.f32.gmra.mxu0 %vm331_vm0, %v12549_v4  ;;  %v12786_v37 = vld [vmem:[#allocation2 + $0x189] sm:$0xff] }
 0x2a2   : > { %9916 = vmatprep.mubr.msk.f32.mxu1 %vm331_vm0, %v12291_v11  ;;  %9972 = vmatprep.mubr.msk.f32.mxu0 %vm331_vm0, %v12555_v23 }
 0x2a5   : > { %9917 = vmatmul.mubr.msk.f32.gmra.mxu1 %vm331_vm0, %v12304_v19  ;;  %9973 = vmatmul.mubr.msk.f32.gmra.mxu0 %vm331_vm0, %v12561_v36 }
 0x2a6   : > { %9919 = vmatprep.mubr.msk.f32.mxu1 %vm331_vm0, %v12314_v53  ;;  %9975 = vmatprep.mubr.msk.f32.mxu0 %vm331_vm0, %v12567_v27 }
 0x2a9   : > { %9920 = vmatmul.mubr.msk.f32.gmra.mxu1 %vm331_vm0, %v12327_v6  ;;  %9976 = vmatmul.mubr.msk.f32.gmra.mxu0 %vm331_vm0, %v12573_v45  ;;  %v6260_v45 = vld [vmem:[#allocation2 + $0x80] sm:$0xff] }
 0x2aa   : > { %9922 = vmatprep.mubr.msk.f32.mxu1 %vm331_vm0, %v12335_v25  ;;  %9978 = vmatprep.mubr.msk.f32.mxu0 %vm331_vm0, %v12579_v5  ;;  %v12803_v5 = vpop.f32.mrf.mxu1 }
 0x2ad   : > { %9923 = vmatmul.mubr.msk.f32.gmra.mxu1 %vm331_vm0, %v12347_v22  ;;  %9979 = vmatmul.mubr.msk.f32.gmra.mxu0 %vm331_vm0, %v12585_v55  ;;  %v12788_v55 = vld [vmem:[#allocation2 + $0x18a] sm:$0xff] }
 0x2ae   : > { %9925 = vmatprep.mubr.msk.f32.mxu1 %vm331_vm0, %v12355_v12  ;;  %9981 = vmatprep.mubr.msk.f32.mxu0 %vm331_vm0, %v12591_v56  ;;  %v6253_v56 = vld [vmem:[#allocation2 + $0x30] sm:$0xff] }
 0x2b1   : > { %9926 = vmatmul.mubr.msk.f32.gmra.mxu1 %vm331_vm0, %v12367_v42  ;;  %9982 = vmatmul.mubr.msk.f32.gmra.mxu0 %vm331_vm0, %v12597_v1  ;;  %v6642_v1 = vld [vmem:[#allocation2 + $0x31] sm:$0xff] }
 0x2b2   : > { %9928 = vmatprep.mubr.msk.f32.mxu1 %vm331_vm0, %v12374_v54  ;;  %9984 = vmatprep.mubr.msk.f32.mxu0 %vm331_vm0, %v12603_v62  ;;  %v6254_v62 = vld [vmem:[#allocation2 + $0x38] sm:$0xff] }
 0x2b5   : > { %9929 = vmatmul.mubr.msk.f32.gmra.mxu1 %vm331_vm0, %v12385_v61  ;;  %9985 = vmatmul.mubr.msk.f32.gmra.mxu0 %vm331_vm0, %v12609_v28  ;;  %v6643_v28 = vld [vmem:[#allocation2 + $0x39] sm:$0xff]  ;;  %v6644_v61 = vld [vmem:[#allocation2 + $0x49] sm:$0xff] }
 0x2b6   : > { %9931 = vmatprep.mubr.msk.f32.mxu1 %vm331_vm0, %v14201_v20  ;;  %9987 = vmatprep.mubr.msk.f32.mxu0 %vm331_vm0, %v12615_v17  ;;  %v7065_v17 = vld [vmem:[%s13897_s3 + $0x110] sm:$0xff] }
 0x2b9   : > { %9932 = vmatmul.mubr.msk.f32.gmra.mxu1 %vm331_vm0, %v14202_v2  ;;  %9988 = vmatmul.mubr.msk.f32.gmra.mxu0 %vm331_vm0, %v12623_v51  ;;  %v6255_v51 = vld [vmem:[#allocation2 + $0x48] sm:$0xff]  ;;  %v6651_v2 = vld [vmem:[#allocation2 + $0x99] sm:$0xff] }
 0x2ba   : > { %9934 = vmatprep.mubr.msk.f32.mxu1 %vm331_vm0, %v12778_v24  ;;  %9990 = vmatprep.mubr.msk.f32.mxu0 %vm331_vm0, %v12780_v63 }
 0x2bd   : > { %9935 = vmatmul.mubr.msk.f32.gmra.mxu1 %vm331_vm0, %v12786_v37  ;;  %9991 = vmatmul.mubr.msk.f32.gmra.mxu0 %vm331_vm0, %v12788_v55 }
 0x2be   : > { %10001 = vmatprep.mubr.msk.f32.mxu1 %vm331_vm0, %v6253_v56  ;;  %10057 = vmatprep.mubr.msk.f32.mxu0 %vm331_vm0, %v6642_v1 }
 0x2c1   : > { %10002 = vmatmul.mubr.msk.f32.vlgmr.msra.gmra.mxu1 %vm331_vm0, %v6254_v62  ;;  %10058 = vmatmul.mubr.msk.f32.vlgmr.msra.gmra.mxu0 %vm331_vm0, %v6643_v28  ;;  %v9670_v49 = vpop.f32.mrf.mxu1  ;;  %v6263_v62 = vld [vmem:[#allocation2 + $0xa8] sm:$0xff] }
 0x2c2   : > { %10106 = vmatpush3.msra.mxu1 %v12682_v59  ;;  %10004 = vmatprep.mubr.msk.f32.mxu1 %vm331_vm0, %v6255_v51  ;;  %v9726_v3 = vpop.f32.mrf.mxu0  ;;  %v6652_v28 = vld [vmem:[#allocation2 + $0xa9] sm:$0xff] }
 0x2c3   : > { %10060 = vmatprep.mubr.msk.f32.mxu0 %vm331_vm0, %v6644_v61  ;;  %10107 = vmatprep.subr.mxu1 %v7065_v17  ;;  %v12813_v48 = vadd.f32 %v9726_v3, %v9670_v49  ;;  %v4227_v40 = vpop.f32.mrf.mxu1 }
 0x2c4   : > { %10108 = vmatpush3.msra.mxu1 %v7065_v17  ;;  %v4548_v21 = vpop.f32.mrf.mxu0 }
 0x2c5   : > { %10005 = vmatmul.mubr.msk.f32.gmra.mxu1 %vm331_vm0, %v6256_v52  ;;  %10061 = vmatmul.mubr.msk.f32.gmra.mxu0 %vm331_vm0, %v6645_v8  ;;  %v12817_v57 = vadd.f32 %v4548_v21, %v4227_v40  ;;  %v9673_v14 = vpop.f32.mrf.mxu1  ;;  %v6264_v8 = vld [vmem:[#allocation2 + $0xb0] sm:$0xff] }
 0x2c6   : > { %10007 = vmatprep.mubr.msk.f32.mxu1 %vm331_vm0, %v6257_v13  ;;  %10063 = vmatprep.mubr.msk.f32.mxu0 %vm331_vm0, %v6646_v33  ;;  %v9729_v43 = vpop.f32.mrf.mxu0  ;;  %v6265_v13 = vld [vmem:[#allocation2 + $0xc0] sm:$0xff] }
 0x2c7   : > { %10109 = vmatprep.subr.mxu1 %v7064_v16  ;;  %v12824_v4 = vadd.f32 %v9729_v43, %v9673_v14  ;;  %v4237_v23 = vpop.f32.mrf.mxu1  ;;  %v6654_v33 = vld [vmem:[#allocation2 + $0xc1] sm:$0xff]  ;;  %v6655_v14 = vld [vmem:[#allocation2 + $0xc9] sm:$0xff] }
 0x2c8   : > { %10110 = vmatpush3.msra.mxu1 %v7064_v16  ;;  %v4558_v36 = vpop.f32.mrf.mxu0  ;;  %v6653_v16 = vld [vmem:[#allocation2 + $0xb1] sm:$0xff] }
 0x2c9   : > { %10008 = vmatmul.mubr.msk.f32.gmra.mxu1 %vm331_vm0, %v6258_v9  ;;  %10064 = vmatmul.mubr.msk.f32.gmra.mxu0 %vm331_vm0, %v6647_v35  ;;  %v12828_v27 = vadd.f32 %v4558_v36, %v4237_v23 }
 0x2ca   : > { %10010 = vmatprep.mubr.msk.f32.mxu1 %vm331_vm0, %v6259_v10  ;;  %10066 = vmatprep.mubr.msk.f32.mxu0 %vm331_vm0, %v6648_v38  ;;  %v9676_v39 = vpop.f32.mrf.mxu1  ;;  %v9732_v41 = vpop.f32.mrf.mxu0  ;;  %v6656_v38 = vld [vmem:[#allocation2 + $0xd9] sm:$0xff] }
 0x2cb   : > { %10111 = vmatprep.subr.mxu1 %v7063_v46  ;;  %v12832_v58 = vadd.f32 %v9732_v41, %v9676_v39  ;;  %v6657_v39 = vld [vmem:[#allocation2 + $0xe1] sm:$0xff] }
 0x2cc   : > { %10112 = vmatpush3.msra.mxu1 %v7063_v46  ;;  %v4247_v59 = vpop.f32.mrf.mxu1  ;;  %v4568_v30 = vpop.f32.mrf.mxu0  ;;  %v6266_v46 = vld [vmem:[#allocation2 + $0xc8] sm:$0xff] }
 0x2cd   : > { %10011 = vmatmul.mubr.msk.f32.gmra.mxu1 %vm331_vm0, %v6260_v45  ;;  %10067 = vmatmul.mubr.msk.f32.gmra.mxu0 %vm331_vm0, %v6649_v60  ;;  %v12837_v18 = vadd.f32 %v4568_v30, %v4247_v59 }
 0x2ce   : > { %10013 = vmatprep.mubr.msk.f32.mxu1 %vm331_vm0, %v6261_v26  ;;  %10069 = vmatprep.mubr.msk.f32.mxu0 %vm331_vm0, %v6650_v44  ;;  %v9679_v56 = vpop.f32.mrf.mxu1  ;;  %v9735_v1 = vpop.f32.mrf.mxu0 }
 0x2cf   : > { %10172 = vmatprep.subr.mxu1 %v14197_v31  ;;  %v12841_v17 = vadd.f32 %v9735_v1, %v9679_v56  ;;  %v14203_v56 = vld [vmem:[#allocation81_spill] sm:$0xff] }
 0x2d0   : > { %v4257_v51 = vpop.f32.mrf.mxu1  ;;  %v4578_v61 = vpop.f32.mrf.mxu0 }
 0x2d1   : > { %10014 = vmatmul.mubr.msk.f32.gmra.mxu1 %vm331_vm0, %v6262_v50  ;;  %10070 = vmatmul.mubr.msk.f32.gmra.mxu0 %vm331_vm0, %v6651_v2  ;;  %v12845_v52 = vadd.f32 %v4578_v61, %v4257_v51 }
 0x2d2   : > { %10016 = vmatprep.mubr.msk.f32.mxu1 %vm331_vm0, %v6263_v62  ;;  %10072 = vmatprep.mubr.msk.f32.mxu0 %vm331_vm0, %v6652_v28  ;;  %v9682_v49 = vpop.f32.mrf.mxu1  ;;  %v9738_v3 = vpop.f32.mrf.mxu0  ;;  %v14204_v28 = vld [vmem:[#allocation24_spill] sm:$0xff] }
 0x2d3   : > { %v12849_v40 = vadd.f32 %v9738_v3, %v9682_v49  ;;  %v14206_v49 = vld [vmem:[#allocation11_spill] sm:$0xff]  ;;  %v14207_v3 = vld [vmem:[#allocation10_spill] sm:$0xff] }
 0x2d4   : > { %v4267_v21 = vpop.f32.mrf.mxu1  ;;  %v4588_v9 = vpop.f32.mrf.mxu0 }
 0x2d5   : > { %10017 = vmatmul.mubr.msk.f32.gmra.mxu1 %vm331_vm0, %v6264_v8  ;;  %10073 = vmatmul.mubr.msk.f32.gmra.mxu0 %vm331_vm0, %v6653_v16  ;;  %v12853_v35 = vadd.f32 %v4588_v9, %v4267_v21 }
 0x2d6   : > { %10019 = vmatprep.mubr.msk.f32.mxu1 %vm331_vm0, %v6265_v13  ;;  %10075 = vmatprep.mubr.msk.f32.mxu0 %vm331_vm0, %v6654_v33  ;;  %v9685_v43 = vpop.f32.mrf.mxu1  ;;  %v9741_v10 = vpop.f32.mrf.mxu0 }
 0x2d7   : > { %v12857_v23 = vadd.f32 %v9741_v10, %v9685_v43 }
 0x2d8   : > { %v4277_v36 = vpop.f32.mrf.mxu1  ;;  %v4598_v45 = vpop.f32.mrf.mxu0 }
 0x2d9   : > { %10020 = vmatmul.mubr.msk.f32.gmra.mxu1 %vm331_vm0, %v6266_v46  ;;  %10076 = vmatmul.mubr.msk.f32.gmra.mxu0 %vm331_vm0, %v6655_v14  ;;  %v12862_v60 = vadd.f32 %v4598_v45, %v4277_v36  ;;  %v14208_v46 = vld [vmem:[#allocation34_spill] sm:$0xff]  ;;  %v14209_v14 = vld [vmem:[#allocation33_spill] sm:$0xff] }
 0x2da   : > { %10022 = vmatprep.mubr.msk.f32.mxu1 %vm331_vm0, %v12265_v34  ;;  %10078 = vmatprep.mubr.msk.f32.mxu0 %vm331_vm0, %v6656_v38  ;;  %v9688_v41 = vpop.f32.mrf.mxu1  ;;  %v6667_v38 = vld [vmem:[#allocation2 + $0x159] sm:$0xff] }
 0x2db   : > { %v9744_v26 = vpop.f32.mrf.mxu0 }
 0x2dc   : > { %v12867_v44 = vadd.f32 %v9744_v26, %v9688_v41  ;;  %v4287_v34 = vpop.f32.mrf.mxu1  ;;  %v14211_v41 = vld [vmem:[#allocation6_spill] sm:$0xff] }
 0x2dd   : > { %10023 = vmatmul.mubr.msk.f32.gmra.mxu1 %vm331_vm0, %v12267_v47  ;;  %10079 = vmatmul.mubr.msk.f32.gmra.mxu0 %vm331_vm0, %v6657_v39  ;;  %v4608_v59 = vpop.f32.mrf.mxu0  ;;  %v14210_v39 = vld [vmem:[#allocation79_spill] sm:$0xff] }
 0x2de   : > { %10025 = vmatprep.mubr.msk.f32.mxu1 %vm331_vm0, %v12293_v7  ;;  %10081 = vmatprep.mubr.msk.f32.mxu0 %vm331_vm0, %v12291_v11  ;;  %v12873_v30 = vadd.f32 %v4608_v59, %v4287_v34  ;;  %v6280_v59 = vld [vmem:[#allocation2 + $0x170] sm:$0xff] }
 0x2e0   : > { %v9691_v50 = vpop.f32.mrf.mxu1  ;;  %v9747_v2 = vpop.f32.mrf.mxu0 }
 0x2e1   : > { %10026 = vmatmul.mubr.msk.f32.gmra.mxu1 %vm331_vm0, %v12295_v15  ;;  %10082 = vmatmul.mubr.msk.f32.gmra.mxu0 %vm331_vm0, %v12304_v19  ;;  %v12879_v47 = vadd.f32 %v9747_v2, %v9691_v50  ;;  %v14205_v19 = vld [vmem:[#allocation25_spill] sm:$0xff]  ;;  %v6669_v50 = vld [vmem:[#allocation2 + $0x171] sm:$0xff] }
 0x2e2   : > { %10028 = vmatprep.mubr.msk.f32.mxu1 %vm331_vm0, %v14203_v56  ;;  %10084 = vmatprep.mubr.msk.f32.mxu0 %vm331_vm0, %v12314_v53  ;;  %v12885_v11 = vpop.f32.mrf.mxu1  ;;  %v12887_v7 = vpop.f32.mrf.mxu0 }
 0x2e4   : > { %v9694_v1 = vpop.f32.mrf.mxu1  ;;  %v9750_v62 = vpop.f32.mrf.mxu0 }
 0x2e5   : > { %10029 = vmatmul.mubr.msk.f32.gmra.mxu1 %vm331_vm0, %v14204_v28  ;;  %10085 = vmatmul.mubr.msk.f32.gmra.mxu0 %vm331_vm0, %v12327_v6  ;;  %v12893_v15 = vadd.f32 %v9750_v62, %v9694_v1  ;;  %v6283_v28 = vld [vmem:[#allocation2 + $0x198] sm:$0xff] }
 0x2e6   : > { %10031 = vmatprep.mubr.msk.f32.mxu1 %vm331_vm0, %v14205_v19  ;;  %10087 = vmatprep.mubr.msk.f32.mxu0 %vm331_vm0, %v12335_v25  ;;  %v4307_v53 = vpop.f32.mrf.mxu1  ;;  %v4628_v51 = vpop.f32.mrf.mxu0  ;;  %v6672_v19 = vld [vmem:[#allocation2 + $0x199] sm:$0xff] }
 0x2e7   : > { %v12899_v61 = vadd.f32 %v4628_v51, %v4307_v53 }
 0x2e8   : > { %v9697_v8 = vpop.f32.mrf.mxu1  ;;  %v9753_v16 = vpop.f32.mrf.mxu0 }
 0x2e9   : > { %10032 = vmatmul.mubr.msk.f32.gmra.mxu1 %vm331_vm0, %v14206_v49  ;;  %10088 = vmatmul.mubr.msk.f32.gmra.mxu0 %vm331_vm0, %v12347_v22  ;;  %v12905_v6 = vadd.f32 %v9753_v16, %v9697_v8 }
 0x2ea   : > { %10034 = vmatprep.mubr.msk.f32.mxu1 %vm331_vm0, %v14207_v3  ;;  %10090 = vmatprep.mubr.msk.f32.mxu0 %vm331_vm0, %v12355_v12  ;;  %v4317_v25 = vpop.f32.mrf.mxu1  ;;  %v4638_v13 = vpop.f32.mrf.mxu0 }
 0x2eb   : > { %v12911_v33 = vadd.f32 %v4638_v13, %v4317_v25 }
 0x2ec   : > { %v9700_v21 = vpop.f32.mrf.mxu1  ;;  %v9756_v9 = vpop.f32.mrf.mxu0 }
 0x2ed   : > { %10035 = vmatmul.mubr.msk.f32.gmra.mxu1 %vm331_vm0, %v14208_v46  ;;  %10091 = vmatmul.mubr.msk.f32.gmra.mxu0 %vm331_vm0, %v12367_v42  ;;  %v12917_v22 = vadd.f32 %v9756_v9, %v9700_v21 }
 0x2ee   : > { %10037 = vmatprep.mubr.msk.f32.mxu1 %vm331_vm0, %v14209_v14  ;;  %10093 = vmatprep.mubr.msk.f32.mxu0 %vm331_vm0, %v12374_v54  ;;  %v4327_v12 = vpop.f32.mrf.mxu1  ;;  %v4648_v43 = vpop.f32.mrf.mxu0 }
 0x2ef   : > { %v12923_v10 = vadd.f32 %v4648_v43, %v4327_v12  ;;  %v7032_v12 = vld [vmem:[#allocation2 + $0x3a] sm:$0xff] }
 0x2f0   : > { %v9703_v36 = vpop.f32.mrf.mxu1  ;;  %v9759_v45 = vpop.f32.mrf.mxu0 }
 0x2f1   : > { %10038 = vmatmul.mubr.msk.f32.gmra.mxu1 %vm331_vm0, %v14210_v39  ;;  %10094 = vmatmul.mubr.msk.f32.gmra.mxu0 %vm331_vm0, %v6667_v38  ;;  %v12928_v42 = vadd.f32 %v9759_v45, %v9703_v36  ;;  %v7033_v36 = vld [vmem:[#allocation2 + $0x4a] sm:$0xff]  ;;  %v4539_v45 = vadd.f32 %v12805_v32, %v12803_v5  ;;  %v14212_v39 = vld [vmem:[#allocation36_spill] sm:$0xff] }
 0x2f2   : > { %10040 = vmatprep.mubr.msk.f32.mxu1 %vm331_vm0, %v14211_v41  ;;  %10096 = vmatprep.mubr.msk.f32.mxu0 %vm331_vm0, %v14201_v20  ;;  %v4337_v54 = vpop.f32.mrf.mxu1  ;;  %v4658_v26 = vpop.f32.mrf.mxu0 }
 0x2f3   : > { %v12934_v34 = vadd.f32 %v4658_v26, %v4337_v54 }
 0x2f4   : > { %v9706_v2 = vpop.f32.mrf.mxu1 }
 0x2f5   : > { %v9762_v56 = vpop.f32.mrf.mxu0  ;;  %10041 = vmatmul.mubr.msk.f32.gmra.mxu1 %vm331_vm0, %v6280_v59  ;;  %10097 = vmatmul.mubr.msk.f32.gmra.mxu0 %vm331_vm0, %v6669_v50 }
 0x2f6   : > { %v12938_v1 = vadd.f32 %v9762_v56, %v9706_v2  ;;  %10043 = vmatprep.mubr.msk.f32.mxu1 %vm331_vm0, %v12617_v0  ;;  %10099 = vmatprep.mubr.msk.f32.mxu0 %vm331_vm0, %v12778_v24  ;;  %v4347_v20 = vpop.f32.mrf.mxu1  ;;  %v6284_v0 = vld [vmem:[#allocation2 + $0x1a0] sm:$0xff]  ;;  %v7034_v2 = vld [vmem:[#allocation2 + $0x52] sm:$0xff] }
 0x2f7   : > { %v4668_v62 = vpop.f32.mrf.mxu0  ;;  %v6673_v24 = vld [vmem:[#allocation2 + $0x1a1] sm:$0xff] }
 0x2f8   : > { %v12944_v53 = vadd.f32 %v4668_v62, %v4347_v20  ;;  %v9709_v51 = vpop.f32.mrf.mxu1  ;;  %v7035_v62 = vld [vmem:[#allocation2 + $0x62] sm:$0xff] }
 0x2f9   : > { %v9765_v8 = vpop.f32.mrf.mxu0  ;;  %10044 = vmatmul.mubr.msk.f32.gmra.mxu1 %vm331_vm0, %v12625_v29  ;;  %10100 = vmatmul.mubr.msk.f32.gmra.mxu0 %vm331_vm0, %v12786_v37  ;;  %v7031_v29 = vld [vmem:[#allocation2 + $0x32] sm:$0xff] }
 0x2fa   : > { %v12950_v16 = vadd.f32 %v9765_v8, %v9709_v51  ;;  %10046 = vmatprep.mubr.msk.f32.mxu1 %vm331_vm0, %v6283_v28  ;;  %10102 = vmatprep.mubr.msk.f32.mxu0 %vm331_vm0, %v6672_v19  ;;  %v4357_v49 = vpop.f32.mrf.mxu1 }
 0x2fb   : > { %v4678_v3 = vpop.f32.mrf.mxu0 }
 0x2fc   : > { %v12954_v25 = vadd.f32 %v4678_v3, %v4357_v49  ;;  %v9712_v13 = vpop.f32.mrf.mxu1  ;;  %v7037_v3 = vld [vmem:[#allocation2 + $0x7a] sm:$0xff] }
 0x2fd   : > { %v9768_v21 = vpop.f32.mrf.mxu0  ;;  %10047 = vmatmul.mubr.msk.f32.gmra.mxu1 %vm331_vm0, %v6284_v0  ;;  %10103 = vmatmul.mubr.msk.f32.gmra.mxu0 %vm331_vm0, %v6673_v24  ;;  %v7036_v0 = vld [vmem:[#allocation2 + $0x6a] sm:$0xff] }
 0x2fe   : > { %v12958_v37 = vadd.f32 %v9768_v21, %v9712_v13  ;;  %10113 = vmatprep.mubr.msk.f32.mxu1 %vm331_vm0, %v7031_v29  ;;  %v4367_v9 = vpop.f32.mrf.mxu1  ;;  %10169 = vmatprep.mubr.msk.f32.mxu0 %vm10293_vm3, %v14197_v31 }
 0x2ff   : > { %v4688_v46 = vpop.f32.mrf.mxu0 }
 0x300   : > { %v12961_v14 = vadd.f32 %v4688_v46, %v4367_v9  ;;  %v9779_v43 = vpop.f32.mrf.mxu1 }
 0x301   : > { %v9835_v38 = vpop.f32.mrf.mxu0  ;;  %10114 = vmatmul.mubr.msk.f32.vlgmr.msra.gmra.mxu1 %vm331_vm0, %v7032_v12  ;;  %v5055_v41 = vadd.f32 %v9779_v43, %v14212_v39  ;;  %v7038_v12 = vld [vmem:[#allocation2 + $0x82] sm:$0xff] }
 0x302   : > { %10116 = vmatprep.mubr.msk.f32.mxu1 %vm331_vm0, %v7033_v36  ;;  %v4895_v54 = vpop.f32.mrf.mxu1 }
 0x303   : > { %v5284_v26 = vpop.f32.mrf.mxu0  ;;  %v12968_v59 = vadd.f32 %v9835_v38, %v5055_v41  ;;  %v5054_v50 = vadd.f32 %v4895_v54, %v4539_v45  ;;  %v7039_v38 = vld [vmem:[#allocation2 + $0x92] sm:$0xff] }
 0x305   : > { %v9782_v56 = vpop.f32.mrf.mxu1  ;;  %v9838_v20 = vpop.f32.mrf.mxu0  ;;  %10117 = vmatmul.mubr.msk.f32.gmra.mxu1 %vm331_vm0, %v7034_v2  ;;  %v12971_v28 = vadd.f32 %v5284_v26, %v5054_v50  ;;  %v7040_v26 = vld [vmem:[#allocation2 + $0x9a] sm:$0xff]  ;;  %v7041_v2 = vld [vmem:[#allocation2 + $0xaa] sm:$0xff] }
 0x306   : > { %v5057_v19 = vadd.f32 %v9782_v56, %v12813_v48  ;;  %10119 = vmatprep.mubr.msk.f32.mxu1 %vm331_vm0, %v7035_v62 }
 0x307   : > { %v4905_v5 = vpop.f32.mrf.mxu1  ;;  %v5294_v32 = vpop.f32.mrf.mxu0 }
 0x308   : > { %v12975_v51 = vadd.f32 %v9838_v20, %v5057_v19  ;;  %v5056_v8 = vadd.f32 %v4905_v5, %v12817_v57 }
 0x309   : > { %v9785_v24 = vpop.f32.mrf.mxu1  ;;  %v9841_v49 = vpop.f32.mrf.mxu0  ;;  %10120 = vmatmul.mubr.msk.f32.gmra.mxu1 %vm331_vm0, %v7036_v0  ;;  %v7043_v0 = vld [vmem:[#allocation2 + $0xc2] sm:$0xff] }
 0x30a   : > { %v12979_v13 = vadd.f32 %v5294_v32, %v5056_v8  ;;  %v5059_v21 = vadd.f32 %v9785_v24, %v12824_v4  ;;  %10122 = vmatprep.mubr.msk.f32.mxu1 %vm331_vm0, %v7037_v3  ;;  %v7042_v32 = vld [vmem:[#allocation2 + $0xb2] sm:$0xff] }
 0x30b   : > { %v4915_v48 = vpop.f32.mrf.mxu1  ;;  %v5304_v29 = vpop.f32.mrf.mxu0 }
 0x30c   : > { %v12983_v9 = vadd.f32 %v9841_v49, %v5059_v21  ;;  %v5058_v46 = vadd.f32 %v4915_v48, %v12828_v27 }
 0x30d   : > { %v9788_v57 = vpop.f32.mrf.mxu1  ;;  %v9844_v43 = vpop.f32.mrf.mxu0  ;;  %10123 = vmatmul.mubr.msk.f32.gmra.mxu1 %vm331_vm0, %v7038_v12  ;;  %v7045_v12 = vld [vmem:[#allocation2 + $0xda] sm:$0xff] }
 0x30e   : > { %v12987_v36 = vadd.f32 %v5304_v29, %v5058_v46  ;;  %v5061_v45 = vadd.f32 %v9788_v57, %v12832_v58  ;;  %10125 = vmatprep.mubr.msk.f32.mxu1 %vm331_vm0, %v7039_v38  ;;  %v7044_v29 = vld [vmem:[#allocation2 + $0xca] sm:$0xff] }
 0x30f   : > { %v4925_v4 = vpop.f32.mrf.mxu1  ;;  %v5314_v39 = vpop.f32.mrf.mxu0 }
 0x310   : > { %v12991_v41 = vadd.f32 %v9844_v43, %v5061_v45  ;;  %v5060_v54 = vadd.f32 %v4925_v4, %v12837_v18 }
 0x311   : > { %v9791_v27 = vpop.f32.mrf.mxu1  ;;  %v9847_v50 = vpop.f32.mrf.mxu0  ;;  %10126 = vmatmul.mubr.msk.f32.gmra.mxu1 %vm331_vm0, %v7040_v26  ;;  %v7047_v26 = vld [vmem:[#allocation2 + $0xf2] sm:$0xff] }
 0x312   : > { %v12995_v56 = vadd.f32 %v5314_v39, %v5060_v54  ;;  %v5063_v20 = vadd.f32 %v9791_v27, %v12841_v17  ;;  %10128 = vmatprep.mubr.msk.f32.mxu1 %vm331_vm0, %v7041_v2  ;;  %v7046_v39 = vld [vmem:[#allocation2 + $0xe2] sm:$0xff] }
 0x313   : > { %v4935_v58 = vpop.f32.mrf.mxu1  ;;  %v5324_v62 = vpop.f32.mrf.mxu0 }
 0x314   : > { %v12999_v19 = vadd.f32 %v9847_v50, %v5063_v20  ;;  %v5062_v5 = vadd.f32 %v4935_v58, %v12845_v52 }
 0x315   : > { %v9794_v18 = vpop.f32.mrf.mxu1  ;;  %v9850_v8 = vpop.f32.mrf.mxu0  ;;  %10129 = vmatmul.mubr.msk.f32.gmra.mxu1 %vm331_vm0, %v7042_v32  ;;  %v7049_v32 = vld [vmem:[#allocation2 + $0x10a] sm:$0xff] }
 0x316   : > { %v13003_v24 = vadd.f32 %v5324_v62, %v5062_v5  ;;  %v5065_v49 = vadd.f32 %v9794_v18, %v12849_v40  ;;  %10131 = vmatprep.mubr.msk.f32.mxu1 %vm331_vm0, %v7043_v0  ;;  %v7048_v62 = vld [vmem:[#allocation2 + $0xfa] sm:$0xff]  ;;  %v4619_v18 = vadd.f32 %v12887_v7, %v12885_v11 }
 0x317   : > { %v4945_v17 = vpop.f32.mrf.mxu1  ;;  %v5334_v3 = vpop.f32.mrf.mxu0 }
 0x318   : > { %v13007_v21 = vadd.f32 %v9850_v8, %v5065_v49  ;;  %v5064_v48 = vadd.f32 %v4945_v17, %v12853_v35 }
 0x319   : > { %v9797_v52 = vpop.f32.mrf.mxu1  ;;  %v9853_v46 = vpop.f32.mrf.mxu0  ;;  %10132 = vmatmul.mubr.msk.f32.gmra.mxu1 %vm331_vm0, %v7044_v29 }
 0x31a   : > { %v13011_v57 = vadd.f32 %v5334_v3, %v5064_v48  ;;  %v5067_v43 = vadd.f32 %v9797_v52, %v12857_v23  ;;  %10134 = vmatprep.mubr.msk.f32.mxu1 %vm331_vm0, %v7045_v12  ;;  %v7050_v3 = vld [vmem:[#allocation2 + $0x112] sm:$0xff]  ;;  %v7051_v52 = vld [vmem:[#allocation2 + $0x122] sm:$0xff] }
 0x31b   : > { %v4955_v40 = vpop.f32.mrf.mxu1  ;;  %v5344_v38 = vpop.f32.mrf.mxu0 }
 0x31c   : > { %v13015_v45 = vadd.f32 %v9853_v46, %v5067_v43  ;;  %v5066_v4 = vadd.f32 %v4955_v40, %v12862_v60  ;;  %v7052_v40 = vld [vmem:[#allocation2 + $0x12a] sm:$0xff] }
 0x31d   : > { %v9800_v35 = vpop.f32.mrf.mxu1  ;;  %v9856_v54 = vpop.f32.mrf.mxu0  ;;  %10135 = vmatmul.mubr.msk.f32.gmra.mxu1 %vm331_vm0, %v7046_v39  ;;  %v7053_v39 = vld [vmem:[#allocation2 + $0x13a] sm:$0xff] }
 0x31e   : > { %v13019_v27 = vadd.f32 %v5344_v38, %v5066_v4  ;;  %v5069_v50 = vadd.f32 %v9800_v35, %v12867_v44  ;;  %10137 = vmatprep.mubr.msk.f32.mxu1 %vm331_vm0, %v7047_v26 }
 0x31f   : > { %v4965_v23 = vpop.f32.mrf.mxu1  ;;  %v5354_v2 = vpop.f32.mrf.mxu0 }
 0x320   : > { %v13023_v20 = vadd.f32 %v9856_v54, %v5069_v50  ;;  %v5068_v58 = vadd.f32 %v4965_v23, %v12873_v30 }
 0x321   : > { %v9803_v60 = vpop.f32.mrf.mxu1  ;;  %v9859_v5 = vpop.f32.mrf.mxu0  ;;  %10138 = vmatmul.mubr.msk.f32.gmra.mxu1 %vm331_vm0, %v7048_v62  ;;  %v7055_v62 = vld [vmem:[#allocation2 + $0x152] sm:$0xff] }
 0x322   : > { %v13029_v8 = vadd.f32 %v5354_v2, %v5068_v58  ;;  %v5071_v44 = vadd.f32 %v9803_v60, %v12879_v47  ;;  %10140 = vmatprep.mubr.msk.f32.mxu1 %vm331_vm0, %v7049_v32  ;;  %v7054_v2 = vld [vmem:[#allocation2 + $0x142] sm:$0xff] }
 0x323   : > { %v4975_v0 = vpop.f32.mrf.mxu1  ;;  %v5364_v49 = vpop.f32.mrf.mxu0 }
 0x324   : > { %v13033_v17 = vadd.f32 %v9859_v5, %v5071_v44  ;;  %v5070_v30 = vadd.f32 %v4975_v0, %v4619_v18  ;;  %v7056_v0 = vld [vmem:[#allocation2 + $0x15a] sm:$0xff] }
 0x325   : > { %v9806_v48 = vpop.f32.mrf.mxu1  ;;  %v9862_v29 = vpop.f32.mrf.mxu0  ;;  %10141 = vmatmul.mubr.msk.f32.gmra.mxu1 %vm331_vm0, %v7050_v3 }
 0x326   : > { %v13036_v46 = vadd.f32 %v5364_v49, %v5070_v30  ;;  %v5073_v11 = vadd.f32 %v9806_v48, %v12893_v15  ;;  %10143 = vmatprep.mubr.msk.f32.mxu1 %vm331_vm0, %v7051_v52  ;;  %v7057_v30 = vld [vmem:[#allocation2 + $0x16a] sm:$0xff] }
 0x327   : > { %v4985_v47 = vpop.f32.mrf.mxu1  ;;  %v5374_v7 = vpop.f32.mrf.mxu0 }
 0x328   : > { %v13040_v12 = vadd.f32 %v9862_v29, %v5073_v11  ;;  %v5072_v43 = vadd.f32 %v4985_v47, %v12899_v61  ;;  %v7058_v47 = vld [vmem:[#allocation2 + $0x172] sm:$0xff] }
 0x329   : > { %v9809_v38 = vpop.f32.mrf.mxu1  ;;  %v9865_v4 = vpop.f32.mrf.mxu0  ;;  %10144 = vmatmul.mubr.msk.f32.gmra.mxu1 %vm331_vm0, %v7052_v40 }
 0x32a   : > { %v13044_v35 = vadd.f32 %v5374_v7, %v5072_v43  ;;  %v5075_v54 = vadd.f32 %v9809_v38, %v12905_v6  ;;  %10146 = vmatprep.mubr.msk.f32.mxu1 %vm331_vm0, %v7053_v39 }
 0x32b   : > { %v4995_v15 = vpop.f32.mrf.mxu1  ;;  %v5384_v26 = vpop.f32.mrf.mxu0 }
 0x32c   : > { %v13048_v50 = vadd.f32 %v9865_v4, %v5075_v54  ;;  %v5074_v23 = vadd.f32 %v4995_v15, %v12911_v33  ;;  %v7061_v4 = vld [vmem:[#allocation2 + $0x19a] sm:$0xff] }
 0x32d   : > { %v9812_v61 = vpop.f32.mrf.mxu1  ;;  %v9868_v58 = vpop.f32.mrf.mxu0  ;;  %10147 = vmatmul.mubr.msk.f32.gmra.mxu1 %vm331_vm0, %v7054_v2 }
 0x32e   : > { %v13052_v60 = vadd.f32 %v5384_v26, %v5074_v23  ;;  %v5077_v5 = vadd.f32 %v9812_v61, %v12917_v22  ;;  %10149 = vmatprep.mubr.msk.f32.mxu1 %vm331_vm0, %v7055_v62 }
 0x32f   : > { %v5005_v6 = vpop.f32.mrf.mxu1  ;;  %v5394_v32 = vpop.f32.mrf.mxu0 }
 0x330   : > { %v13056_v18 = vadd.f32 %v9868_v58, %v5077_v5  ;;  %v5076_v44 = vadd.f32 %v5005_v6, %v12923_v10 }
 0x331   : > { %v9815_v33 = vpop.f32.mrf.mxu1  ;;  %v9871_v49 = vpop.f32.mrf.mxu0  ;;  %10150 = vmatmul.mubr.msk.f32.gmra.mxu1 %vm331_vm0, %v7056_v0 }
 0x332   : > { %v13060_v3 = vadd.f32 %v5394_v32, %v5076_v44  ;;  %v5079_v48 = vadd.f32 %v9815_v33, %v12928_v42  ;;  %10152 = vmatprep.mubr.msk.f32.mxu1 %vm331_vm0, %v7057_v30 }
 0x333   : > { %v5015_v22 = vpop.f32.mrf.mxu1  ;;  %v5404_v29 = vpop.f32.mrf.mxu0 }
 0x334   : > { %v13064_v52 = vadd.f32 %v9871_v49, %v5079_v48  ;;  %v5078_v11 = vadd.f32 %v5015_v22, %v12934_v34 }
 0x335   : > { %v9818_v10 = vpop.f32.mrf.mxu1  ;;  %v9874_v7 = vpop.f32.mrf.mxu0  ;;  %10153 = vmatmul.mubr.msk.f32.gmra.mxu1 %vm331_vm0, %v7058_v47 }
 0x336   : > { %v13068_v43 = vadd.f32 %v5404_v29, %v5078_v11  ;;  %v5081_v40 = vadd.f32 %v9818_v10, %v12938_v1  ;;  %10155 = vmatprep.mubr.msk.f32.mxu1 %vm331_vm0, %v12780_v63  ;;  %v7062_v1 = vld [vmem:[#allocation2 + $0x1a2] sm:$0xff] }
 0x337   : > { %v5025_v42 = vpop.f32.mrf.mxu1  ;;  %v5414_v38 = vpop.f32.mrf.mxu0 }
 0x338   : > { %v13073_v39 = vadd.f32 %v9874_v7, %v5081_v40  ;;  %v5080_v54 = vadd.f32 %v5025_v42, %v12944_v53 }
 0x339   : > { %v9821_v34 = vpop.f32.mrf.mxu1  ;;  %v9877_v15 = vpop.f32.mrf.mxu0  ;;  %10156 = vmatmul.mubr.msk.f32.gmra.mxu1 %vm331_vm0, %v12788_v55 }
 0x33a   : > { %v13078_v26 = vadd.f32 %v5414_v38, %v5080_v54  ;;  %v5083_v23 = vadd.f32 %v9821_v34, %v12950_v16  ;;  %10158 = vmatprep.mubr.msk.f32.mxu1 %vm331_vm0, %v7061_v4 }
 0x33b   : > { %v5035_v63 = vpop.f32.mrf.mxu1  ;;  %v5424_v2 = vpop.f32.mrf.mxu0 }
 0x33c   : > { %v13082_v61 = vadd.f32 %v9877_v15, %v5083_v23  ;;  %v5082_v58 = vadd.f32 %v5035_v63, %v12954_v25 }
 0x33d   : > { %v9824_v62 = vpop.f32.mrf.mxu1  ;;  %v9880_v53 = vpop.f32.mrf.mxu0  ;;  %10159 = vmatmul.mubr.msk.f32.gmra.mxu1 %vm331_vm0, %v7062_v1 }
 0x33e   : > { %v13086_v5 = vadd.f32 %v5424_v2, %v5082_v58  ;;  %v5085_v55 = vadd.f32 %v9824_v62, %v12958_v37  ;;  %10180 = vmatprep.mubr.msk.f32.mxu1 %vm10293_vm3, %v14197_v31 }
 0x33f   : > { %v5045_v6 = vpop.f32.mrf.mxu1  ;;  %v5434_v32 = vpop.f32.mrf.mxu0 }
 0x340   : > { %v13089_v16 = vadd.f32 %v9880_v53, %v5085_v55  ;;  %v5084_v44 = vadd.f32 %v5045_v6, %v12961_v14 }
 0x341   : > { %v9891_v0 = vpop.f32.mrf.mxu1  ;;  %v9947_v33 = vpop.f32.mrf.mxu0 }
 0x342   : > { %v13092_v49 = vadd.f32 %v5434_v32, %v5084_v44  ;;  %v5833_v25 = vadd.f32 %v9891_v0, %v12968_v59 }
 0x343   : > { %v5673_v30 = vpop.f32.mrf.mxu1  ;;  %v13095_v48 = vpop.f32.mrf.mxu0 }
 0x344   : > { %v13097_v22 = vadd.f32 %v9947_v33, %v5833_v25  ;;  %v13100_v29 = vadd.f32 %v5673_v30, %v12971_v28 }
 0x345   : > { %v9894_v37 = vpop.f32.mrf.mxu1  ;;  %v9950_v11 = vpop.f32.mrf.mxu0 }
 0x346   : > { %v5835_v47 = vadd.f32 %v9894_v37, %v12975_v51 }
 0x347   : > { %v5683_v10 = vpop.f32.mrf.mxu1  ;;  %v13103_v14 = vpop.f32.mrf.mxu0 }
 0x348   : > { %v13105_v7 = vadd.f32 %v9950_v11, %v5835_v47  ;;  %v13108_v40 = vadd.f32 %v5683_v10, %v12979_v13 }
 0x349   : > { %v9897_v59 = vpop.f32.mrf.mxu1  ;;  %v9953_v42 = vpop.f32.mrf.mxu0 }
 0x34a   : > { %v5837_v38 = vadd.f32 %v9897_v59, %v12983_v9 }
 0x34b   : > { %v5693_v4 = vpop.f32.mrf.mxu1  ;;  %v13111_v54 = vpop.f32.mrf.mxu0 }
 0x34c   : > { %v13113_v28 = vadd.f32 %v9953_v42, %v5837_v38  ;;  %v13116_v34 = vadd.f32 %v5693_v4, %v12987_v36  ;;  %v7532_v42 = vld [vmem:[%s13899_s5 + $0x18] sm:$0xff] }
 0x34d   : > { %v9900_v51 = vpop.f32.mrf.mxu1  ;;  %v9956_v15 = vpop.f32.mrf.mxu0  ;;  %10162 = vmatpush3.msra.mxu0 %v7532_v42  ;;  %v7531_v42 = vld [vmem:[%s13899_s5 + $0x10] sm:$0xff] }
 0x34e   : > { %v5839_v23 = vadd.f32 %v9900_v51, %v12991_v41  ;;  %10163 = vmatprep.subr.mxu0 %v14197_v31 }
 0x34f   : > { %v5703_v1 = vpop.f32.mrf.mxu1  ;;  %v13119_v63 = vpop.f32.mrf.mxu0  ;;  %10164 = vmatpush3.msra.mxu0 %v7531_v42 }
 0x350   : > { %v13121_v13 = vadd.f32 %v9956_v15, %v5839_v23  ;;  %v13124_v2 = vadd.f32 %v5703_v1, %v12995_v56  ;;  %10165 = vmatprep.subr.mxu0 %v14197_v31 }
 0x351   : > { %v9903_v9 = vpop.f32.mrf.mxu1  ;;  %v9959_v58 = vpop.f32.mrf.mxu0 }
 0x352   : > { %v5841_v62 = vadd.f32 %v9903_v9, %v12999_v19 }
 0x353   : > { %v5713_v53 = vpop.f32.mrf.mxu1  ;;  %v13127_v55 = vpop.f32.mrf.mxu0 }
 0x354   : > { %v13129_v36 = vadd.f32 %v9959_v58, %v5841_v62  ;;  %v13132_v6 = vadd.f32 %v5713_v53, %v13003_v24 }
 0x355   : > { %v9906_v41 = vpop.f32.mrf.mxu1  ;;  %v9962_v32 = vpop.f32.mrf.mxu0 }
 0x356   : > { %v5843_v44 = vadd.f32 %v9906_v41, %v13007_v21 }
 0x357   : > { %v5723_v0 = vpop.f32.mrf.mxu1  ;;  %v13135_v33 = vpop.f32.mrf.mxu0 }
 0x358   : > { %v13137_v56 = vadd.f32 %v9962_v32, %v5843_v44  ;;  %v13140_v25 = vadd.f32 %v5723_v0, %v13011_v57 }
 0x359   : > { %v9909_v19 = vpop.f32.mrf.mxu1  ;;  %v9965_v30 = vpop.f32.mrf.mxu0 }
 0x35a   : > { %v5845_v37 = vadd.f32 %v9909_v19, %v13015_v45 }
 0x35b   : > { %v5733_v11 = vpop.f32.mrf.mxu1  ;;  %v13143_v47 = vpop.f32.mrf.mxu0 }
 0x35c   : > { %v13145_v24 = vadd.f32 %v9965_v30, %v5845_v37  ;;  %v13148_v10 = vadd.f32 %v5733_v11, %v13019_v27 }
 0x35d   : > { %v9912_v21 = vpop.f32.mrf.mxu1  ;;  %v9968_v59 = vpop.f32.mrf.mxu0 }
 0x35e   : > { %v5847_v57 = vadd.f32 %v9912_v21, %v13023_v20 }
 0x35f   : > { %v5743_v38 = vpop.f32.mrf.mxu1  ;;  %v13154_v4 = vpop.f32.mrf.mxu0 }
 0x360   : > { %v13157_v45 = vadd.f32 %v9968_v59, %v5847_v57  ;;  %v13160_v51 = vadd.f32 %v5743_v38, %v13029_v8 }
 0x361   : > { %v9915_v27 = vpop.f32.mrf.mxu1  ;;  %v9971_v15 = vpop.f32.mrf.mxu0 }
 0x362   : > { %v5849_v23 = vadd.f32 %v9915_v27, %v13033_v17 }
 0x363   : > { %v5753_v1 = vpop.f32.mrf.mxu1  ;;  %v13163_v9 = vpop.f32.mrf.mxu0 }
 0x364   : > { %v13165_v58 = vadd.f32 %v9971_v15, %v5849_v23  ;;  %v13168_v20 = vadd.f32 %v5753_v1, %v13036_v46 }
 0x365   : > { %v9918_v62 = vpop.f32.mrf.mxu1  ;;  %v9974_v53 = vpop.f32.mrf.mxu0 }
 0x366   : > { %v5851_v41 = vadd.f32 %v9918_v62, %v13040_v12 }
 0x367   : > { %v5763_v32 = vpop.f32.mrf.mxu1  ;;  %v13171_v44 = vpop.f32.mrf.mxu0 }
 0x368   : > { %14213 = vst [vmem:[#allocation39_spill] sm:$0xff] %v13171_v44  ;;  %v13173_v8 = vadd.f32 %v9974_v53, %v5851_v41  ;;  %v13176_v0 = vadd.f32 %v5763_v32, %v13044_v35 }
 0x369   : > { %v9921_v17 = vpop.f32.mrf.mxu1  ;;  %v9977_v19 = vpop.f32.mrf.mxu0 }
 0x36a   : > { %v5853_v30 = vadd.f32 %v9921_v17, %v13048_v50 }
 0x36b   : > { %v5773_v37 = vpop.f32.mrf.mxu1  ;;  %v13179_v11 = vpop.f32.mrf.mxu0 }
 0x36c   : > { %14214 = vst [vmem:[#allocation87_spill] sm:$0xff] %v13179_v11  ;;  %v13181_v46 = vadd.f32 %v9977_v19, %v5853_v30  ;;  %v13184_v21 = vadd.f32 %v5773_v37, %v13052_v60 }
 0x36d   : > { %v9924_v12 = vpop.f32.mrf.mxu1  ;;  %v9980_v59 = vpop.f32.mrf.mxu0 }
 0x36e   : > { %14215 = vst [vmem:[#allocation80_spill] sm:$0xff] %v13184_v21  ;;  %v5855_v35 = vadd.f32 %v9924_v12, %v13056_v18 }
 0x36f   : > { %v5783_v57 = vpop.f32.mrf.mxu1  ;;  %v13190_v38 = vpop.f32.mrf.mxu0 }
 0x370   : > { %14216 = vst [vmem:[#allocation8_spill] sm:$0xff] %v13190_v38  ;;  %v13193_v50 = vadd.f32 %v9980_v59, %v5855_v35  ;;  %v13196_v27 = vadd.f32 %v5783_v57, %v13060_v3 }
 0x371   : > { %v9927_v60 = vpop.f32.mrf.mxu1  ;;  %v9983_v15 = vpop.f32.mrf.mxu0 }
 0x372   : > { %14217 = vst [vmem:[#allocation9_spill] sm:$0xff] %v13196_v27  ;;  %v5857_v23 = vadd.f32 %v9927_v60, %v13064_v52 }
 0x373   : > { %v5793_v1 = vpop.f32.mrf.mxu1  ;;  %v13199_v62 = vpop.f32.mrf.mxu0 }
 0x374   : > { %14218 = vst [vmem:[#allocation13_spill] sm:$0xff] %v13199_v62  ;;  %v13201_v53 = vadd.f32 %v9983_v15, %v5857_v23  ;;  %v13204_v18 = vadd.f32 %v5793_v1, %v13068_v43  ;;  %v7530_v15 = vld [vmem:[%s13899_s5 + $0x8] sm:$0xff] }
 0x375   : > { %v9930_v41 = vpop.f32.mrf.mxu1  ;;  %v9986_v32 = vpop.f32.mrf.mxu0  ;;  %10166 = vmatpush3.msra.mxu0 %v7530_v15 }
 0x376   : > { %14219 = vst [vmem:[#allocation12_spill] sm:$0xff] %v13204_v18  ;;  %v5859_v17 = vadd.f32 %v9930_v41, %v13073_v39  ;;  %10167 = vmatprep.subr.mxu0 %v14197_v31 }
 0x377   : > { %v5803_v19 = vpop.f32.mrf.mxu1  ;;  %v13207_v30 = vpop.f32.mrf.mxu0 }
 0x378   : > { %14220 = vst [vmem:[#allocation38_spill] sm:$0xff] %v13207_v30  ;;  %v13209_v3 = vadd.f32 %v9986_v32, %v5859_v17  ;;  %v13212_v37 = vadd.f32 %v5803_v19, %v13078_v26  ;;  %v7608_v30 = vld [vmem:[%s13901_s7] sm:$0xff] }
 0x379   : > { %v9933_v52 = vpop.f32.mrf.mxu1  ;;  %v9989_v12 = vpop.f32.mrf.mxu0 }
 0x37a   : > { %14221 = vst [vmem:[#allocation37_spill] sm:$0xff] %v13212_v37  ;;  %v5861_v59 = vadd.f32 %v9933_v52, %v13082_v61 }
 0x37b   : > { %v5813_v42 = vpop.f32.mrf.mxu1  ;;  %v13215_v35 = vpop.f32.mrf.mxu0 }
 0x37c   : > { %14222 = vst [vmem:[#allocation90_spill] sm:$0xff] %v13215_v35  ;;  %v13217_v43 = vadd.f32 %v9989_v12, %v5861_v59  ;;  %v13220_v57 = vadd.f32 %v5813_v42, %v13086_v5 }
 0x37d   : > { %v9936_v39 = vpop.f32.mrf.mxu1  ;;  %v9992_v60 = vpop.f32.mrf.mxu0 }
 0x37e   : > { %14223 = vst [vmem:[#allocation82_spill] sm:$0xff] %v13220_v57  ;;  %v5863_v26 = vadd.f32 %v9936_v39, %v13089_v16 }
 0x37f   : > { %v5823_v23 = vpop.f32.mrf.mxu1  ;;  %v13226_v1 = vpop.f32.mrf.mxu0 }
 0x380   : > { %14224 = vst [vmem:[#allocation40_spill] sm:$0xff] %v13226_v1  ;;  %v13229_v61 = vadd.f32 %v9992_v60, %v5863_v26  ;;  %v13232_v41 = vadd.f32 %v5823_v23, %v13092_v49 }
 0x381   : > { %v10003_v5 = vpop.f32.mrf.mxu1  ;;  %v13234_v32 = vpop.f32.mrf.mxu0 }
 0x382   : > { %14225 = vst [vmem:[#allocation43_spill] sm:$0xff] %v13232_v41  ;;  %v13237_v17 = vadd.f32 %v10003_v5, %v13097_v22  ;;  %v7529_v41 = vld [vmem:[%s13899_s5] sm:$0xff] }
 0x383   : > { %v13239_v19 = vpop.f32.mrf.mxu1  ;;  %v13241_v16 = vpop.f32.mrf.mxu0  ;;  %10168 = vmatpush3.msra.mxu0 %v7529_v41  ;;  %v7609_v41 = vld [vmem:[%s13901_s7 + $0x8] sm:$0xff] }
 0x385   : > { %v10006_v52 = vpop.f32.mrf.mxu1  ;;  %v13248_v42 = vpop.f32.mrf.mxu0 }
 0x386   : > { %v13244_v12 = vadd.f32 %v10006_v52, %v13105_v7 }
 0x387   : > { %v13246_v59 = vpop.f32.mrf.mxu1  ;;  %v13255_v22 = vpop.f32.mrf.mxu0 }
 0x389   : > { %v10009_v49 = vpop.f32.mrf.mxu1  ;;  %v13262_v7 = vpop.f32.mrf.mxu0 }
 0x38a   : > { %v13251_v39 = vadd.f32 %v10009_v49, %v13113_v28 }
 0x38b   : > { %v13253_v60 = vpop.f32.mrf.mxu1  ;;  %v13269_v28 = vpop.f32.mrf.mxu0 }
 0x38d   : > { %v10012_v15 = vpop.f32.mrf.mxu1  ;;  %v13287_v35 = vpop.f32.mrf.mxu0 }
 0x38e   : > { %v13258_v26 = vadd.f32 %v10012_v15, %v13121_v13 }
 0x38f   : > { %v13260_v23 = vpop.f32.mrf.mxu1 }
 0x391   : > { %v10015_v5 = vpop.f32.mrf.mxu1 }
 0x392   : > { %v13265_v52 = vadd.f32 %v10015_v5, %v13129_v36  ;;  %v7611_v36 = vld [vmem:[%s13901_s7 + $0x18] sm:$0xff]  ;;  %v7610_v5 = vld [vmem:[%s13901_s7 + $0x10] sm:$0xff] }
 0x393   : > { %v13267_v1 = vpop.f32.mrf.mxu1  ;;  %10173 = vmatpush3.msra.mxu1 %v7611_v36  ;;  %v13302_v36 = vpop.f32.mrf.mxu0 }
 0x394   : > { %10174 = vmatprep.subr.mxu1 %v14197_v31 }
 0x395   : > { %v10018_v49 = vpop.f32.mrf.mxu1  ;;  %10175 = vmatpush3.msra.mxu1 %v7610_v5  ;;  %v13310_v5 = vpop.f32.mrf.mxu0 }
 0x396   : > { %v13275_v13 = vadd.f32 %v10018_v49, %v13137_v56  ;;  %10176 = vmatprep.subr.mxu1 %v14197_v31 }
 0x397   : > { %v13278_v15 = vpop.f32.mrf.mxu1  ;;  %10177 = vmatpush3.msra.mxu1 %v7609_v41  ;;  %v13317_v27 = vpop.f32.mrf.mxu0 }
 0x398   : > { %10178 = vmatprep.subr.mxu1 %v14197_v31 }
 0x399   : > { %v10021_v56 = vpop.f32.mrf.mxu1  ;;  %10179 = vmatpush3.msra.mxu1 %v7608_v30 }
 0x39a   : > { %v13294_v49 = vadd.f32 %v10021_v56, %v13145_v24 }
 0x39b   : > { %v13296_v57 = vpop.f32.mrf.mxu1 }
 0x39d   : > { %v10024_v37 = vpop.f32.mrf.mxu1 }
 0x39e   : > { %v13306_v62 = vadd.f32 %v10024_v37, %v13157_v45  ;;  %v13324_v45 = vpop.f32.mrf.mxu0 }
 0x39f   : > { %v13308_v24 = vpop.f32.mrf.mxu1 }
 0x3a1   : > { %v10027_v56 = vpop.f32.mrf.mxu1 }
 0x3a2   : > { %v13313_v18 = vadd.f32 %v10027_v56, %v13165_v58  ;;  %v13331_v58 = vpop.f32.mrf.mxu0 }
 0x3a3   : > { %v13315_v38 = vpop.f32.mrf.mxu1 }
 0x3a4   : > { %14226 = vst [vmem:[#allocation83_spill] sm:$0xff] %v13313_v18 }
 0x3a5   : > { %v10030_v41 = vpop.f32.mrf.mxu1 }
 0x3a6   : > { %v13320_v11 = vadd.f32 %v10030_v41, %v13173_v8  ;;  %v13338_v8 = vpop.f32.mrf.mxu0 }
 0x3a7   : > { %v13322_v31 = vpop.f32.mrf.mxu1 }
 0x3a8   : > { %14227 = vst [vmem:[#allocation93_spill] sm:$0xff] %v13320_v11  ;;  %14228 = vst [vmem:[#allocation15_spill] sm:$0xff] %v13322_v31 }
 0x3a9   : > { %v10033_v30 = vpop.f32.mrf.mxu1 }
 0x3aa   : > { %v13327_v37 = vadd.f32 %v10033_v30, %v13181_v46  ;;  %v13345_v46 = vpop.f32.mrf.mxu0 }
 0x3ab   : > { %v13329_v21 = vpop.f32.mrf.mxu1 }
 0x3ac   : > { %14229 = vst [vmem:[#allocation14_spill] sm:$0xff] %v13327_v37  ;;  %14230 = vst [vmem:[#allocation16_spill] sm:$0xff] %v13329_v21 }
 0x3ad   : > { %v10036_v56 = vpop.f32.mrf.mxu1 }
 0x3ae   : > { %v13334_v18 = vadd.f32 %v10036_v56, %v13193_v50  ;;  %v13352_v50 = vpop.f32.mrf.mxu0 }
 0x3af   : > { %v13336_v44 = vpop.f32.mrf.mxu1 }
 0x3b0   : > { %14231 = vst [vmem:[#allocation42_spill] sm:$0xff] %v13334_v18  ;;  %14232 = vst [vmem:[#allocation41_spill] sm:$0xff] %v13336_v44 }
 0x3b1   : > { %v10039_v41 = vpop.f32.mrf.mxu1 }
 0x3b2   : > { %v13341_v11 = vadd.f32 %v10039_v41, %v13201_v53  ;;  %v6221_v53 = vadd.f32 %v13095_v48, %v13100_v29  ;;  %v13361_v41 = vpop.f32.mrf.mxu0 }
 0x3b3   : > { %v13343_v31 = vpop.f32.mrf.mxu1 }
 0x3b4   : > { %14233 = vst [vmem:[#allocation85_spill] sm:$0xff] %v13341_v11  ;;  %14234 = vst [vmem:[#allocation44_spill] sm:$0xff] %v13343_v31  ;;  %v6610_v31 = vadd.f32 %v13239_v19, %v6221_v53 }
 0x3b5   : > { %v10042_v30 = vpop.f32.mrf.mxu1 }
 0x3b6   : > { %v13348_v37 = vadd.f32 %v10042_v30, %v13209_v3  ;;  %v6999_v48 = vadd.f32 %v13241_v16, %v6610_v31  ;;  %v6227_v31 = vadd.f32 %v13119_v63, %v13124_v2 }
 0x3b7   : > { %v13350_v21 = vpop.f32.mrf.mxu1 }
 0x3b8   : > { %14235 = vst [vmem:[#allocation47_spill] sm:$0xff] %v13348_v37  ;;  %v6223_v37 = vadd.f32 %v13103_v14, %v13108_v40  ;;  %v7002_v40 = vadd.f32 %v13248_v42, %v13244_v12  ;;  %v7004_v12 = vadd.f32 %v13262_v7, %v13251_v39  ;;  %v6616_v53 = vadd.f32 %v13260_v23, %v6227_v31 }
 0x3b9   : > { %v10045_v56 = vpop.f32.mrf.mxu1  ;;  %v6229_v7 = vadd.f32 %v13127_v55, %v13132_v6 }
 0x3ba   : > { %v13355_v18 = vadd.f32 %v10045_v56, %v13217_v43  ;;  %v7000_v43 = vadd.f32 %v13234_v32, %v13237_v17  ;;  %v13373_v56 = vpop.f32.mrf.mxu0  ;;  %v6612_v29 = vadd.f32 %v13246_v59, %v6223_v37 }
 0x3bb   : > { %v13357_v44 = vpop.f32.mrf.mxu1 }
 0x3bc   : > { %14236 = vst [vmem:[#allocation98_spill] sm:$0xff] %v13355_v18  ;;  %14237 = vst [vmem:[#allocation86_spill] sm:$0xff] %v13357_v44  ;;  %v13386_v32 = vpop.f32.mrf.mxu0 }
 0x3bd   : > { %v10048_v11 = vpop.f32.mrf.mxu1 }
 0x3be   : > { %v13365_v3 = vadd.f32 %v10048_v11, %v13229_v61  ;;  %v6225_v11 = vadd.f32 %v13111_v54, %v13116_v34  ;;  %v13382_v61 = vld [vmem:[%s13898_s4] ss:$0 sm:$0xff]  ;;  %v13400_v42 = vpop.f32.mrf.mxu0 }
 0x3bf   : > { %v13367_v30 = vpop.f32.mrf.mxu1 }
 0x3c0   : > { %v6614_v19 = vadd.f32 %v13253_v60, %v6225_v11  ;;  %v13418_v23 = vpop.f32.mrf.mxu0 }
 0x3c1   : > { %v10115_v18 = vpop.f32.mrf.mxu1 }
 0x3c2   : > { %v7389_v44 = vadd.f32 %v10115_v18, %v7000_v43  ;;  %v7001_v18 = vadd.f32 %v13255_v22, %v6612_v29 }
 0x3c3   : > { %v7229_v14 = vpop.f32.mrf.mxu1 }
 0x3c4   : > { %v7388_v17 = vadd.f32 %v7229_v14, %v6999_v48  ;;  %v13391_v59 = vadd.f32 %v13382_v61, %v7389_v44  ;;  %v7003_v44 = vadd.f32 %v13269_v28, %v6614_v19  ;;  %v7006_v28 = vadd.f32 %v13287_v35, %v13258_v26 }
 0x3c5   : > { %v10118_v16 = vpop.f32.mrf.mxu1  ;;  %v6618_v19 = vadd.f32 %v13267_v1, %v6229_v7  ;;  %v7008_v1 = vadd.f32 %v13310_v5, %v13265_v52 }
 0x3c6   : > { %v13394_v54 = vadd.f32 %v13382_v61, %v7388_v17  ;;  %v7391_v34 = vadd.f32 %v10118_v16, %v7002_v40  ;;  %v7460_v48 = vsel %vm331_vm0, %v13391_v59, 0.0  ;;  %v7005_v17 = vadd.f32 %v13302_v36, %v6616_v53  ;;  %v13436_v36 = vpop.f32.mrf.mxu0 }
 0x3c7   : > { %v7239_v37 = vpop.f32.mrf.mxu1 }
 0x3c8   : > { %v7459_v60 = vsel %vm331_vm0, %v13394_v54, 0.0  ;;  %v7390_v22 = vadd.f32 %v7239_v37, %v7001_v18  ;;  %v13409_v63 = vadd.f32 %v13382_v61, %v7391_v34  ;;  %v6231_v34 = vadd.f32 %v13135_v33, %v13140_v25 }
 0x3c9   : > { %v10121_v43 = vpop.f32.mrf.mxu1  ;;  %v7461_v29 = vadd.f32 %v7460_v48, %v7459_v60  ;;  %v6233_v48 = vadd.f32 %v13143_v47, %v13148_v10 }
 0x3ca   : > { %v13412_v2 = vadd.f32 %v13382_v61, %v7390_v22  ;;  %v7393_v39 = vadd.f32 %v10121_v43, %v7004_v12  ;;  %v7464_v55 = vsel %vm331_vm0, %v13409_v63, 0.0  ;;  %v7007_v22 = vadd.f32 %v13317_v27, %v6618_v19 }
 0x3cb   : > { %v7249_v11 = vpop.f32.mrf.mxu1  ;;  %v7010_v27 = vadd.f32 %v13324_v45, %v13275_v13  ;;  %v6235_v19 = vadd.f32 %v13154_v4, %v13160_v51 }
 0x3cc   : > { %v7462_v14 = vsel %vm331_vm0, %v13412_v2, 0.0  ;;  %v7392_v40 = vadd.f32 %v7249_v11, %v7003_v44  ;;  %v13427_v6 = vadd.f32 %v13382_v61, %v7393_v39  ;;  %v6620_v44 = vadd.f32 %v13278_v15, %v6231_v34  ;;  %v13454_v15 = vpop.f32.mrf.mxu0 }
 0x3cd   : > { %v7463_v16 = vadd.f32 %v7462_v14, %v7461_v29  ;;  %v10124_v18 = vpop.f32.mrf.mxu1  ;;  %v6622_v14 = vadd.f32 %v13296_v57, %v6233_v48  ;;  %v7012_v57 = vadd.f32 %v13338_v8, %v13294_v49 }
 0x3ce   : > { %v13430_v35 = vadd.f32 %v13382_v61, %v7392_v40  ;;  %v7395_v26 = vadd.f32 %v10124_v18, %v7006_v28  ;;  %v7468_v33 = vsel %vm331_vm0, %v13427_v6, 0.0  ;;  %v7009_v28 = vadd.f32 %v13331_v58, %v6620_v44  ;;  %v13472_v58 = vpop.f32.mrf.mxu0 }
 0x3cf   : > { %v7465_v31 = vadd.f32 %v7464_v55, %v7463_v16  ;;  %v7259_v37 = vpop.f32.mrf.mxu1  ;;  %v7011_v34 = vadd.f32 %v13345_v46, %v6622_v14 }
 0x3d0   : > { %v7466_v12 = vsel %vm331_vm0, %v13430_v35, 0.0  ;;  %v7394_v60 = vadd.f32 %v7259_v37, %v7005_v17  ;;  %v13445_v25 = vadd.f32 %v13382_v61, %v7395_v26  ;;  %v13490_v46 = vpop.f32.mrf.mxu0 }
 0x3d1   : > { %v7467_v53 = vadd.f32 %v7466_v12, %v7465_v31  ;;  %v10127_v43 = vpop.f32.mrf.mxu1  ;;  %v6624_v31 = vadd.f32 %v13308_v24, %v6235_v19  ;;  %v6237_v12 = vadd.f32 %v13163_v9, %v13168_v20  ;;  %v7014_v24 = vadd.f32 %v13352_v50, %v13306_v62 }
 0x3d2   : > { %v13448_v52 = vadd.f32 %v13382_v61, %v7394_v60  ;;  %v7397_v5 = vadd.f32 %v10127_v43, %v7008_v1  ;;  %v7472_v47 = vsel %vm331_vm0, %v13445_v25, 0.0 }
 0x3d3   : > { %v7469_v39 = vadd.f32 %v7468_v33, %v7467_v53  ;;  %v7269_v7 = vpop.f32.mrf.mxu1  ;;  %v7013_v43 = vadd.f32 %v13361_v41, %v6624_v31  ;;  %v6626_v33 = vadd.f32 %v13315_v38, %v6237_v12  ;;  %v14239_v41 = vld [vmem:[#allocation83_spill] sm:$0xff] }
 0x3d4   : > { %v7470_v29 = vsel %vm331_vm0, %v13448_v52, 0.0  ;;  %v7396_v11 = vadd.f32 %v7269_v7, %v7007_v22  ;;  %v13463_v10 = vadd.f32 %v13382_v61, %v7397_v5  ;;  %v7016_v38 = vadd.f32 %v13373_v56, %v14239_v41 }
 0x3d5   : > { %v7471_v40 = vadd.f32 %v7470_v29, %v7469_v39  ;;  %v10130_v17 = vpop.f32.mrf.mxu1  ;;  %v14238_v39 = vld [vmem:[#allocation39_spill] sm:$0xff] }
 0x3d6   : > { %v13466_v13 = vadd.f32 %v13382_v61, %v7396_v11  ;;  %v7399_v45 = vadd.f32 %v10130_v17, %v7010_v27  ;;  %v7476_v4 = vsel %vm331_vm0, %v13463_v10, 0.0  ;;  %v6239_v7 = vadd.f32 %v14238_v39, %v13176_v0  ;;  %v10095_v11 = vpop.f32.mrf.mxu0  ;;  %v14240_v17 = vld [vmem:[#allocation15_spill] sm:$0xff] }
 0x3d7   : > { %v7473_v16 = vadd.f32 %v7472_v47, %v7471_v40  ;;  %v7279_v18 = vpop.f32.mrf.mxu1  ;;  %v7015_v40 = vadd.f32 %v13386_v32, %v6626_v33  ;;  %v14243_v32 = vld [vmem:[#allocation93_spill] sm:$0xff] }
 0x3d8   : > { %v7474_v55 = vsel %vm331_vm0, %v13466_v13, 0.0  ;;  %v7398_v26 = vadd.f32 %v7279_v18, %v7009_v28  ;;  %v13481_v51 = vadd.f32 %v13382_v61, %v7399_v45  ;;  %v6628_v47 = vadd.f32 %v14240_v17, %v6239_v7 }
 0x3d9   : > { %v7475_v37 = vadd.f32 %v7474_v55, %v7473_v16  ;;  %v10133_v1 = vpop.f32.mrf.mxu1  ;;  %v14242_v55 = vld [vmem:[#allocation87_spill] sm:$0xff] }
 0x3da   : > { %v13484_v49 = vadd.f32 %v13382_v61, %v7398_v26  ;;  %v7401_v8 = vadd.f32 %v10133_v1, %v7012_v57  ;;  %v7480_v9 = vsel %vm331_vm0, %v13481_v51, 0.0  ;;  %v14241_v57 = vld [vmem:[#allocation80_spill] sm:$0xff]  ;;  %v6960_v1 = vpop.f32.mrf.mxu0  ;;  %v7017_v12 = vadd.f32 %v13418_v23, %v6628_v47  ;;  %v14247_v23 = vld [vmem:[#allocation14_spill] sm:$0xff] }
 0x3db   : > { %v7477_v60 = vadd.f32 %v7476_v4, %v7475_v37  ;;  %v7289_v22 = vpop.f32.mrf.mxu1  ;;  %v6241_v26 = vadd.f32 %v14242_v55, %v14241_v57  ;;  %v7018_v37 = vadd.f32 %v13400_v42, %v14243_v32  ;;  %v7020_v7 = vadd.f32 %v13436_v36, %v14247_v23 }
 0x3dc   : > { %v7478_v44 = vsel %vm331_vm0, %v13484_v49, 0.0  ;;  %v7400_v53 = vadd.f32 %v7289_v22, %v7011_v34  ;;  %v13499_v20 = vadd.f32 %v13382_v61, %v7401_v8 }
 0x3dd   : > { %v7479_v5 = vadd.f32 %v7478_v44, %v7477_v60  ;;  %v10136_v48 = vpop.f32.mrf.mxu1  ;;  %v14244_v60 = vld [vmem:[#allocation16_spill] sm:$0xff] }
 0x3de   : > { %v13502_v62 = vadd.f32 %v13382_v61, %v7400_v53  ;;  %v7403_v50 = vadd.f32 %v10136_v48, %v7014_v24  ;;  %v7484_v16 = vsel %vm331_vm0, %v13499_v20, 0.0  ;;  %v6630_v22 = vadd.f32 %v14244_v60, %v6241_v26  ;;  %v14246_v48 = vld [vmem:[#allocation8_spill] sm:$0xff] }
 0x3df   : > { %v7481_v27 = vadd.f32 %v7480_v9, %v7479_v5  ;;  %v7299_v29 = vpop.f32.mrf.mxu1  ;;  %v14245_v5 = vld [vmem:[#allocation9_spill] sm:$0xff] }
 0x3e0   : > { %v7482_v28 = vsel %vm331_vm0, %v13502_v62, 0.0  ;;  %v7402_v14 = vadd.f32 %v7299_v29, %v7013_v43  ;;  %v13515_v0 = vadd.f32 %v13382_v61, %v7403_v50  ;;  %v6243_v9 = vadd.f32 %v14246_v48, %v14245_v5  ;;  %v14254_v5 = vld [vmem:[#allocation38_spill] sm:$0xff] }
 0x3e1   : > { %v7483_v45 = vadd.f32 %v7482_v28, %v7481_v27  ;;  %v10139_v19 = vpop.f32.mrf.mxu1  ;;  %v10098_v27 = vpop.f32.mrf.mxu0  ;;  %v14248_v28 = vld [vmem:[#allocation41_spill] sm:$0xff] }
 0x3e2   : > { %v13518_v18 = vadd.f32 %v13382_v61, %v7402_v14  ;;  %v7405_v56 = vadd.f32 %v10139_v19, %v7016_v38  ;;  %v7488_v53 = vsel %vm331_vm0, %v13515_v0, 0.0  ;;  %v7019_v38 = vadd.f32 %v13454_v15, %v6630_v22  ;;  %v14251_v15 = vld [vmem:[#allocation42_spill] sm:$0xff] }
 0x3e3   : > { %v7485_v34 = vadd.f32 %v7484_v16, %v7483_v45  ;;  %v7309_v31 = vpop.f32.mrf.mxu1  ;;  %v6632_v14 = vadd.f32 %v14248_v28, %v6243_v9  ;;  %v14249_v16 = vld [vmem:[#allocation12_spill] sm:$0xff] }
 0x3e4   : > { %v7486_v4 = vsel %vm331_vm0, %v13518_v18, 0.0  ;;  %v7404_v8 = vadd.f32 %v7309_v31, %v7015_v40  ;;  %v13531_v43 = vadd.f32 %v13382_v61, %v7405_v56  ;;  %v14250_v56 = vld [vmem:[#allocation13_spill] sm:$0xff]  ;;  %v6970_v31 = vpop.f32.mrf.mxu0 }
 0x3e5   : > { %v7487_v24 = vadd.f32 %v7486_v4, %v7485_v34  ;;  %v10142_v44 = vpop.f32.mrf.mxu1  ;;  %v6245_v57 = vadd.f32 %v14250_v56, %v14249_v16  ;;  %v7022_v34 = vadd.f32 %v13472_v58, %v14251_v15  ;;  %v7021_v4 = vadd.f32 %v13490_v46, %v6632_v14  ;;  %v14255_v46 = vld [vmem:[#allocation85_spill] sm:$0xff]  ;;  %v14257_v16 = vld [vmem:[#allocation90_spill] sm:$0xff] }
 0x3e6   : > { %v13534_v33 = vadd.f32 %v13382_v61, %v7404_v8  ;;  %v7407_v42 = vadd.f32 %v10142_v44, %v7018_v37  ;;  %v7492_v47 = vsel %vm331_vm0, %v13531_v43, 0.0  ;;  %v14252_v8 = vld [vmem:[#allocation44_spill] sm:$0xff]  ;;  %v10101_v23 = vpop.f32.mrf.mxu0 }
 0x3e7   : > { %v7489_v50 = vadd.f32 %v7488_v53, %v7487_v24  ;;  %v7319_v39 = vpop.f32.mrf.mxu1 }
 0x3e8   : > { %v7490_v29 = vsel %vm331_vm0, %v13534_v33, 0.0  ;;  %v7406_v41 = vadd.f32 %v7319_v39, %v7017_v12  ;;  %v13547_v45 = vadd.f32 %v13382_v61, %v7407_v42  ;;  %v6634_v12 = vadd.f32 %v14252_v8, %v6245_v57  ;;  %v14253_v42 = vld [vmem:[#allocation37_spill] sm:$0xff] }
 0x3e9   : > { %v7491_v40 = vadd.f32 %v7490_v29, %v7489_v50  ;;  %v10145_v17 = vpop.f32.mrf.mxu1  ;;  %v6247_v48 = vadd.f32 %v14254_v5, %v14253_v42  ;;  %v7024_v39 = vadd.f32 %v10095_v11, %v14255_v46  ;;  %v14260_v42 = vld [vmem:[#allocation43_spill] sm:$0xff]  ;;  %v14261_v5 = vld [vmem:[#allocation40_spill] sm:$0xff] }
 0x3ea   : > { %v13550_v19 = vadd.f32 %v13382_v61, %v7406_v41  ;;  %v7409_v36 = vadd.f32 %v10145_v17, %v7020_v7  ;;  %v7496_v24 = vsel %vm331_vm0, %v13547_v45, 0.0  ;;  %v7023_v41 = vadd.f32 %v6960_v1, %v6634_v12  ;;  %v14258_v1 = vld [vmem:[#allocation47_spill] sm:$0xff] }
 0x3eb   : > { %v7493_v55 = vadd.f32 %v7492_v47, %v7491_v40  ;;  %v7329_v26 = vpop.f32.mrf.mxu1 }
 0x3ec   : > { %v7494_v32 = vsel %vm331_vm0, %v13550_v19, 0.0  ;;  %v7408_v37 = vadd.f32 %v7329_v26, %v7019_v38  ;;  %v13563_v44 = vadd.f32 %v13382_v61, %v7409_v36  ;;  %v6636_v38 = vadd.f32 %v13350_v21, %v6247_v48  ;;  %v14256_v36 = vld [vmem:[#allocation82_spill] sm:$0xff]  ;;  %v6980_v21 = vpop.f32.mrf.mxu0 }
 0x3ed   : > { %v7495_v60 = vadd.f32 %v7494_v32, %v7493_v55  ;;  %v10148_v22 = vpop.f32.mrf.mxu1  ;;  %v6249_v56 = vadd.f32 %v14257_v16, %v14256_v36  ;;  %v7026_v26 = vadd.f32 %v10098_v27, %v14258_v1  ;;  %v6251_v48 = vadd.f32 %v14261_v5, %v14260_v42 }
 0x3ee   : > { %v13566_v53 = vadd.f32 %v13382_v61, %v7408_v37  ;;  %v7411_v58 = vadd.f32 %v10148_v22, %v7022_v34  ;;  %v7500_v40 = vsel %vm331_vm0, %v13563_v44, 0.0  ;;  %v7025_v32 = vadd.f32 %v6970_v31, %v6636_v38  ;;  %v14259_v37 = vld [vmem:[#allocation86_spill] sm:$0xff] }
 0x3ef   : > { %v7497_v9 = vadd.f32 %v7496_v24, %v7495_v60  ;;  %v7339_v50 = vpop.f32.mrf.mxu1  ;;  %v10104_v60 = vpop.f32.mrf.mxu0 }
 0x3f0   : > { %v7498_v7 = vsel %vm331_vm0, %v13566_v53, 0.0  ;;  %v7410_v29 = vadd.f32 %v7339_v50, %v7021_v4  ;;  %v13577_v17 = vadd.f32 %v13382_v61, %v7411_v58  ;;  %v6638_v4 = vadd.f32 %v14259_v37, %v6249_v56  ;;  %v14262_v50 = vld [vmem:[#allocation98_spill] sm:$0xff] }
 0x3f1   : > { %v7499_v28 = vadd.f32 %v7498_v7, %v7497_v9  ;;  %v10151_v14 = vpop.f32.mrf.mxu1  ;;  %v7028_v46 = vadd.f32 %v10101_v23, %v14262_v50 }
 0x3f2   : > { %v13580_v47 = vadd.f32 %v13382_v61, %v7410_v29  ;;  %v7413_v11 = vadd.f32 %v10151_v14, %v7024_v39  ;;  %v7504_v22 = vsel %vm331_vm0, %v13577_v17, 0.0  ;;  %v7027_v29 = vadd.f32 %v6980_v21, %v6638_v4  ;;  %v6990_v14 = vpop.f32.mrf.mxu0 }
 0x3f3   : > { %v7501_v57 = vadd.f32 %v7500_v40, %v7499_v28  ;;  %v7349_v55 = vpop.f32.mrf.mxu1 }
 0x3f4   : > { %v7502_v15 = vsel %vm331_vm0, %v13580_v47, 0.0  ;;  %v7412_v34 = vadd.f32 %v7349_v55, %v7023_v41  ;;  %v13591_v24 = vadd.f32 %v13382_v61, %v7413_v11  ;;  %v6640_v41 = vadd.f32 %v13367_v30, %v6251_v48 }
 0x3f5   : > { %v7503_v8 = vadd.f32 %v7502_v15, %v7501_v57  ;;  %v10154_v12 = vpop.f32.mrf.mxu1  ;;  %v7030_v57 = vadd.f32 %v10104_v60, %v13365_v3 }
 0x3f6   : > { %v13594_v58 = vadd.f32 %v13382_v61, %v7412_v34  ;;  %v7415_v27 = vadd.f32 %v10154_v12, %v7026_v26  ;;  %v7508_v40 = vsel %vm331_vm0, %v13591_v24, 0.0  ;;  %v7029_v1 = vadd.f32 %v6990_v14, %v6640_v41 }
 0x3f7   : > { %v7505_v9 = vadd.f32 %v7504_v22, %v7503_v8  ;;  %v7359_v31 = vpop.f32.mrf.mxu1 }
 0x3f8   : > { %v7506_v39 = vsel %vm331_vm0, %v13594_v58, 0.0  ;;  %v7414_v7 = vadd.f32 %v7359_v31, %v7025_v32  ;;  %v13605_v11 = vadd.f32 %v13382_v61, %v7415_v27 }
 0x3f9   : > { %v7507_v38 = vadd.f32 %v7506_v39, %v7505_v9  ;;  %v10157_v28 = vpop.f32.mrf.mxu1 }
 0x3fa   : > { %v13608_v36 = vadd.f32 %v13382_v61, %v7414_v7  ;;  %v7417_v23 = vadd.f32 %v10157_v28, %v7028_v46  ;;  %v7512_v15 = vsel %vm331_vm0, %v13605_v11, 0.0 }
 0x3fb   : > { %v7509_v16 = vadd.f32 %v7508_v40, %v7507_v38  ;;  %v7369_v56 = vpop.f32.mrf.mxu1 }
 0x3fc   : > { %v7510_v30 = vsel %vm331_vm0, %v13608_v36, 0.0  ;;  %v7416_v55 = vadd.f32 %v7369_v56, %v7027_v29  ;;  %v13616_v34 = vadd.f32 %v13382_v61, %v7417_v23  ;;  %v7612_v56 = vld [vmem:[%s13902_s8] sm:$0x1] }
 0x3fd   : > { %v7511_v26 = vadd.f32 %v7510_v30, %v7509_v16  ;;  %v10160_v21 = vpop.f32.mrf.mxu1 }
 0x3fe   : > { %v13619_v32 = vadd.f32 %v13382_v61, %v7416_v55  ;;  %v7419_v37 = vadd.f32 %v10160_v21, %v7030_v57  ;;  %v7516_v22 = vsel %vm331_vm0, %v13616_v34, 0.0 }
 0x3ff   : > { %v7513_v4 = vadd.f32 %v7512_v15, %v7511_v26  ;;  %v7379_v8 = vpop.f32.mrf.mxu1  ;;  %v7692_v15 = vlaneseq }
 0x400   : > { %v7514_v3 = vsel %vm331_vm0, %v13619_v32, 0.0  ;;  %v7418_v12 = vadd.f32 %v7379_v8, %v7029_v1  ;;  %v13626_v27 = vadd.f32 %v13382_v61, %v7419_v37 }
 0x401   : > { %v7515_v60 = vadd.f32 %v7514_v3, %v7513_v4  ;;  %v7693_v37 = vshrl.u32 %v7692_v15, 7  ;;  %v7749_v15 = vld [vmem:[%s10511_s16 + $0xa8] sm:$0xff] }
 0x402   : > { %v13629_v42 = vadd.f32 %v13382_v61, %v7418_v12  ;;  %v7520_v31 = vsel %vm331_vm0, %v13626_v27, 0.0  ;;  %v7533_v61 = vld [vmem:[%s13900_s6] sm:$0x1] }
 0x403   : > { %v7517_v5 = vadd.f32 %v7516_v22, %v7515_v60  ;;  %v7694_v4 = vsub.s32 0, %v7693_v37  ;;  %v7751_v37 = vld [vmem:[%s10511_s16 + $0xb8] sm:$0xff] }
 0x404   : > { %v7518_v48 = vsel %vm331_vm0, %v13629_v42, 0.0 }
 0x405   : > { %v7519_v9 = vadd.f32 %v7518_v48, %v7517_v5 }
 0x407   : > { %v7521_v50 = vadd.f32 %v7520_v31, %v7519_v9 }
 0x409   : > { %v7522_v46 = vrot.slane %v7521_v50, 4 }
 0x40b   : > { %v7523_v39 = vadd.f32 %v7522_v46, %v7521_v50  ;;  %v7728_v46 = vld [vmem:[%s10511_s16] sm:$0xff] }
 0x40d   : > { %v7524_v7 = vrot.slane %v7523_v39, 2 }
 0x40f   : > { %v7525_v29 = vadd.f32 %v7524_v7, %v7523_v39  ;;  %v7730_v39 = vld [vmem:[%s10511_s16 + $0x10] sm:$0xff]  ;;  %v7735_v7 = vld [vmem:[%s10511_s16 + $0x38] sm:$0xff] }
 0x411   : > { %v7526_v41 = vrot.slane %v7525_v29, 1 }
 0x413   : > { %v7527_v38 = vadd.f32 %v7526_v41, %v7525_v29  ;;  %v7737_v41 = vld [vmem:[%s10511_s16 + $0x48] sm:$0xff] }
 0x415   : > { %v7528_v28 = vmul.f32 0.00390625, %v7527_v38  ;;  %v7736_v38 = vld [vmem:[%s10511_s16 + $0x40] sm:$0xff] }
 0x417   : > { %10170 = vmatmul.mubr.msk.f32.vlgmr.msra.gmra.mxu0 %vm331_vm0, %v7528_v28  ;;  %v7739_v28 = vld [vmem:[%s10511_s16 + $0x58] sm:$0xff] }
 0x4d7   : > { %v7603_v14 = vpop.f32.mrf.mxu0 }
 0x4d8   : > { %v7604_v40 = vadd.f32 %v7603_v14, %v7533_v61  ;;  %v7741_v14 = vld [vmem:[%s10511_s16 + $0x68] sm:$0xff] }
 0x4d9   : > { %v10171_v23 = vpop.f32.mrf.mxu0 }
 0x4da   : > { %v7607_v16 = vmax.f32 %v7604_v40, 0.0  ;;  %v7740_v40 = vld [vmem:[%s10511_s16 + $0x60] sm:$0xff] }
 0x4dc   : > { %10181 = vmatmul.mubr.msk.f32.vlgmr.msra.gmra.mxu1 %vm331_vm0, %v7607_v16  ;;  %v7742_v16 = vld [vmem:[%s10511_s16 + $0x70] sm:$0xff] }
 0x59c   : > { %v7682_v57 = vpop.f32.mrf.mxu1 }
 0x59d   : > { %v7683_v30 = vadd.f32 %v7682_v57, %v7612_v56  ;;  %v7745_v56 = vld [vmem:[%s10511_s16 + $0x88] sm:$0xff] }
 0x59e   : > { %v10182_v55 = vpop.f32.mrf.mxu1 }
 0x59f   : > { %v8487_v1 = vmul.f32 -1.442695, %v7683_v30  ;;  %v7747_v30 = vld [vmem:[%s10511_s16 + $0x98] sm:$0xff]  ;;  %v7746_v55 = vld [vmem:[%s10511_s16 + $0x90] sm:$0xff] }
 0x5a1   : > { %10226 = vpow2.f32 %v8487_v1 }
 0x5ae   : > { %v10227_v26 = vpop.eup %10226 }
 0x5af   : > { %v7689_v21 = vadd.f32 1.0, %v10227_v26 }
 0x5b1   : > { %10228 = vrcp.f32 %v7689_v21 }
 0x5be   : > { %v10229_v8 = vpop.eup %10228 }
 0x5bf   : > { %v7695_v3 = vrot.slane %v10229_v8, %v7694_v4 }
 0x5c1   : > { %v7696_v12 = vmul.f32 %v7695_v3, %v13394_v54  ;;  %v7697_v60 = vmul.f32 %v7695_v3, %v13391_v59  ;;  %v7698_v22 = vmul.f32 %v7695_v3, %v13412_v2  ;;  %v7699_v5 = vmul.f32 %v7695_v3, %v13409_v63 }
 0x5c2   : > { %v7700_v48 = vmul.f32 %v7695_v3, %v13430_v35  ;;  %v7701_v9 = vmul.f32 %v7695_v3, %v13427_v6  ;;  %v7702_v31 = vmul.f32 %v7695_v3, %v13448_v52  ;;  %v7703_v50 = vmul.f32 %v7695_v3, %v13445_v25  ;;  %v7729_v35 = vld [vmem:[%s10511_s16 + $0x8] sm:$0xff]  ;;  %v7731_v6 = vld [vmem:[%s10511_s16 + $0x18] sm:$0xff] }
 0x5c3   : > { %v7704_v54 = vmul.f32 %v7695_v3, %v13466_v13  ;;  %v7705_v59 = vmul.f32 %v7695_v3, %v13463_v10  ;;  %v7706_v63 = vmul.f32 %v7695_v3, %v13484_v49  ;;  %v7707_v2 = vmul.f32 %v7695_v3, %v13481_v51  ;;  %v7733_v51 = vld [vmem:[%s10511_s16 + $0x28] sm:$0xff]  ;;  %v7732_v49 = vld [vmem:[%s10511_s16 + $0x20] sm:$0xff] }
 0x5c4   : > { %v13661_v52 = vmul.f32 %v7695_v3, %v13502_v62  ;;  %v13664_v25 = vmul.f32 %v7695_v3, %v13499_v20  ;;  %v13667_v13 = vmul.f32 %v7695_v3, %v13518_v18  ;;  %v13670_v10 = vmul.f32 %v7695_v3, %v13515_v0  ;;  %v7734_v62 = vld [vmem:[%s10511_s16 + $0x30] sm:$0xff] }
 0x5c5   : > { %v13681_v29 = vmul.f32 %v7695_v3, %v13534_v33  ;;  %v13684_v20 = vmul.f32 %v7695_v3, %v13531_v43  ;;  %v13687_v18 = vmul.f32 %v7695_v3, %v13550_v19  ;;  %v13690_v0 = vmul.f32 %v7695_v3, %v13547_v45  ;;  %v7738_v45 = vld [vmem:[%s10511_s16 + $0x50] sm:$0xff] }
 0x5c6   : > { %v13696_v61 = vmul.f32 %v7695_v3, %v13566_v53  ;;  %v13699_v33 = vmul.f32 %v7695_v3, %v13563_v44  ;;  %v13702_v43 = vmul.f32 %v7695_v3, %v13580_v47  ;;  %v13705_v19 = vmul.f32 %v7695_v3, %v13577_v17  ;;  %v7743_v17 = vld [vmem:[%s10511_s16 + $0x78] sm:$0xff] }
 0x5c7   : > { %v13711_v23 = vmul.f32 %v7695_v3, %v13594_v58  ;;  %v13714_v53 = vmul.f32 %v7695_v3, %v13591_v24  ;;  %v13717_v44 = vmul.f32 %v7695_v3, %v13608_v36  ;;  %v13720_v47 = vmul.f32 %v7695_v3, %v13605_v11  ;;  %v7744_v11 = vld [vmem:[%s10511_s16 + $0x80] sm:$0xff] }
 0x5c8   : > { %v13726_v57 = vmul.f32 %v7695_v3, %v13619_v32  ;;  %v13729_v58 = vmul.f32 %v7695_v3, %v13616_v34  ;;  %v13732_v24 = vmul.f32 %v7695_v3, %v13629_v42  ;;  %v13735_v36 = vmul.f32 %v7695_v3, %v13626_v27  ;;  %v7748_v34 = vld [vmem:[%s10511_s16 + $0xa0] sm:$0xff]  ;;  %v7750_v3 = vld [vmem:[%s10511_s16 + $0xb0] sm:$0xff] }
 0x5c9   : > { %v7760_v1 = vadd.f32 %v7728_v46, %v7696_v12  ;;  %v7761_v26 = vadd.f32 %v7729_v35, %v7697_v60  ;;  %v7762_v21 = vadd.f32 %v7730_v39, %v7698_v22  ;;  %v7763_v32 = vadd.f32 %v7731_v6, %v7699_v5  ;;  %v7755_v22 = vld [vmem:[%s10511_s16 + $0xd8] sm:$0xff]  ;;  %v7754_v5 = vld [vmem:[%s10511_s16 + $0xd0] sm:$0xff] }
 0x5ca   : > { %14263 = vst [vmem:[#allocation17_spill] sm:$0xff] %v13726_v57  ;;  %14264 = vst [vmem:[#allocation18_spill] sm:$0xff] %v13729_v58  ;;  %v7764_v4 = vadd.f32 %v7732_v49, %v7700_v48  ;;  %v7765_v42 = vadd.f32 %v7733_v51, %v7701_v9  ;;  %v7766_v8 = vadd.f32 %v7734_v62, %v7702_v31  ;;  %v7757_v48 = vld [vmem:[%s10511_s16 + $0xe8] sm:$0xff] }
 0x5cb   : > { %14265 = vst [vmem:[#allocation46_spill] sm:$0xff] %v13732_v24  ;;  %14266 = vst [vmem:[#allocation45_spill] sm:$0xff] %v13735_v36  ;;  %v7767_v27 = vadd.f32 %v7735_v7, %v7703_v50  ;;  %v7753_v36 = vld [vmem:[%s10511_s16 + $0xc8] sm:$0xff]  ;;  %v7752_v24 = vld [vmem:[%s10511_s16 + $0xc0] sm:$0xff]  ;;  %v7768_v58 = vadd.f32 %v7736_v38, %v7704_v54  ;;  %v7769_v57 = vadd.f32 %v7737_v41, %v7705_v59 }
 0x5cc   : > { %v7770_v12 = vadd.f32 %v7738_v45, %v7706_v63  ;;  %v7771_v60 = vadd.f32 %v7739_v28, %v7707_v2  ;;  %7792 = vst.msk [vmem:[%s13747_s29] sm:$0xff] %vm331_vm0, %v7760_v1  ;;  %7793 = vst.msk [vmem:[%s13747_s29 + $0x8] sm:$0xff] %vm331_vm0, %v7761_v26  ;;  %v7772_v9 = vadd.f32 %v7740_v40, %v13661_v52  ;;  %v7756_v59 = vld [vmem:[%s10511_s16 + $0xe0] sm:$0xff]  ;;  %v7759_v63 = vld [vmem:[%s10511_s16 + $0xf8] sm:$0xff] }
 0x5cd   : > { %7794 = vst.msk [vmem:[%s13747_s29 + $0x10] sm:$0xff] %vm331_vm0, %v7762_v21  ;;  %7795 = vst.msk [vmem:[%s13747_s29 + $0x18] sm:$0xff] %vm331_vm0, %v7763_v32  ;;  %v7773_v31 = vadd.f32 %v7741_v14, %v13664_v25  ;;  %v7774_v50 = vadd.f32 %v7742_v16, %v13667_v13  ;;  %v7775_v54 = vadd.f32 %v7743_v17, %v13670_v10  ;;  %v7758_v2 = vld [vmem:[%s10511_s16 + $0xf0] sm:$0xff] }
 0x5ce   : > { %7796 = vst.msk [vmem:[%s13747_s29 + $0x20] sm:$0xff] %vm331_vm0, %v7764_v4  ;;  %7797 = vst.msk [vmem:[%s13747_s29 + $0x28] sm:$0xff] %vm331_vm0, %v7765_v42  ;;  %v7776_v35 = vadd.f32 %v7744_v11, %v13681_v29  ;;  %v7777_v46 = vadd.f32 %v7745_v56, %v13684_v20  ;;  %v7778_v6 = vadd.f32 %v7746_v55, %v13687_v18 }
 0x5cf   : > { %7798 = vst.msk [vmem:[%s13747_s29 + $0x30] sm:$0xff] %vm331_vm0, %v7766_v8  ;;  %7799 = vst.msk [vmem:[%s13747_s29 + $0x38] sm:$0xff] %vm331_vm0, %v7767_v27  ;;  %v7779_v39 = vadd.f32 %v7747_v30, %v13690_v0  ;;  %v7780_v52 = vadd.f32 %v7748_v34, %v13696_v61  ;;  %v7781_v25 = vadd.f32 %v7749_v15, %v13699_v33 }
 0x5d0   : > { %7800 = vst.msk [vmem:[%s13747_s29 + $0x40] sm:$0xff] %vm331_vm0, %v7768_v58  ;;  %7801 = vst.msk [vmem:[%s13747_s29 + $0x48] sm:$0xff] %vm331_vm0, %v7769_v57  ;;  %v7782_v13 = vadd.f32 %v7750_v3, %v13702_v43  ;;  %v7783_v10 = vadd.f32 %v7751_v37, %v13705_v19  ;;  %v7784_v51 = vadd.f32 %v7752_v24, %v13711_v23 }
 0x5d1   : > { %7802 = vst.msk [vmem:[%s13747_s29 + $0x50] sm:$0xff] %vm331_vm0, %v7770_v12  ;;  %7803 = vst.msk [vmem:[%s13747_s29 + $0x58] sm:$0xff] %vm331_vm0, %v7771_v60  ;;  %v7785_v49 = vadd.f32 %v7753_v36, %v13714_v53  ;;  %v7786_v7 = vadd.f32 %v7754_v5, %v13717_v44  ;;  %v7787_v62 = vadd.f32 %v7755_v22, %v13720_v47  ;;  %v14267_v29 = vld [vmem:[#allocation17_spill] sm:$0xff]  ;;  %v14268_v18 = vld [vmem:[#allocation18_spill] sm:$0xff] }
 0x5d2   : > { %7804 = vst.msk [vmem:[%s13747_s29 + $0x60] sm:$0xff] %vm331_vm0, %v7772_v9  ;;  %7805 = vst.msk [vmem:[%s13747_s29 + $0x68] sm:$0xff] %vm331_vm0, %v7773_v31  ;;  %v7788_v20 = vadd.f32 %v7756_v59, %v14267_v29  ;;  %v7789_v0 = vadd.f32 %v7757_v48, %v14268_v18  ;;  %v14269_v41 = vld [vmem:[#allocation46_spill] sm:$0xff]  ;;  %v14270_v28 = vld [vmem:[#allocation45_spill] sm:$0xff] }
 0x5d3   : > { %7806 = vst.msk [vmem:[%s13747_s29 + $0x70] sm:$0xff] %vm331_vm0, %v7774_v50  ;;  %7807 = vst.msk [vmem:[%s13747_s29 + $0x78] sm:$0xff] %vm331_vm0, %v7775_v54  ;;  %v7790_v38 = vadd.f32 %v7758_v2, %v14269_v41  ;;  %v7791_v61 = vadd.f32 %v7759_v63, %v14270_v28 }
 0x5d4   : > { %7808 = vst.msk [vmem:[%s13747_s29 + $0x80] sm:$0xff] %vm331_vm0, %v7776_v35  ;;  %7809 = vst.msk [vmem:[%s13747_s29 + $0x88] sm:$0xff] %vm331_vm0, %v7777_v46 }
 0x5d5   : > { %7810 = vst.msk [vmem:[%s13747_s29 + $0x90] sm:$0xff] %vm331_vm0, %v7778_v6  ;;  %7811 = vst.msk [vmem:[%s13747_s29 + $0x98] sm:$0xff] %vm331_vm0, %v7779_v39 }
 0x5d6   : > { %7812 = vst.msk [vmem:[%s13747_s29 + $0xa0] sm:$0xff] %vm331_vm0, %v7780_v52  ;;  %7813 = vst.msk [vmem:[%s13747_s29 + $0xa8] sm:$0xff] %vm331_vm0, %v7781_v25 }
 0x5d7   : > { %7814 = vst.msk [vmem:[%s13747_s29 + $0xb0] sm:$0xff] %vm331_vm0, %v7782_v13  ;;  %7815 = vst.msk [vmem:[%s13747_s29 + $0xb8] sm:$0xff] %vm331_vm0, %v7783_v10 }
 0x5d8   : > { %7816 = vst.msk [vmem:[%s13747_s29 + $0xc0] sm:$0xff] %vm331_vm0, %v7784_v51  ;;  %7817 = vst.msk [vmem:[%s13747_s29 + $0xc8] sm:$0xff] %vm331_vm0, %v7785_v49 }
 0x5d9   : > { %7818 = vst.msk [vmem:[%s13747_s29 + $0xd0] sm:$0xff] %vm331_vm0, %v7786_v7  ;;  %7819 = vst.msk [vmem:[%s13747_s29 + $0xd8] sm:$0xff] %vm331_vm0, %v7787_v62 }
 0x5da   : > { %7820 = vst.msk [vmem:[%s13747_s29 + $0xe0] sm:$0xff] %vm331_vm0, %v7788_v20  ;;  %7821 = vst.msk [vmem:[%s13747_s29 + $0xe8] sm:$0xff] %vm331_vm0, %v7789_v0 }
 0x5db   : > { %7822 = vst.msk [vmem:[%s13747_s29 + $0xf0] sm:$0xff] %vm331_vm0, %v7790_v38  ;;  %7823 = vst.msk [vmem:[%s13747_s29 + $0xf8] sm:$0xff] %vm331_vm0, %v7791_v61 }
 0x5dc   : > { %10243 = shalt.err (!%p10240_p3)
}
 0x5dd   : > { %s10244_s27 = scalar_lea.hbm %s13818_s22, 4096  ;;  %s10248_s14 = scalar_lea.hbm %s13903_s9, 8192 }
 0x5de   : > { %p10245_p4 = scmp.ne.s32.totalorder %s13818_s22, %s10244_s27  ;;  %p10249_p9 = scmp.lt.s32.totalorder %s13818_s22, %s13903_s9 }
 0x5df   : > { %p10250_p10 = scmp.lt.s32.totalorder %s10248_s14, %s10244_s27 }
 0x5e0   : > { %p10246_p7 = pnand %p10245_p4, %p10385_p5 }
 0x5e1   : > { %p10251_p11 = por %p10250_p10, %p10249_p9 }
 0x5e2   : > { %p10247_p8 = pneg %p10246_p7 }
 0x5e4   : > { %p10252_p12 = pnand %p10251_p11, %p10247_p8 }
 0x5e6   : > { %10255 = shalt.err (!%p10252_p12)
}
 0x5e7   : > { %s10295_s23 = smov 128   ;;  %s10296_s24 = smov 8  }
 0x5e8   : > { %10183 = dma.vmem_to_hbm [thread:$0]  (%p10385_p5), %s13822_s17, 4096, %s13818_s22, %s13854_s13, %s10295_s23, %s10295_s23, %s10296_s24  }
 0x5e9 PF: > { %p10189_p13 = scmp.ge.s32.totalorder %s10290_s12, 2  ;;  %s7853_s25 = sand.u32 1, %s10278_s30  }
 0x5ea   : > { %s7854_s26 = scalar_lea.sflag [#allocation4], %s7853_s25 }
 0x5eb   : > { %p10186_p0 = pnand %p10189_p13, %p10389_p6 }
 0x5ed   : > { %p10187_p1 = pneg %p10186_p0 }
 0x5ef   : > { %10273 = dma.done.wait (%p10187_p1), %s7854_s26, 4096  }
 0x5f0   : > { %10275 = vsyncadd (%p10187_p1), %s7854_s26, 4294963200  ;;  %p19_p2 = scmp.ge.s32.totalorder %s10372_s15, 4   ;;  %s14271_s30 = smov %s10282_s10 }
 0x5f1   : > { %s14272_s10 = smov %s10286_s11  ;;  %s14273_s11 = smov %s10383_s18 }
 0x5f2   : > { %s14274_s12 = smov %s10372_s15  ;;  %21 = sbr.rel (!%p19_p2) target bundleno = 3 (0x3), region = 94 }
 0x5f7   :  { %7859 = vsyncpa [#allocation4], 1 }
 0x5f8   :  { %7861 = vsyncpa [#allocation4 + $0x1], 1 }

</bundles_post_ra>
